<compile_context>
chip_gen: v7x
topology: tpu7x:2x2x1
jax: 0.10.0
libtpu: 0.0.40
codegen_flags: <defaults>
</compile_context>

<pallas_src>
import numpy as np
import jax
import jax.numpy as jnp
from jax import lax
from jax.experimental import pallas as pl
from jax.experimental.pallas import tpu as pltpu

POOL_SIZES = (1, 2, 3)
NUM_CELLS = sum(s * s for s in POOL_SIZES)  # 14
EPS = 1e-5


def _bins(n, s):
    """PyTorch adaptive pooling bin boundaries."""
    return [(int(np.floor(i * n / s)), int(np.ceil((i + 1) * n / s))) for i in range(s)]


def _build_cells(H, W):
    """All 14 SPP cells in PyTorch SPP order: (size, row-bin, col-bin)."""
    cells = []
    for s in POOL_SIZES:
        for (hs, he) in _bins(H, s):
            for (ws, we) in _bins(W, s):
                cells.append((hs, he, ws, we))
    return cells


# ----------------------------- Pallas kernel ------------------------------- #
def _sig(z):
    # sigmoid via exp (EUP) + approximate reciprocal (EUP) -- VPU stays free.
    return pl.reciprocal(1.0 + jnp.exp(-z), approx=True)


def _windowed_max(arr, width, stride, axis_len):
    """max over lane offsets {p, p+stride, ..., p+(width-1)*stride} via a
    doubling roll/max tree.  Exact for every lane p whose window stays in
    bounds (the only lanes the caller reads)."""
    cur = arr
    covered = 1
    while covered < width:
        step = min(covered, width - covered)
        shift = (axis_len - step * stride) % axis_len  # == roll by -step*stride
        cur = jnp.maximum(cur, pltpu.roll(cur, shift=shift, axis=1))
        covered += step
    return cur


def make_attention_kernel(H, W, groups, block_batch):
    HW = H * W

    def kernel(x_ref, mavg_ref, sel_ref, w1_ref, w2_ref,
               bnc_s_ref, bnc_b_ref, kstack_ref, bns_ref,
               xid_ref, xage_ref):
        for i in range(block_batch):
            x = x_ref[i]                               # (C, HW) f32, lane-dense
            C = x.shape[0]

            # --- SPP: avg via one matmul, max via roll-tree + exact gather matmul ---
            feat = jnp.dot(x, mavg_ref[...],
                           preferred_element_type=jnp.float32)        # (C, 14)
            for g, (colw, rowh) in enumerate(groups):
                m = _windowed_max(x, colw, 1, HW)      # column windows
                m = _windowed_max(m, rowh, W, HW)      # row windows
                feat = feat + jnp.dot(m, sel_ref[g],
                                      preferred_element_type=jnp.float32)

            # --- channel branch: single matmul over the flattened SPP vector ---
            featstack = jnp.concatenate(
                [feat[:, f:f + 1] for f in range(NUM_CELLS)], axis=0)  # (14*C, 1)
            hid = jnp.maximum(
                jnp.dot(w1_ref[...], featstack,
                        preferred_element_type=jnp.float32), 0.0)      # (HID, 1)
            ch = jnp.dot(w2_ref[...], hid,
                         preferred_element_type=jnp.float32)           # (C, 1)
            ch_scale = _sig(ch * bnc_s_ref[...] + bnc_b_ref[...])      # (C, 1)

            # --- spatial branch: channel max/mean -> fused banded 7x7 conv matmul ---
            x_max = jnp.max(x, axis=0, keepdims=True)                  # (1, HW)
            x_mean = jnp.sum(x, axis=0, keepdims=True) * (1.0 / C)     # (1, HW)
            sp_in = jnp.concatenate([x_max, x_mean], axis=1)           # (1, 2*HW)
            conv = jnp.dot(sp_in, kstack_ref[...],
                           preferred_element_type=jnp.float32)         # (1, HW)
            sp_scale = _sig(conv * bns_ref[0] + bns_ref[1])            # (1, HW)

            # --- combine (lane-dense epilogue, full-width stores) ---
            scale = 0.5 * ch_scale + 0.5 * sp_scale                    # (C, HW)
            x_age = x * scale
            xid_ref[i] = x - x_age
            xage_ref[i] = x_age

    return kernel


def attention_forward(x_sc, mavgT, sel, w1cat, w2, bnc_s, bnc_b, kstack, bns,
                      *, groups, H, W, block_batch):
    B, C, HW = x_sc.shape
    assert B % block_batch == 0
    steps = B // block_batch

    def _const(a):
        n = a.ndim
        return pl.BlockSpec(a.shape, lambda b, n=n: (0,) * n)

    kernel = make_attention_kernel(H, W, groups, block_batch)
    out_shape = (jax.ShapeDtypeStruct((B, C, HW), jnp.float32),
                 jax.ShapeDtypeStruct((B, C, HW), jnp.float32))
    return pl.pallas_call(
        kernel,
        out_shape=out_shape,
        grid=(steps,),
        in_specs=[
            pl.BlockSpec((block_batch, C, HW), lambda b: (b, 0, 0)),   # x
            _const(mavgT),                                             # avg-pool matrix
            _const(sel),                                               # max-pool gather matrices
            _const(w1cat),                                             # 1x1 conv #1 (flattened/permuted)
            _const(w2),                                                # 1x1 conv #2
            _const(bnc_s),                                             # folded BN (channel) scale
            _const(bnc_b),                                             # folded BN (channel) bias
            _const(kstack),                                            # fused 7x7 conv as banded matrix
            pl.BlockSpec(memory_space=pltpu.MemorySpace.SMEM),         # folded BN (spatial) scalars
        ],
        out_specs=(pl.BlockSpec((block_batch, C, HW), lambda b: (b, 0, 0)),
                   pl.BlockSpec((block_batch, C, HW), lambda b: (b, 0, 0))),
        compiler_params=pltpu.CompilerParams(dimension_semantics=("parallel",)),
    )(x_sc, mavgT, sel, w1cat, w2, bnc_s, bnc_b, kstack, bns)


# ------------------------------ glue builders ------------------------------ #
def build_avg_matrix(H, W):
    """(HW, 14): per-cell 1/area weights; feat_avg = x @ mavgT."""
    HW = H * W
    mavgT = np.zeros((HW, NUM_CELLS), np.float32)
    for cell, (hs, he, ws, we) in enumerate(_build_cells(H, W)):
        area = float((he - hs) * (we - ws))
        for h in range(hs, he):
            for w in range(ws, we):
                mavgT[h * W + w, cell] = 1.0 / area
    return jnp.asarray(mavgT)


def build_max_plan(H, W):
    """Group cells by (col-width, row-height) and build the 0/1 gather matrices
    that pick each cell's max (located at lane hs*W+ws of its group's windowed
    array) into the (C, 14) feature block."""
    HW = H * W
    cells = _build_cells(H, W)
    groups = []
    for (hs, he, ws, we) in cells:
        key = (we - ws, he - hs)
        if key not in groups:
            groups.append(key)
    sel = np.zeros((len(groups), HW, NUM_CELLS), np.float32)
    for cell, (hs, he, ws, we) in enumerate(cells):
        g = groups.index((we - ws, he - hs))
        sel[g, hs * W + ws, cell] = 1.0
    return groups, jnp.asarray(sel)


def build_w1cat(w1, C):
    """w1: (HID, 14*C) in PyTorch SPP-flatten order -> (HID, 14*C) with columns
    reordered to cell-major / channel-minor (cell*C + c), matching featstack."""
    perm = np.zeros(NUM_CELLS * C, np.int64)
    off = 0
    cell = 0
    for s in POOL_SIZES:
        for i in range(s):
            for j in range(s):
                for c in range(C):
                    perm[cell * C + c] = off + c * s * s + i * s + j
                cell += 1
        off += C * s * s
    return jnp.asarray(np.asarray(w1)[:, perm])


def build_conv_stack(w_sp, H, W):
    """w_sp: (1, 2, 7, 7) -> (2*HW, HW) fused banded matrix (zero pad, pad=3);
    conv_row = [chmax | chmean] (1, 2*HW) @ Kstack."""
    HW = H * W
    w_np = np.asarray(w_sp)
    K = np.zeros((2 * HW, HW), np.float32)
    for ci in range(2):
        for h in range(H):
            for w in range(W):
                p = h * W + w
                for kh in range(7):
                    for kw in range(7):
                        hh, ww = h + kh - 3, w + kw - 3
                        if 0 <= hh < H and 0 <= ww < W:
                            K[ci * HW + hh * W + ww, p] = w_np[0, ci, kh, kw]
    return jnp.asarray(K)


# --------------------------- pure-JAX reference ----------------------------- #
def reference(x, w1, w2, w_sp, bnc_scale, bnc_bias, bns):
    B, C, H, W = x.shape
    feats = []
    for s in POOL_SIZES:
        avg, mx = [], []
        for (hs, he) in _bins(H, s):
            for (ws, we) in _bins(W, s):
                patch = x[:, :, hs:he, ws:we]
                avg.append(patch.mean(axis=(2, 3)))
                mx.append(patch.max(axis=(2, 3)))
        avg = jnp.stack(avg, axis=-1)
        mx = jnp.stack(mx, axis=-1)
        feats.append((avg + mx).reshape(B, C * s * s))
    channel_input = jnp.concatenate(feats, axis=1)                       # (B, 14C)
    hidden = jnp.maximum(jnp.dot(channel_input, w1.T, precision=lax.Precision.HIGHEST), 0.0)
    out = jnp.dot(hidden, w2.T, precision=lax.Precision.HIGHEST)
    ch_scale = 1.0 / (1.0 + jnp.exp(-(out * bnc_scale + bnc_bias)))      # (B, C)
    sp_in = jnp.stack([x.max(axis=1), x.mean(axis=1)], axis=1)           # (B, 2, H, W)
    conv = lax.conv_general_dilated(sp_in, w_sp, (1, 1), ((3, 3), (3, 3)),
                                    dimension_numbers=("NCHW", "OIHW", "NCHW"),
                                    precision=lax.Precision.HIGHEST)     # (B, 1, H, W)
    sp_scale = 1.0 / (1.0 + jnp.exp(-(conv * bns[0] + bns[1])))
    x_age = 0.5 * (x * ch_scale[:, :, None, None] + x * sp_scale)
    return x - x_age, x_age


# ---------------------------------- main ------------------------------------ #
if __name__ == "__main__":
    B, C, H, W = 2, 32, 16, 16
    reduction = 4
    HW = H * W
    big_c = C * NUM_CELLS           # 14 * C
    hid = big_c // reduction

    key = jax.random.PRNGKey(0)
    kx, k1, k2, k3 = jax.random.split(key, 4)
    x_nchw = jax.random.normal(kx, (B, C, H, W), jnp.float32)
    w1 = jax.random.normal(k1, (hid, big_c), jnp.float32) * 0.05      # Conv2d(14C, 14C/r, 1)
    w2 = jax.random.normal(k2, (C, hid), jnp.float32) * 0.05          # Conv2d(14C/r, C, 1)
    w_sp = jax.random.normal(k3, (1, 2, 7, 7), jnp.float32) * 0.05    # Conv2d(2, 1, 7)

    # Folded inference-mode BatchNorm params (PyTorch init: gamma=1, beta=0, mean=0, var=1)
    bnc_scale = jnp.full((C,), 1.0 / np.sqrt(1.0 + EPS), jnp.float32)
    bnc_bias = jnp.zeros((C,), jnp.float32)
    bns = jnp.array([1.0 / np.sqrt(1.0 + EPS), 0.0], jnp.float32)

    # Glue: pooling matrices, permuted/flattened 1x1 conv weight, fused 7x7 conv matrix.
    mavgT = build_avg_matrix(H, W)             # (HW, 14)
    groups, sel = build_max_plan(H, W)         # [(colw, rowh)...], (G, HW, 14)
    w1cat = build_w1cat(w1, C)                 # (HID, 14*C)
    kstack = build_conv_stack(w_sp, H, W)      # (2*HW, HW)

    # layout: NCHW -> (B, C, HW) is a pure reshape (no transpose).
    x_sc = x_nchw.reshape(B, C, HW)

    # 2 parallel grid steps when possible (one per v7x TensorCore); batch folded
    # into each step to amortize per-step overhead on single-TC v5e/v6e.
    num_steps = 2 if (B >= 2 and B % 2 == 0) else 1
    block_batch = B // num_steps

    x_id_sc, x_age_sc = attention_forward(
        x_sc, mavgT, sel, w1cat, w2,
        bnc_scale.reshape(C, 1), bnc_bias.reshape(C, 1), kstack, bns,
        groups=groups, H=H, W=W, block_batch=block_batch)
    jax.block_until_ready((x_id_sc, x_age_sc))

    x_id = x_id_sc.reshape(B, C, H, W)
    x_age = x_age_sc.reshape(B, C, H, W)

    ref_id, ref_age = reference(x_nchw, w1, w2, w_sp, bnc_scale, bnc_bias, bns)
    np.testing.assert_allclose(np.asarray(x_age), np.asarray(ref_age), rtol=5e-3, atol=5e-3)
    np.testing.assert_allclose(np.asarray(x_id), np.asarray(ref_id), rtol=5e-3, atol=5e-3)
    np.testing.assert_allclose(np.asarray(x_id + x_age), np.asarray(x_nchw), rtol=1e-6, atol=1e-6)

    print("KERNEL_OK")
</pallas_src>

<mosaic_0001>
module attributes {stable_mosaic.version = 11 : i64} {
  func.func @kernel(%arg0: i32, %arg1: memref<1x32x256xf32, #tpu.memory_space<vmem>>, %arg2: memref<256x14xf32, #tpu.memory_space<vmem>>, %arg3: memref<3x256x14xf32, #tpu.memory_space<vmem>>, %arg4: memref<112x448xf32, #tpu.memory_space<vmem>>, %arg5: memref<32x112xf32, #tpu.memory_space<vmem>>, %arg6: memref<32x1xf32, #tpu.memory_space<vmem>>, %arg7: memref<32x1xf32, #tpu.memory_space<vmem>>, %arg8: memref<512x256xf32, #tpu.memory_space<vmem>>, %arg9: memref<2xf32, #tpu.memory_space<smem>>, %arg10: memref<1x32x256xf32, #tpu.memory_space<vmem>>, %arg11: memref<1x32x256xf32, #tpu.memory_space<vmem>>) attributes {dimension_semantics = [#tpu.dimension_semantics<parallel>], iteration_bounds = array<i64: 2>, scalar_prefetch = 0 : i64, scratch_operands = 0 : i64, tpu.core_type = #tpu.core_type<tc>, window_params = [{transform_indices = @transform_0, window_bounds = array<i64: 1, 32, 256>}, {pipeline_mode = #tpu.pipeline_mode<synchronous>, transform_indices = @transform_1, window_bounds = array<i64: 256, 14>}, {pipeline_mode = #tpu.pipeline_mode<synchronous>, transform_indices = @transform_2, window_bounds = array<i64: 3, 256, 14>}, {pipeline_mode = #tpu.pipeline_mode<synchronous>, transform_indices = @transform_3, window_bounds = array<i64: 112, 448>}, {pipeline_mode = #tpu.pipeline_mode<synchronous>, transform_indices = @transform_4, window_bounds = array<i64: 32, 112>}, {pipeline_mode = #tpu.pipeline_mode<synchronous>, transform_indices = @transform_5, window_bounds = array<i64: 32, 1>}, {pipeline_mode = #tpu.pipeline_mode<synchronous>, transform_indices = @transform_6, window_bounds = array<i64: 32, 1>}, {pipeline_mode = #tpu.pipeline_mode<synchronous>, transform_indices = @transform_7, window_bounds = array<i64: 512, 256>}, {transform_indices = @transform_8, window_bounds = array<i64: 2>}, {transform_indices = @transform_9, window_bounds = array<i64: 1, 32, 256>}, {transform_indices = @transform_10, window_bounds = array<i64: 1, 32, 256>}]} {
    %c0 = arith.constant 0 : index
    %c0_0 = arith.constant 0 : index
    %c0_1 = arith.constant 0 : index
    %0 = vector.load %arg1[%c0, %c0_0, %c0_1] : memref<1x32x256xf32, #tpu.memory_space<vmem>>, vector<1x32x256xf32>
    %1 = vector.shape_cast %0 : vector<1x32x256xf32> to vector<32x256xf32>
    %c0_2 = arith.constant 0 : index
    %c0_3 = arith.constant 0 : index
    %2 = vector.load %arg2[%c0_2, %c0_3] : memref<256x14xf32, #tpu.memory_space<vmem>>, vector<256x14xf32>
    %cst = arith.constant dense<0.000000e+00> : vector<32x14xf32>
    %3 = tpu.matmul %1, %2, %cst {dimension_numbers = #tpu.dot_dimension_numbers<[1], [0], [0], [1], [0, 0, 1, 1], [], []>} : vector<32x256xf32>, vector<256x14xf32>, vector<32x14xf32> -> vector<32x14xf32>
    %c255_i32 = arith.constant 255 : i32
    %4 = tpu.dynamic_rotate %1 by %c255_i32 dim 1 : vector<32x256xf32>, i32 -> vector<32x256xf32>
    %5 = arith.maximumf %1, %4 : vector<32x256xf32>
    %c254_i32 = arith.constant 254 : i32
    %6 = tpu.dynamic_rotate %5 by %c254_i32 dim 1 : vector<32x256xf32>, i32 -> vector<32x256xf32>
    %7 = arith.maximumf %5, %6 : vector<32x256xf32>
    %c252_i32 = arith.constant 252 : i32
    %8 = tpu.dynamic_rotate %7 by %c252_i32 dim 1 : vector<32x256xf32>, i32 -> vector<32x256xf32>
    %9 = arith.maximumf %7, %8 : vector<32x256xf32>
    %c248_i32 = arith.constant 248 : i32
    %10 = tpu.dynamic_rotate %9 by %c248_i32 dim 1 : vector<32x256xf32>, i32 -> vector<32x256xf32>
    %11 = arith.maximumf %9, %10 : vector<32x256xf32>
    %c240_i32 = arith.constant 240 : i32
    %12 = tpu.dynamic_rotate %11 by %c240_i32 dim 1 : vector<32x256xf32>, i32 -> vector<32x256xf32>
    %13 = arith.maximumf %11, %12 : vector<32x256xf32>
    %c224_i32 = arith.constant 224 : i32
    %14 = tpu.dynamic_rotate %13 by %c224_i32 dim 1 : vector<32x256xf32>, i32 -> vector<32x256xf32>
    %15 = arith.maximumf %13, %14 : vector<32x256xf32>
    %c192_i32 = arith.constant 192 : i32
    %16 = tpu.dynamic_rotate %15 by %c192_i32 dim 1 : vector<32x256xf32>, i32 -> vector<32x256xf32>
    %17 = arith.maximumf %15, %16 : vector<32x256xf32>
    %c128_i32 = arith.constant 128 : i32
    %18 = tpu.dynamic_rotate %17 by %c128_i32 dim 1 : vector<32x256xf32>, i32 -> vector<32x256xf32>
    %19 = arith.maximumf %17, %18 : vector<32x256xf32>
    %c0_4 = arith.constant 0 : index
    %c0_5 = arith.constant 0 : index
    %c0_6 = arith.constant 0 : index
    %20 = vector.load %arg3[%c0_4, %c0_5, %c0_6] : memref<3x256x14xf32, #tpu.memory_space<vmem>>, vector<1x256x14xf32>
    %21 = vector.shape_cast %20 : vector<1x256x14xf32> to vector<256x14xf32>
    %cst_7 = arith.constant dense<0.000000e+00> : vector<32x14xf32>
    %22 = tpu.matmul %19, %21, %cst_7 {dimension_numbers = #tpu.dot_dimension_numbers<[1], [0], [0], [1], [0, 0, 1, 1], [], []>} : vector<32x256xf32>, vector<256x14xf32>, vector<32x14xf32> -> vector<32x14xf32>
    %23 = arith.addf %3, %22 : vector<32x14xf32>
    %c255_i32_8 = arith.constant 255 : i32
    %24 = tpu.dynamic_rotate %1 by %c255_i32_8 dim 1 : vector<32x256xf32>, i32 -> vector<32x256xf32>
    %25 = arith.maximumf %1, %24 : vector<32x256xf32>
    %c254_i32_9 = arith.constant 254 : i32
    %26 = tpu.dynamic_rotate %25 by %c254_i32_9 dim 1 : vector<32x256xf32>, i32 -> vector<32x256xf32>
    %27 = arith.maximumf %25, %26 : vector<32x256xf32>
    %c252_i32_10 = arith.constant 252 : i32
    %28 = tpu.dynamic_rotate %27 by %c252_i32_10 dim 1 : vector<32x256xf32>, i32 -> vector<32x256xf32>
    %29 = arith.maximumf %27, %28 : vector<32x256xf32>
    %c240_i32_11 = arith.constant 240 : i32
    %30 = tpu.dynamic_rotate %29 by %c240_i32_11 dim 1 : vector<32x256xf32>, i32 -> vector<32x256xf32>
    %31 = arith.maximumf %29, %30 : vector<32x256xf32>
    %c224_i32_12 = arith.constant 224 : i32
    %32 = tpu.dynamic_rotate %31 by %c224_i32_12 dim 1 : vector<32x256xf32>, i32 -> vector<32x256xf32>
    %33 = arith.maximumf %31, %32 : vector<32x256xf32>
    %c192_i32_13 = arith.constant 192 : i32
    %34 = tpu.dynamic_rotate %33 by %c192_i32_13 dim 1 : vector<32x256xf32>, i32 -> vector<32x256xf32>
    %35 = arith.maximumf %33, %34 : vector<32x256xf32>
    %c1 = arith.constant 1 : index
    %c0_14 = arith.constant 0 : index
    %c0_15 = arith.constant 0 : index
    %36 = vector.load %arg3[%c1, %c0_14, %c0_15] : memref<3x256x14xf32, #tpu.memory_space<vmem>>, vector<1x256x14xf32>
    %37 = vector.shape_cast %36 : vector<1x256x14xf32> to vector<256x14xf32>
    %cst_16 = arith.constant dense<0.000000e+00> : vector<32x14xf32>
    %38 = tpu.matmul %35, %37, %cst_16 {dimension_numbers = #tpu.dot_dimension_numbers<[1], [0], [0], [1], [0, 0, 1, 1], [], []>} : vector<32x256xf32>, vector<256x14xf32>, vector<32x14xf32> -> vector<32x14xf32>
    %39 = arith.addf %23, %38 : vector<32x14xf32>
    %c255_i32_17 = arith.constant 255 : i32
    %40 = tpu.dynamic_rotate %1 by %c255_i32_17 dim 1 : vector<32x256xf32>, i32 -> vector<32x256xf32>
    %41 = arith.maximumf %1, %40 : vector<32x256xf32>
    %c254_i32_18 = arith.constant 254 : i32
    %42 = tpu.dynamic_rotate %41 by %c254_i32_18 dim 1 : vector<32x256xf32>, i32 -> vector<32x256xf32>
    %43 = arith.maximumf %41, %42 : vector<32x256xf32>
    %c254_i32_19 = arith.constant 254 : i32
    %44 = tpu.dynamic_rotate %43 by %c254_i32_19 dim 1 : vector<32x256xf32>, i32 -> vector<32x256xf32>
    %45 = arith.maximumf %43, %44 : vector<32x256xf32>
    %c240_i32_20 = arith.constant 240 : i32
    %46 = tpu.dynamic_rotate %45 by %c240_i32_20 dim 1 : vector<32x256xf32>, i32 -> vector<32x256xf32>
    %47 = arith.maximumf %45, %46 : vector<32x256xf32>
    %c224_i32_21 = arith.constant 224 : i32
    %48 = tpu.dynamic_rotate %47 by %c224_i32_21 dim 1 : vector<32x256xf32>, i32 -> vector<32x256xf32>
    %49 = arith.maximumf %47, %48 : vector<32x256xf32>
    %c224_i32_22 = arith.constant 224 : i32
    %50 = tpu.dynamic_rotate %49 by %c224_i32_22 dim 1 : vector<32x256xf32>, i32 -> vector<32x256xf32>
    %51 = arith.maximumf %49, %50 : vector<32x256xf32>
    %c2 = arith.constant 2 : index
    %c0_23 = arith.constant 0 : index
    %c0_24 = arith.constant 0 : index
    %52 = vector.load %arg3[%c2, %c0_23, %c0_24] : memref<3x256x14xf32, #tpu.memory_space<vmem>>, vector<1x256x14xf32>
    %53 = vector.shape_cast %52 : vector<1x256x14xf32> to vector<256x14xf32>
    %cst_25 = arith.constant dense<0.000000e+00> : vector<32x14xf32>
    %54 = tpu.matmul %51, %53, %cst_25 {dimension_numbers = #tpu.dot_dimension_numbers<[1], [0], [0], [1], [0, 0, 1, 1], [], []>} : vector<32x256xf32>, vector<256x14xf32>, vector<32x14xf32> -> vector<32x14xf32>
    %55 = arith.addf %39, %54 : vector<32x14xf32>
    %56 = vector.extract_strided_slice %55 {offsets = [0, 0], sizes = [32, 1], strides = [1, 1]} : vector<32x14xf32> to vector<32x1xf32>
    %57 = vector.extract_strided_slice %55 {offsets = [0, 1], sizes = [32, 1], strides = [1, 1]} : vector<32x14xf32> to vector<32x1xf32>
    %58 = vector.extract_strided_slice %55 {offsets = [0, 2], sizes = [32, 1], strides = [1, 1]} : vector<32x14xf32> to vector<32x1xf32>
    %59 = vector.extract_strided_slice %55 {offsets = [0, 3], sizes = [32, 1], strides = [1, 1]} : vector<32x14xf32> to vector<32x1xf32>
    %60 = vector.extract_strided_slice %55 {offsets = [0, 4], sizes = [32, 1], strides = [1, 1]} : vector<32x14xf32> to vector<32x1xf32>
    %61 = vector.extract_strided_slice %55 {offsets = [0, 5], sizes = [32, 1], strides = [1, 1]} : vector<32x14xf32> to vector<32x1xf32>
    %62 = vector.extract_strided_slice %55 {offsets = [0, 6], sizes = [32, 1], strides = [1, 1]} : vector<32x14xf32> to vector<32x1xf32>
    %63 = vector.extract_strided_slice %55 {offsets = [0, 7], sizes = [32, 1], strides = [1, 1]} : vector<32x14xf32> to vector<32x1xf32>
    %64 = vector.extract_strided_slice %55 {offsets = [0, 8], sizes = [32, 1], strides = [1, 1]} : vector<32x14xf32> to vector<32x1xf32>
    %65 = vector.extract_strided_slice %55 {offsets = [0, 9], sizes = [32, 1], strides = [1, 1]} : vector<32x14xf32> to vector<32x1xf32>
    %66 = vector.extract_strided_slice %55 {offsets = [0, 10], sizes = [32, 1], strides = [1, 1]} : vector<32x14xf32> to vector<32x1xf32>
    %67 = vector.extract_strided_slice %55 {offsets = [0, 11], sizes = [32, 1], strides = [1, 1]} : vector<32x14xf32> to vector<32x1xf32>
    %68 = vector.extract_strided_slice %55 {offsets = [0, 12], sizes = [32, 1], strides = [1, 1]} : vector<32x14xf32> to vector<32x1xf32>
    %69 = vector.extract_strided_slice %55 {offsets = [0, 13], sizes = [32, 1], strides = [1, 1]} : vector<32x14xf32> to vector<32x1xf32>
    %70 = tpu.concatenate %56, %57, %58, %59, %60, %61, %62, %63, %64, %65, %66, %67, %68, %69 in 0 : vector<32x1xf32>, vector<32x1xf32>, vector<32x1xf32>, vector<32x1xf32>, vector<32x1xf32>, vector<32x1xf32>, vector<32x1xf32>, vector<32x1xf32>, vector<32x1xf32>, vector<32x1xf32>, vector<32x1xf32>, vector<32x1xf32>, vector<32x1xf32>, vector<32x1xf32> -> vector<448x1xf32>
    %c0_26 = arith.constant 0 : index
    %c0_27 = arith.constant 0 : index
    %71 = vector.load %arg4[%c0_26, %c0_27] : memref<112x448xf32, #tpu.memory_space<vmem>>, vector<112x448xf32>
    %cst_28 = arith.constant dense<0.000000e+00> : vector<112x1xf32>
    %72 = tpu.matmul %71, %70, %cst_28 {dimension_numbers = #tpu.dot_dimension_numbers<[1], [0], [0], [1], [0, 0, 1, 1], [], []>} : vector<112x448xf32>, vector<448x1xf32>, vector<112x1xf32> -> vector<112x1xf32>
    %cst_29 = arith.constant 0.000000e+00 : f32
    %73 = vector.broadcast %cst_29 : f32 to vector<112x1xf32>
    %74 = arith.maximumf %72, %73 : vector<112x1xf32>
    %c0_30 = arith.constant 0 : index
    %c0_31 = arith.constant 0 : index
    %75 = vector.load %arg5[%c0_30, %c0_31] : memref<32x112xf32, #tpu.memory_space<vmem>>, vector<32x112xf32>
    %cst_32 = arith.constant dense<0.000000e+00> : vector<32x1xf32>
    %76 = tpu.matmul %75, %74, %cst_32 {dimension_numbers = #tpu.dot_dimension_numbers<[1], [0], [0], [1], [0, 0, 1, 1], [], []>} : vector<32x112xf32>, vector<112x1xf32>, vector<32x1xf32> -> vector<32x1xf32>
    %c0_33 = arith.constant 0 : index
    %c0_34 = arith.constant 0 : index
    %77 = vector.load %arg6[%c0_33, %c0_34] : memref<32x1xf32, #tpu.memory_space<vmem>>, vector<32x1xf32>
    %78 = arith.mulf %76, %77 : vector<32x1xf32>
    %c0_35 = arith.constant 0 : index
    %c0_36 = arith.constant 0 : index
    %79 = vector.load %arg7[%c0_35, %c0_36] : memref<32x1xf32, #tpu.memory_space<vmem>>, vector<32x1xf32>
    %80 = arith.addf %78, %79 : vector<32x1xf32>
    %cst_37 = arith.constant 0.000000e+00 : f32
    %81 = vector.broadcast %cst_37 : f32 to vector<32x1xf32>
    %82 = arith.subf %81, %80 : vector<32x1xf32>
    %83 = math.exp %82 : vector<32x1xf32>
    %cst_38 = arith.constant 1.000000e+00 : f32
    %84 = vector.broadcast %cst_38 : f32 to vector<32x1xf32>
    %85 = arith.addf %84, %83 : vector<32x1xf32>
    %86 = tpu.reciprocal %85 {approx = true} : vector<32x1xf32> -> vector<32x1xf32>
    %cst_39 = arith.constant dense<0xFF800000> : vector<256xf32>
    %87 = vector.multi_reduction <maximumf>, %1, %cst_39 [0] : vector<32x256xf32> to vector<256xf32>
    %88 = vector.shape_cast %87 : vector<256xf32> to vector<1x256xf32>
    %cst_40 = arith.constant dense<0.000000e+00> : vector<256xf32>
    %89 = vector.multi_reduction <add>, %1, %cst_40 [0] : vector<32x256xf32> to vector<256xf32>
    %90 = vector.shape_cast %89 : vector<256xf32> to vector<1x256xf32>
    %cst_41 = arith.constant 3.125000e-02 : f32
    %91 = vector.broadcast %cst_41 : f32 to vector<1x256xf32>
    %92 = arith.mulf %90, %91 : vector<1x256xf32>
    %93 = tpu.concatenate %88, %92 in 1 : vector<1x256xf32>, vector<1x256xf32> -> vector<1x512xf32>
    %c0_42 = arith.constant 0 : index
    %c0_43 = arith.constant 0 : index
    %94 = vector.load %arg8[%c0_42, %c0_43] : memref<512x256xf32, #tpu.memory_space<vmem>>, vector<512x256xf32>
    %cst_44 = arith.constant dense<0.000000e+00> : vector<1x256xf32>
    %95 = tpu.matmul %93, %94, %cst_44 {dimension_numbers = #tpu.dot_dimension_numbers<[1], [0], [0], [1], [0, 0, 1, 1], [], []>} : vector<1x512xf32>, vector<512x256xf32>, vector<1x256xf32> -> vector<1x256xf32>
    %c0_45 = arith.constant 0 : index
    %96 = memref.load %arg9[%c0_45] : memref<2xf32, #tpu.memory_space<smem>>
    %97 = vector.broadcast %96 : f32 to vector<1x256xf32>
    %98 = arith.mulf %95, %97 : vector<1x256xf32>
    %c1_46 = arith.constant 1 : index
    %99 = memref.load %arg9[%c1_46] : memref<2xf32, #tpu.memory_space<smem>>
    %100 = vector.broadcast %99 : f32 to vector<1x256xf32>
    %101 = arith.addf %98, %100 : vector<1x256xf32>
    %cst_47 = arith.constant 0.000000e+00 : f32
    %102 = vector.broadcast %cst_47 : f32 to vector<1x256xf32>
    %103 = arith.subf %102, %101 : vector<1x256xf32>
    %104 = math.exp %103 : vector<1x256xf32>
    %cst_48 = arith.constant 1.000000e+00 : f32
    %105 = vector.broadcast %cst_48 : f32 to vector<1x256xf32>
    %106 = arith.addf %105, %104 : vector<1x256xf32>
    %107 = tpu.reciprocal %106 {approx = true} : vector<1x256xf32> -> vector<1x256xf32>
    %cst_49 = arith.constant 5.000000e-01 : f32
    %108 = vector.broadcast %cst_49 : f32 to vector<32x1xf32>
    %109 = arith.mulf %108, %86 : vector<32x1xf32>
    %cst_50 = arith.constant 5.000000e-01 : f32
    %110 = vector.broadcast %cst_50 : f32 to vector<1x256xf32>
    %111 = arith.mulf %110, %107 : vector<1x256xf32>
    %112 = vector.broadcast %109 : vector<32x1xf32> to vector<32x256xf32>
    %113 = vector.broadcast %111 : vector<1x256xf32> to vector<32x256xf32>
    %114 = arith.addf %112, %113 : vector<32x256xf32>
    %115 = arith.mulf %1, %114 : vector<32x256xf32>
    %116 = arith.subf %1, %115 : vector<32x256xf32>
    %c0_51 = arith.constant 0 : index
    %c0_52 = arith.constant 0 : index
    %c0_53 = arith.constant 0 : index
    %117 = vector.load %arg10[%c0_51, %c0_52, %c0_53] : memref<1x32x256xf32, #tpu.memory_space<vmem>>, vector<1x32x256xf32>
    %118 = vector.shape_cast %117 : vector<1x32x256xf32> to vector<32x256xf32>
    %119 = vector.shape_cast %116 : vector<32x256xf32> to vector<1x32x256xf32>
    tpu.vector_store %arg10[%c0_51, %c0_52, %c0_53], %119 {strides = array<i32>} : memref<1x32x256xf32, #tpu.memory_space<vmem>>, vector<1x32x256xf32>,
    %c0_54 = arith.constant 0 : index
    %c0_55 = arith.constant 0 : index
    %c0_56 = arith.constant 0 : index
    %120 = vector.load %arg11[%c0_54, %c0_55, %c0_56] : memref<1x32x256xf32, #tpu.memory_space<vmem>>, vector<1x32x256xf32>
    %121 = vector.shape_cast %120 : vector<1x32x256xf32> to vector<32x256xf32>
    %122 = vector.shape_cast %115 : vector<32x256xf32> to vector<1x32x256xf32>
    tpu.vector_store %arg11[%c0_54, %c0_55, %c0_56], %122 {strides = array<i32>} : memref<1x32x256xf32, #tpu.memory_space<vmem>>, vector<1x32x256xf32>,
    return
  }
  func.func @transform_0(%arg0: i32) -> (i32, i32, i32) {
    %c0_i32 = arith.constant 0 : i32
    %c0_i32_0 = arith.constant 0 : i32
    %c0_i32_1 = arith.constant 0 : i32
    return %arg0, %c0_i32, %c0_i32_0 : i32, i32, i32
  }
  func.func @transform_1(%arg0: i32) -> (i32, i32) {
    %c0_i32 = arith.constant 0 : i32
    %c0_i32_0 = arith.constant 0 : i32
    %c0_i32_1 = arith.constant 0 : i32
    return %c0_i32, %c0_i32_0 : i32, i32
  }
  func.func @transform_2(%arg0: i32) -> (i32, i32, i32) {
    %c0_i32 = arith.constant 0 : i32
    %c0_i32_0 = arith.constant 0 : i32
    %c0_i32_1 = arith.constant 0 : i32
    %c0_i32_2 = arith.constant 0 : i32
    return %c0_i32, %c0_i32_0, %c0_i32_1 : i32, i32, i32
  }
  func.func @transform_3(%arg0: i32) -> (i32, i32) {
    %c0_i32 = arith.constant 0 : i32
    %c0_i32_0 = arith.constant 0 : i32
    %c0_i32_1 = arith.constant 0 : i32
    return %c0_i32, %c0_i32_0 : i32, i32
  }
  func.func @transform_4(%arg0: i32) -> (i32, i32) {
    %c0_i32 = arith.constant 0 : i32
    %c0_i32_0 = arith.constant 0 : i32
    %c0_i32_1 = arith.constant 0 : i32
    return %c0_i32, %c0_i32_0 : i32, i32
  }
  func.func @transform_5(%arg0: i32) -> (i32, i32) {
    %c0_i32 = arith.constant 0 : i32
    %c0_i32_0 = arith.constant 0 : i32
    %c0_i32_1 = arith.constant 0 : i32
    return %c0_i32, %c0_i32_0 : i32, i32
  }
  func.func @transform_6(%arg0: i32) -> (i32, i32) {
    %c0_i32 = arith.constant 0 : i32
    %c0_i32_0 = arith.constant 0 : i32
    %c0_i32_1 = arith.constant 0 : i32
    return %c0_i32, %c0_i32_0 : i32, i32
  }
  func.func @transform_7(%arg0: i32) -> (i32, i32) {
    %c0_i32 = arith.constant 0 : i32
    %c0_i32_0 = arith.constant 0 : i32
    %c0_i32_1 = arith.constant 0 : i32
    return %c0_i32, %c0_i32_0 : i32, i32
  }
  func.func @transform_8(%arg0: i32) -> i32 {
    %c0_i32 = arith.constant 0 : i32
    %c0_i32_0 = arith.constant 0 : i32
    return %c0_i32 : i32
  }
  func.func @transform_9(%arg0: i32) -> (i32, i32, i32) {
    %c0_i32 = arith.constant 0 : i32
    %c0_i32_0 = arith.constant 0 : i32
    %c0_i32_1 = arith.constant 0 : i32
    return %arg0, %c0_i32, %c0_i32_0 : i32, i32, i32
  }
  func.func @transform_10(%arg0: i32) -> (i32, i32, i32) {
    %c0_i32 = arith.constant 0 : i32
    %c0_i32_0 = arith.constant 0 : i32
    %c0_i32_1 = arith.constant 0 : i32
    return %arg0, %c0_i32, %c0_i32_0 : i32, i32, i32
  }
}

</mosaic_0001>

<bundles_post_ra>
// kernel: tpu_custom_call.1
= control target key start
LH: loop header
LB: loop body
LE: loop exit
PB: predicated region body
PF: predicated region fallthrough
CT: control target
= control target key end

     0   :  { %s5895_s0 = inlined_call_operand.vmem [shape: f32[2,32,256], index: 0, kind: input, shape index: {}]   ;;  %s5896_s1 = inlined_call_operand.vmem [shape: f32[256,14], index: 1, kind: input, shape index: {}]   ;;  %s5897_s2 = inlined_call_operand.vmem [shape: f32[3,256,14], index: 2, kind: input, shape index: {}]   ;;  %s5898_s3 = inlined_call_operand.hbm [shape: f32[112,448], index: 3, kind: input, shape index: {}]   ;;  %s5899_s4 = inlined_call_operand.vmem [shape: f32[32,112], index: 4, kind: input, shape index: {}]   ;;  %s5900_s5 = inlined_call_operand.vmem [shape: f32[32,1], index: 5, kind: input, shape index: {}]   ;;  %s5901_s6 = inlined_call_operand.vmem [shape: f32[32,1], index: 6, kind: input, shape index: {}]   ;;  %s5902_s7 = inlined_call_operand.vmem [shape: f32[512,256], index: 7, kind: input, shape index: {}]   ;;  %s5903_s8 = inlined_call_operand.vmem [shape: f32[2], index: 8, kind: input, shape index: {}]   ;;  %s5904_s9 = inlined_call_operand.hbm [shape: f32[2,32,256], index: 9, kind: output, shape index: {0}]   ;;  %s5905_s10 = inlined_call_operand.hbm [shape: f32[2,32,256], index: 10, kind: output, shape index: {1}]  }
   0x1   :  { %5919 = sst [smem:[#allocation14_spill]] %s5895_s0 }
   0x2   :  { %5920 = sst [smem:[#allocation15_spill]] %s5896_s1 }
   0x3   :  { %5921 = sst [smem:[#allocation16_spill]] %s5903_s8 }
   0x4   :  { %16 = vsyncpa [#allocation3], 0 }
   0x5   :  { %17 = vsyncpa [#allocation5], 0 }
   0x6   :  { %18 = vsyncpa [#allocation4], 0 }
   0x7   :  { %20 = vsyncpa [#allocation4 + $0x1], 0 }
   0x8   :  { %21 = vsyncpa [#allocation9], 0 }
   0x9   :  { %23 = vsyncpa [#allocation9 + $0x1], 0  ;;  %s4108_s13 = smov 0   ;;  %s4110_s14 = smov 0  }
   0xa   :  { %s4112_s15 = smov 0   ;;  %s4114_s16 = smov 0  }
   0xb LB: > { %s4129_s17 = sadd.s32 4294967295, %s4025_s16   ;;  %s2579_s18 = sadd.s32 4294967294, %s4025_s16   ;;  %s4025_s16 = sphi %s4114_s16, %s5944_s16   ;;  %s4021_s15 = sphi %s4112_s15, %s5943_s15   ;;  %s4017_s14 = sphi %s4110_s14, %s5942_s14   ;;  %s4013_s13 = sphi %s4108_s13, %s5941_s13  }
   0xc   : > { %s4133_s19 = sadd.s32 1, %s4025_s16   ;;  %s230_s20 = sadd.s32 1, %s4021_s15 }
   0xd   : > { %s227_s21 = ssub.s32 %s4025_s16, %s4133_s19  ;;  %p240_p0 = scmp.ne.s32.totalorder %s4021_s15, %s4017_s14 }
   0xe   : > { %p228_p1 = scmp.eq.s32.totalorder %s227_s21, 0  ;;  %p241_p2 = scmp.eq.s32.totalorder %s4129_s17, 1 }
   0xf   : > { %p246_p3 = scmp.ne.s32.totalorder %s4017_s14, %s4013_s13  ;;  %p247_p4 = scmp.eq.s32.totalorder %s2579_s18, 1 }
  0x10   : > { %s4144_s22 = scalar_select %p228_p1, %s4021_s15, %s230_s20  }
  0x11   : > { %p4146_p5 = por %p241_p2, %p240_p0  ;;  %p4150_p6 = por %p247_p4, %p246_p3 }
  0x12   : > { %p2580_p7 = scmp.ge.s32.totalorder %s4025_s16, 1  ;;  %p280_p8 = scmp.lt.s32.totalorder %s4025_s16, 3 }
  0x13   : > { %s5922_s23 = scalar_select %p4146_p5, 1, 0 }
  0x14   : > { %s5923_s24 = scalar_select %p4150_p6, 1, 0 }
  0x15   : > { %p5906_p9 = scmp.eq.s32.totalorder %s4129_s17, 0  ;;  %p4157_p10 = pnand %p2580_p7, %p280_p8 }
  0x16   : > { %s4027_s26 = smov [#allocation2]   ;;  %s5925_s8 = sld [smem:[#allocation16_spill]] }
  0x17   : > { %s5924_s25 = scalar_select %p4157_p10, 1, 0 }
  0x18   : > { %s298_s27 = sshll.u32 %s4027_s26, 4  ;;  %p3353_p11 = pneg %p4157_p10  ;;  %s299_s27 = int_to_ptr.vmem [resolvable:$true] %s298_s27 }
  0x19   : > { %s3880_s20 = scalar_lea.hbm %s5898_s3, 7168 }
  0x1a   : > { %p4168_p12 = pnand %p5906_p9, %p3353_p11  ;;  %p3881_p13 = scmp.ne.s32.totalorder %s5898_s3, %s3880_s20 }
  0x1b   : > { %p3887_p3 = scmp.lt.u32.totalorder %s3880_s20, %s5898_s3 }
  0x1c   : > { %s324_s30 = sshll.u32 %s5925_s8, 4  ;;  %p3882_p0 = pneg %p4168_p12  ;;  %s4172_s30 = int_to_ptr.vmem [resolvable:$true] %s324_s30 }
  0x1e   : > { %p3883_p1 = pnand %p3882_p0, %p3881_p13 }
  0x20   : > { %p3884_p2 = pneg %p3883_p1 }
  0x22   : > { %p3889_p4 = pnand %p3887_p3, %p3884_p2 }
  0x24   : > { %3892 = shalt.err (!%p3889_p4)
}
  0x25   : > { %s3893_s8 = scalar_lea.vmem %s299_s27, 7168  ;;  %p3901_p9 = scmp.lt.s32.totalorder %s299_s27, %s299_s27 }
  0x26   : > { %p3894_p7 = scmp.ne.s32.totalorder %s299_s27, %s3893_s8  ;;  %p3902_p6 = scmp.lt.s32.totalorder %s3893_s8, %s3893_s8 }
  0x28   : > { %p3896_p8 = pnand %p3894_p7, %p3882_p0  ;;  %p3903_p5 = por %p3902_p6, %p3901_p9 }
  0x2a   : > { %p3897_p11 = pneg %p3896_p8 }
  0x2c   : > { %p3904_p10 = pnand %p3903_p5, %p3897_p11 }
  0x2e   : > { %3907 = shalt.err (!%p3904_p10)
}
  0x2f   : > { %s4028_s12 = smov 512   ;;  %s4029_s18 = smov 32  }
  0x30   : > { %3356 = dma.hbm_to_vmem [thread:$0]  (!%p4168_p12), %s5898_s3, 7168, %s299_s27, [#allocation3], %s4028_s12, %s4028_s12, %s4029_s18  }
  0x31   : > { %s3908_s26 = scalar_lea.vmem %s4172_s30, 16  ;;  %p3916_p5 = scmp.lt.s32.totalorder %s4172_s30, %s4172_s30 }
  0x32   : > { %p3909_p13 = scmp.ne.s32.totalorder %s4172_s30, %s3908_s26  ;;  %p3917_p9 = scmp.lt.s32.totalorder %s3908_s26, %s3908_s26 }
  0x34   : > { %p3911_p1 = pnand %p3909_p13, %p3882_p0  ;;  %p3918_p10 = por %p3917_p9, %p3916_p5 }
  0x36   : > { %p3912_p6 = pneg %p3911_p1 }
  0x38   : > { %p3919_p2 = pnand %p3918_p10, %p3912_p6 }
  0x3a   : > { %3922 = shalt.err (!%p3919_p2)
}
  0x3b   : > { %s4030_s8 = smov [#allocation6]   ;;  %p5927_p3 = scmp.ne.s32.totalorder %s5924_s25, 0 }
  0x3c   : > { %3359 = dma.vmem_to_smem (!%p4168_p12), %s4172_s30, 16, %s4030_s8, [#allocation5]  }
  0x3d   : > { %345 = sbr.rel (%p5927_p3) target bundleno = 2159 (0x86f), region = 56  ;;  %p5928_p4 = scmp.eq.s32.totalorder (!%p5927_p3), %s4129_s17, 0 }
  0x44   : > { %3996 = dma.done.wait (%p5928_p4), [#allocation3], 7168   ;;  %p5929_p0 = pmov %p5928_p4 }
  0x46   : > { %3998 = vsyncadd (%p5929_p0), [#allocation3], 4294960128  ;;  %p5930_p7 = pmov %p5929_p0 }
  0x47   : > { %p5931_p8 = pmov %p5929_p0 }
  0x48   : > { %4000 = dma.done.wait (%p5930_p7), [#allocation5], 16  }
  0x49   : > { %4002 = vsyncadd (%p5931_p8), [#allocation5], 4294967280 }
  0x4a   : > { %355 = sfence }
  0x4b   : > { %p393_p11 = scmp.lt.s32.totalorder %s4129_s17, 1  ;;  %s5932_s0 = sld [smem:[#allocation14_spill]]  ;;  %v454_v12 = vlaneseq  ;;  %vm1561_vm7 = vcmask 523264   ;;  %vm1892_vm8 = vcmask 916480  }
  0x4c   : > { %s5911_s29 = smov 127   ;;  %s5909_s12 = smov 126  }
  0x4d   : > { %s394_s27 = scalar_select %p393_p11, %s4129_s17, 1  ;;  %v4236_v13 = vand.u32 127, %v454_v12 }
  0x4e   : > { %s5915_s18 = smov 124   ;;  %s5913_s20 = smov 120  }
  0x4f   : > { %s2682_s30 = sshll.u32 %s394_s27, 6  ;;  %vm456_vm0 = vcmp.lt.s32.totalorder %v4236_v13, 127  ;;  %vm489_vm1 = vcmp.lt.s32.totalorder %v4236_v13, 126  ;;  %vm522_vm2 = vcmp.lt.s32.totalorder %v4236_v13, 124  ;;  %vm555_vm3 = vcmp.lt.s32.totalorder %v4236_v13, 120  ;;  %s4035_s21 = smov 112  }
  0x50   : > { %vm588_vm4 = vcmp.lt.s32.totalorder %v4236_v13, 112  ;;  %s5917_s26 = smov 96   ;;  %vm621_vm5 = vcmp.lt.s32.totalorder %v4236_v13, 96  ;;  %s5933_s1 = sld [smem:[#allocation15_spill]]  ;;  %vm654_vm6 = vcmp.lt.s32.totalorder %v4236_v13, 64 }
  0x51   : > { %s4221_s28 = scalar_lea.vmem %s5932_s0, %s2682_s30  ;;  %s4037_s30 = smov 64  }
  0x52   : > { %v398_v0 = vld [vmem:[%s4221_s28] sm:$0xff]  ;;  %v399_v1 = vld [vmem:[%s4221_s28 + $0x8] sm:$0xff]  ;;  %v400_v5 = vld [vmem:[%s4221_s28 + $0x10] sm:$0xff]  ;;  %s5934_s25 = smov 96   ;;  %s4039_s0 = smov 123  }
  0x53   : > { %v402_v2 = vld [vmem:[%s4221_s28 + $0x20] sm:$0xff]  ;;  %v3428_v3 = vpack.i.bf16 %v399_v1, %v398_v0  ;;  %v403_v4 = vld [vmem:[%s4221_s28 + $0x28] sm:$0xff]  ;;  %v401_v6 = vld [vmem:[%s4221_s28 + $0x18] sm:$0xff]  ;;  %s4040_s8 = smov 119   ;;  %s4041_s27 = smov 118  }
  0x54   : > { %v3438_v7 = vpack.i.bf16 %v403_v4, %v402_v2  ;;  %v404_v8 = vld [vmem:[%s4221_s28 + $0x30] sm:$0xff]  ;;  %v405_v9 = vld [vmem:[%s4221_s28 + $0x38] sm:$0xff]  ;;  %v3433_v10 = vpack.i.bf16 %v401_v6, %v400_v5  ;;  %s4042_s11 = smov 117   ;;  %p5939_p13 = scmp.ne.s32.totalorder %s5922_s23, 0 }
  0x55   : > { %3429 = vrot.lane.b32.xlu0 %v3428_v3, %s5911_s29  ;;  %v3443_v11 = vpack.i.bf16 %v405_v9, %v404_v8 }
  0x56   : > { %3439 = vrot.lane.b32.xlu1 %v3438_v7, %s5911_s29 }
  0x59   : > { %3434 = vrot.lane.b32.xlu0 %v3433_v10, %s5911_s29 }
  0x5a   : > { %3444 = vrot.lane.b32.xlu1 %v3443_v11, %s5911_s29  ;;  %s4043_s29 = smov 122  }
  0xc7   : > { %v3430_v14 = vpop.permute.xlu0 %3429 }
  0xc8   : > { %v3432_v15 = vunpack.i.h.bf16 %v3430_v14  ;;  %v3431_v16 = vunpack.i.l.bf16 %v3430_v14  ;;  %v3440_v17 = vpop.permute.xlu1 %3439 }
  0xc9   : > { %v3442_v18 = vunpack.i.h.bf16 %v3440_v17  ;;  %v3441_v19 = vunpack.i.l.bf16 %v3440_v17 }
  0xca   : > { %v457_v20 = vsel %vm456_vm0, %v3431_v16, %v3432_v15  ;;  %v461_v21 = vsel %vm456_vm0, %v3432_v15, %v3431_v16 }
  0xcb   : > { %v459_v22 = vsel %vm456_vm0, %v3441_v19, %v3442_v18  ;;  %v463_v23 = vsel %vm456_vm0, %v3442_v18, %v3441_v19  ;;  %v3435_v24 = vpop.permute.xlu0 %3434  ;;  %v465_v25 = vmax.f32 %v398_v0, %v457_v20  ;;  %v466_v26 = vmax.f32 %v399_v1, %v461_v21 }
  0xcc   : > { %v3437_v27 = vunpack.i.h.bf16 %v3435_v24  ;;  %v3436_v28 = vunpack.i.l.bf16 %v3435_v24  ;;  %v3445_v29 = vpop.permute.xlu1 %3444  ;;  %v469_v30 = vmax.f32 %v402_v2, %v459_v22  ;;  %v470_v31 = vmax.f32 %v403_v4, %v463_v23 }
  0xcd   : > { %v3447_v32 = vunpack.i.h.bf16 %v3445_v29  ;;  %v3446_v33 = vunpack.i.l.bf16 %v3445_v29  ;;  %v3448_v34 = vpack.i.bf16 %v466_v26, %v465_v25 }
  0xce   : > { %v458_v35 = vsel %vm456_vm0, %v3436_v28, %v3437_v27  ;;  %v462_v36 = vsel %vm456_vm0, %v3437_v27, %v3436_v28  ;;  %v3458_v37 = vpack.i.bf16 %v470_v31, %v469_v30 }
  0xcf   : > { %v460_v38 = vsel %vm456_vm0, %v3446_v33, %v3447_v32  ;;  %v464_v39 = vsel %vm456_vm0, %v3447_v32, %v3446_v33  ;;  %3449 = vrot.lane.b32.xlu0 %v3448_v34, %s5909_s12  ;;  %v467_v40 = vmax.f32 %v400_v5, %v458_v35  ;;  %v468_v41 = vmax.f32 %v401_v6, %v462_v36 }
  0xd0   : > { %v471_v42 = vmax.f32 %v404_v8, %v460_v38  ;;  %v472_v43 = vmax.f32 %v405_v9, %v464_v39 }
  0xd1   : > { %v3453_v44 = vpack.i.bf16 %v468_v41, %v467_v40 }
  0xd2   : > { %v3463_v45 = vpack.i.bf16 %v472_v43, %v471_v42 }
  0xd3   : > { %3454 = vrot.lane.b32.xlu1 %v3453_v44, %s5909_s12  ;;  %3459 = vrot.lane.b32.xlu0 %v3458_v37, %s5909_s12 }
  0xd7   : > { %3464 = vrot.lane.b32.xlu1 %v3463_v45, %s5909_s12 }
 0x141   : > { %v3450_v46 = vpop.permute.xlu0 %3449 }
 0x142   : > { %v3452_v47 = vunpack.i.h.bf16 %v3450_v46  ;;  %v3451_v48 = vunpack.i.l.bf16 %v3450_v46 }
 0x144   : > { %v490_v49 = vsel %vm489_vm1, %v3451_v48, %v3452_v47  ;;  %v494_v50 = vsel %vm489_vm1, %v3452_v47, %v3451_v48 }
 0x145   : > { %v4264_v51 = vmax.f32 %v465_v25, %v490_v49  ;;  %v4266_v52 = vmax.f32 %v466_v26, %v494_v50  ;;  %v3455_v53 = vpop.permute.xlu1 %3454  ;;  %v3460_v54 = vpop.permute.xlu0 %3459 }
 0x146   : > { %v3457_v55 = vunpack.i.h.bf16 %v3455_v53  ;;  %v3456_v56 = vunpack.i.l.bf16 %v3455_v53  ;;  %v3462_v57 = vunpack.i.h.bf16 %v3460_v54  ;;  %v3461_v58 = vunpack.i.l.bf16 %v3460_v54 }
 0x147   : > { %v3468_v59 = vpack.i.bf16 %v4266_v52, %v4264_v51 }
 0x148   : > { %v491_v60 = vsel %vm489_vm1, %v3456_v56, %v3457_v55  ;;  %v495_v61 = vsel %vm489_vm1, %v3457_v55, %v3456_v56  ;;  %v492_v62 = vsel %vm489_vm1, %v3461_v58, %v3462_v57  ;;  %v496_v63 = vsel %vm489_vm1, %v3462_v57, %v3461_v58 }
 0x149   : > { %v4278_v0 = vmax.f32 %v467_v40, %v491_v60  ;;  %v4280_v1 = vmax.f32 %v468_v41, %v495_v61  ;;  %v4282_v2 = vmax.f32 %v469_v30, %v492_v62  ;;  %v4284_v3 = vmax.f32 %v470_v31, %v496_v63  ;;  %v3465_v4 = vpop.permute.xlu1 %3464  ;;  %3469 = vrot.lane.b32.xlu0 %v3468_v59, %s5915_s18 }
 0x14a   : > { %v3467_v5 = vunpack.i.h.bf16 %v3465_v4  ;;  %v3466_v6 = vunpack.i.l.bf16 %v3465_v4 }
 0x14b   : > { %v4289_v7 = vpack.i.bf16 %v4280_v1, %v4278_v0  ;;  %v3478_v8 = vpack.i.bf16 %v4284_v3, %v4282_v2 }
 0x14c   : > { %v493_v9 = vsel %vm489_vm1, %v3466_v6, %v3467_v5  ;;  %v497_v10 = vsel %vm489_vm1, %v3467_v5, %v3466_v6 }
 0x14d   : > { %v4297_v11 = vmax.f32 %v471_v42, %v493_v9  ;;  %v4299_v14 = vmax.f32 %v472_v43, %v497_v10  ;;  %3474 = vrot.lane.b32.xlu1 %v4289_v7, %s5915_s18  ;;  %3479 = vrot.lane.b32.xlu0 %v3478_v8, %s5915_s18 }
 0x14f   : > { %v4306_v15 = vpack.i.bf16 %v4299_v14, %v4297_v11 }
 0x151   : > { %3484 = vrot.lane.b32.xlu1 %v4306_v15, %s5915_s18  ;;  %s4044_s18 = smov 116  }
 0x1bb   : > { %v3470_v16 = vpop.permute.xlu0 %3469 }
 0x1bc   : > { %v3472_v17 = vunpack.i.h.bf16 %v3470_v16  ;;  %v3471_v18 = vunpack.i.l.bf16 %v3470_v16 }
 0x1be   : > { %v523_v19 = vsel %vm522_vm2, %v3471_v18, %v3472_v17  ;;  %v527_v20 = vsel %vm522_vm2, %v3472_v17, %v3471_v18 }
 0x1bf   : > { %v4316_v21 = vmax.f32 %v4264_v51, %v523_v19  ;;  %v4319_v22 = vmax.f32 %v4266_v52, %v527_v20  ;;  %v3475_v23 = vpop.permute.xlu1 %3474  ;;  %v3480_v24 = vpop.permute.xlu0 %3479 }
 0x1c0   : > { %v3477_v25 = vunpack.i.h.bf16 %v3475_v23  ;;  %v3476_v26 = vunpack.i.l.bf16 %v3475_v23  ;;  %v3482_v27 = vunpack.i.h.bf16 %v3480_v24  ;;  %v3481_v28 = vunpack.i.l.bf16 %v3480_v24 }
 0x1c1   : > { %v4323_v29 = vpack.i.bf16 %v4319_v22, %v4316_v21 }
 0x1c2   : > { %v524_v30 = vsel %vm522_vm2, %v3476_v26, %v3477_v25  ;;  %v528_v31 = vsel %vm522_vm2, %v3477_v25, %v3476_v26  ;;  %v525_v32 = vsel %vm522_vm2, %v3481_v28, %v3482_v27  ;;  %v529_v33 = vsel %vm522_vm2, %v3482_v27, %v3481_v28 }
 0x1c3   : > { %v4334_v34 = vmax.f32 %v4278_v0, %v524_v30  ;;  %v4337_v35 = vmax.f32 %v4280_v1, %v528_v31  ;;  %v4340_v36 = vmax.f32 %v4282_v2, %v525_v32  ;;  %v4343_v37 = vmax.f32 %v4284_v3, %v529_v33  ;;  %v3485_v38 = vpop.permute.xlu1 %3484  ;;  %3489 = vrot.lane.b32.xlu0 %v4323_v29, %s5913_s20 }
 0x1c4   : > { %v3487_v39 = vunpack.i.h.bf16 %v3485_v38  ;;  %v3486_v40 = vunpack.i.l.bf16 %v3485_v38 }
 0x1c5   : > { %v3493_v41 = vpack.i.bf16 %v4337_v35, %v4334_v34  ;;  %v3498_v42 = vpack.i.bf16 %v4343_v37, %v4340_v36 }
 0x1c6   : > { %v526_v43 = vsel %vm522_vm2, %v3486_v40, %v3487_v39  ;;  %v530_v44 = vsel %vm522_vm2, %v3487_v39, %v3486_v40 }
 0x1c7   : > { %v4356_v45 = vmax.f32 %v4297_v11, %v526_v43  ;;  %v4359_v46 = vmax.f32 %v4299_v14, %v530_v44  ;;  %3494 = vrot.lane.b32.xlu1 %v3493_v41, %s5913_s20  ;;  %3499 = vrot.lane.b32.xlu0 %v3498_v42, %s5913_s20 }
 0x1c9   : > { %v3503_v47 = vpack.i.bf16 %v4359_v46, %v4356_v45 }
 0x1cb   : > { %3504 = vrot.lane.b32.xlu1 %v3503_v47, %s5913_s20  ;;  %s4045_s20 = smov 121  }
 0x1cf   : > { %3514 = vrot.lane.b32.xlu1 %v3468_v59, %s5909_s12 }
 0x1d3   : > { %3524 = vrot.lane.b32.xlu1 %v3478_v8, %s5909_s12 }
 0x235   : > { %v3490_v48 = vpop.permute.xlu0 %3489 }
 0x236   : > { %v3492_v49 = vunpack.i.h.bf16 %v3490_v48  ;;  %v3491_v50 = vunpack.i.l.bf16 %v3490_v48 }
 0x238   : > { %v556_v53 = vsel %vm555_vm3, %v3491_v50, %v3492_v49  ;;  %v560_v54 = vsel %vm555_vm3, %v3492_v49, %v3491_v50 }
 0x239   : > { %v3495_v55 = vpop.permute.xlu1 %3494  ;;  %v3500_v56 = vpop.permute.xlu0 %3499  ;;  %v564_v57 = vmax.f32 %v4316_v21, %v556_v53  ;;  %v565_v58 = vmax.f32 %v4319_v22, %v560_v54 }
 0x23a   : > { %v3497_v59 = vunpack.i.h.bf16 %v3495_v55  ;;  %v3496_v60 = vunpack.i.l.bf16 %v3495_v55  ;;  %v3502_v4 = vunpack.i.h.bf16 %v3500_v56  ;;  %v3501_v5 = vunpack.i.l.bf16 %v3500_v56 }
 0x23b   : > { %v3508_v61 = vpack.i.bf16 %v565_v58, %v564_v57 }
 0x23c   : > { %v557_v62 = vsel %vm555_vm3, %v3496_v60, %v3497_v59  ;;  %v561_v63 = vsel %vm555_vm3, %v3497_v59, %v3496_v60  ;;  %v558_v18 = vsel %vm555_vm3, %v3501_v5, %v3502_v4  ;;  %v562_v19 = vsel %vm555_vm3, %v3502_v4, %v3501_v5 }
 0x23d   : > { %v3505_v6 = vpop.permute.xlu1 %3504  ;;  %3509 = vrot.lane.b32.xlu0 %v3508_v61, %s4035_s21  ;;  %v566_v8 = vmax.f32 %v4334_v34, %v557_v62  ;;  %v567_v9 = vmax.f32 %v4337_v35, %v561_v63  ;;  %v4402_v27 = vmax.f32 %v4340_v36, %v558_v18  ;;  %v4405_v28 = vmax.f32 %v4343_v37, %v562_v19 }
 0x23e   : > { %v3507_v10 = vunpack.i.h.bf16 %v3505_v6  ;;  %v3506_v16 = vunpack.i.l.bf16 %v3505_v6 }
 0x23f   : > { %v3533_v17 = vpack.i.bf16 %v567_v9, %v566_v8 }
 0x240   : > { %v559_v20 = vsel %vm555_vm3, %v3506_v16, %v3507_v10  ;;  %v563_v23 = vsel %vm555_vm3, %v3507_v10, %v3506_v16 }
 0x241   : > { %3534 = vrot.lane.b32.xlu1 %v3533_v17, %s4035_s21  ;;  %3519 = vrot.lane.b32.xlu0 %v4289_v7, %s5909_s12  ;;  %v4394_v24 = vmax.f32 %v4356_v45, %v559_v20  ;;  %v4397_v25 = vmax.f32 %v4359_v46, %v563_v23  ;;  %v3538_v7 = vpack.i.bf16 %v4405_v28, %v4402_v27  ;;  %v3515_v30 = vpop.permute.xlu1 %3514 }
 0x242   : > { %v3517_v31 = vunpack.i.h.bf16 %v3515_v30  ;;  %v3516_v32 = vunpack.i.l.bf16 %v3515_v30 }
 0x243   : > { %v3543_v26 = vpack.i.bf16 %v4397_v25, %v4394_v24 }
 0x244   : > { %v1115_v33 = vsel %vm489_vm1, %v3517_v31, %v3516_v32 }
 0x245   : > { %3544 = vrot.lane.b32.xlu1 %v3543_v26, %s4035_s21  ;;  %3529 = vrot.lane.b32.xlu0 %v4306_v15, %s5909_s12  ;;  %v1111_v15 = vsel %vm489_vm1, %v3516_v32, %v3517_v31  ;;  %v4431_v44 = vmax.f32 %v4266_v52, %v1115_v33  ;;  %s5938_s12 = smov 126  }
 0x246   : > { %v4428_v43 = vmax.f32 %v4264_v51, %v1111_v15 }
 0x248   : > { %v3558_v10 = vpack.i.bf16 %v4431_v44, %v4428_v43 }
 0x249   : > { %3554 = vrot.lane.b32.xlu1 %v4323_v29, %s4035_s21  ;;  %3539 = vrot.lane.b32.xlu0 %v3538_v7, %s4035_s21  ;;  %v3525_v29 = vpop.permute.xlu1 %3524 }
 0x24a   : > { %v3526_v48 = vunpack.i.l.bf16 %v3525_v29 }
 0x24d   : > { %3564 = vrot.lane.b32.xlu1 %v3493_v41, %s4035_s21 }
 0x251   : > { %3574 = vrot.lane.b32.xlu1 %v3498_v42, %s4035_s21 }
 0x255   : > { %3584 = vrot.lane.b32.xlu1 %v3503_v47, %s4035_s21  ;;  %v3527_v47 = vunpack.i.h.bf16 %v3525_v29 }
 0x257   : > { %v1117_v16 = vsel %vm489_vm1, %v3527_v47, %v3526_v48 }
 0x258   : > { %v4482_v29 = vmax.f32 %v4284_v3, %v1117_v16 }
 0x2af   : > { %v3510_v38 = vpop.permute.xlu0 %3509 }
 0x2b0   : > { %v3512_v39 = vunpack.i.h.bf16 %v3510_v38  ;;  %v3511_v40 = vunpack.i.l.bf16 %v3510_v38 }
 0x2b2   : > { %v589_v41 = vsel %vm588_vm4, %v3511_v40, %v3512_v39  ;;  %v593_v42 = vsel %vm588_vm4, %v3512_v39, %v3511_v40 }
 0x2b3   : > { %v3535_v49 = vpop.permute.xlu1 %3534  ;;  %v3520_v50 = vpop.permute.xlu0 %3519  ;;  %v4433_v53 = vmax.f32 %v564_v57, %v589_v41  ;;  %v4435_v54 = vmax.f32 %v565_v58, %v593_v42  ;;  %v1113_v58 = vsel %vm489_vm1, %v3526_v48, %v3527_v47 }
 0x2b4   : > { %v3537_v55 = vunpack.i.h.bf16 %v3535_v49  ;;  %v3536_v56 = vunpack.i.l.bf16 %v3535_v49  ;;  %v3522_v59 = vunpack.i.h.bf16 %v3520_v50  ;;  %v3521_v60 = vunpack.i.l.bf16 %v3520_v50 }
 0x2b5   : > { %v3548_v61 = vpack.i.bf16 %v4435_v54, %v4433_v53  ;;  %v4479_v33 = vmax.f32 %v4282_v2, %v1113_v58 }
 0x2b6   : > { %v590_v51 = vsel %vm588_vm4, %v3536_v56, %v3537_v55  ;;  %v594_v52 = vsel %vm588_vm4, %v3537_v55, %v3536_v56  ;;  %v1112_v62 = vsel %vm489_vm1, %v3521_v60, %v3522_v59  ;;  %v1116_v57 = vsel %vm489_vm1, %v3522_v59, %v3521_v60 }
 0x2b7   : > { %v3545_v63 = vpop.permute.xlu1 %3544  ;;  %v3530_v4 = vpop.permute.xlu0 %3529  ;;  %3549 = vrot.lane.b32.xlu0 %v3548_v61, %s5917_s26  ;;  %v4450_v5 = vmax.f32 %v566_v8, %v590_v51  ;;  %v4452_v6 = vmax.f32 %v567_v9, %v594_v52  ;;  %v4459_v19 = vmax.f32 %v4278_v0, %v1112_v62  ;;  %v4464_v8 = vmax.f32 %v4280_v1, %v1116_v57 }
 0x2b8   : > { %v3547_v17 = vunpack.i.h.bf16 %v3545_v63  ;;  %v3546_v18 = vunpack.i.l.bf16 %v3545_v63  ;;  %v3532_v20 = vunpack.i.h.bf16 %v3530_v4  ;;  %v3531_v23 = vunpack.i.l.bf16 %v3530_v4 }
 0x2b9   : > { %v3593_v26 = vpack.i.bf16 %v4452_v6, %v4450_v5  ;;  %v3578_v56 = vpack.i.bf16 %v4482_v29, %v4479_v33 }
 0x2ba   : > { %v592_v9 = vsel %vm588_vm4, %v3546_v18, %v3547_v17  ;;  %v596_v7 = vsel %vm588_vm4, %v3547_v17, %v3546_v18  ;;  %v1114_v38 = vsel %vm489_vm1, %v3531_v23, %v3532_v20  ;;  %v1118_v39 = vsel %vm489_vm1, %v3532_v20, %v3531_v23 }
 0x2bb   : > { %3594 = vrot.lane.b32.xlu1 %v3593_v26, %s5917_s26  ;;  %v3555_v30 = vpop.permute.xlu1 %3554  ;;  %v3540_v31 = vpop.permute.xlu0 %3539  ;;  %3559 = vrot.lane.b32.xlu0 %v3558_v10, %s4035_s21  ;;  %v4473_v0 = vmax.f32 %v4394_v24, %v592_v9  ;;  %v4476_v32 = vmax.f32 %v4397_v25, %v596_v7  ;;  %v3568_v25 = vpack.i.bf16 %v4464_v8, %v4459_v19 }
 0x2bc   : > { %v3557_v1 = vunpack.i.h.bf16 %v3555_v30  ;;  %v3556_v15 = vunpack.i.l.bf16 %v3555_v30  ;;  %v3542_v3 = vunpack.i.h.bf16 %v3540_v31  ;;  %v3541_v41 = vunpack.i.l.bf16 %v3540_v31  ;;  %v691_v30 = vld [vmem:[%s5897_s2 + $0x80] sm:$0xff]  ;;  %v692_v31 = vld [vmem:[%s5897_s2 + $0x88] sm:$0xff] }
 0x2bd   : > { %v3603_v24 = vpack.i.bf16 %v4476_v32, %v4473_v0  ;;  %v4509_v59 = vmax.f32 %v4297_v11, %v1114_v38  ;;  %v4512_v60 = vmax.f32 %v4299_v14, %v1118_v39  ;;  %v694_v38 = vld [vmem:[%s5897_s2 + $0x98] sm:$0xff] }
 0x2be   : > { %v893_v40 = vsel %vm588_vm4, %v3556_v15, %v3557_v1  ;;  %v897_v2 = vsel %vm588_vm4, %v3557_v1, %v3556_v15  ;;  %v2987_v1 = vpack.c.bf16 %v692_v31, %v691_v30  ;;  %v693_v15 = vld [vmem:[%s5897_s2 + $0x90] sm:$0xff]  ;;  %v687_v31 = vld [vmem:[%s5897_s2 + $0x60] sm:$0xff] }
 0x2bf   : > { %3604 = vrot.lane.b32.xlu1 %v3603_v24, %s5917_s26  ;;  %v3565_v42 = vpop.permute.xlu1 %3564  ;;  %3569 = vrot.lane.b32.xlu0 %v3568_v25, %s4035_s21  ;;  %v4499_v47 = vmax.f32 %v4316_v21, %v893_v40  ;;  %v4502_v48 = vmax.f32 %v4319_v22, %v897_v2  ;;  %v591_v21 = vsel %vm588_vm4, %v3541_v41, %v3542_v3  ;;  %v677_v25 = vld [vmem:[%s5897_s2 + $0x10] sm:$0xff]  ;;  %v678_v40 = vld [vmem:[%s5897_s2 + $0x18] sm:$0xff] }
 0x2c0   : > { %v3567_v49 = vunpack.i.h.bf16 %v3565_v42  ;;  %v3566_v50 = vunpack.i.l.bf16 %v3565_v42  ;;  %v595_v22 = vsel %vm588_vm4, %v3542_v3, %v3541_v41  ;;  %v3588_v63 = vpack.i.bf16 %v4512_v60, %v4509_v59  ;;  %v695_v2 = vld [vmem:[%s5897_s2 + $0xa0] sm:$0xff]  ;;  %2988 = vmatprep.subr.bf16.mxu0 %v2987_v1  ;;  %v696_v3 = vld [vmem:[%s5897_s2 + $0xa8] sm:$0xff] }
 0x2c1   : > { %v3613_v55 = vpack.i.bf16 %v4502_v48, %v4499_v47  ;;  %v4535_v4 = vmax.f32 %v4402_v27, %v591_v21  ;;  %v4538_v10 = vmax.f32 %v4405_v28, %v595_v22  ;;  %v2991_v24 = vpack.c.bf16 %v694_v38, %v693_v15  ;;  %v706_v15 = vld [vmem:[%s5897_s2 + $0xf8] sm:$0xff] }
 0x2c2   : > { %v894_v61 = vsel %vm588_vm4, %v3566_v50, %v3567_v49  ;;  %v898_v51 = vsel %vm588_vm4, %v3567_v49, %v3566_v50  ;;  %v2993_v41 = vpack.c.bf16 %v678_v40, %v677_v25  ;;  %v2995_v42 = vpack.c.bf16 %v696_v3, %v695_v2  ;;  %v679_v49 = vld [vmem:[%s5897_s2 + $0x20] sm:$0xff]  ;;  %v680_v50 = vld [vmem:[%s5897_s2 + $0x28] sm:$0xff] }
 0x2c3   : > { %v3575_v52 = vpop.permute.xlu1 %3574  ;;  %3614 = vrot.lane.b32.xlu1 %v3613_v55, %s5917_s26  ;;  %3579 = vrot.lane.b32.xlu0 %v3578_v56, %s4035_s21  ;;  %v4525_v11 = vmax.f32 %v4334_v34, %v894_v61  ;;  %v4528_v14 = vmax.f32 %v4337_v35, %v898_v51  ;;  %v3598_v23 = vpack.i.bf16 %v4538_v10, %v4535_v4  ;;  %v697_v55 = vld [vmem:[%s5897_s2 + $0xb0] sm:$0xff]  ;;  %v698_v56 = vld [vmem:[%s5897_s2 + $0xb8] sm:$0xff] }
 0x2c4   : > { %v3577_v62 = vunpack.i.h.bf16 %v3575_v52  ;;  %v3576_v57 = vunpack.i.l.bf16 %v3575_v52  ;;  %v2997_v21 = vpack.c.bf16 %v680_v50, %v679_v49  ;;  %v2999_v22 = vpack.c.bf16 %v698_v56, %v697_v55  ;;  %v681_v61 = vld [vmem:[%s5897_s2 + $0x30] sm:$0xff]  ;;  %v682_v51 = vld [vmem:[%s5897_s2 + $0x38] sm:$0xff]  ;;  %v699_v52 = vld [vmem:[%s5897_s2 + $0xc0] sm:$0xff] }
 0x2c5   : > { %v3623_v58 = vpack.i.bf16 %v4528_v14, %v4525_v11 }
 0x2c6   : > { %v895_v34 = vsel %vm588_vm4, %v3576_v57, %v3577_v62  ;;  %v899_v35 = vsel %vm588_vm4, %v3577_v62, %v3576_v57  ;;  %v700_v62 = vld [vmem:[%s5897_s2 + $0xc8] sm:$0xff]  ;;  %v3001_v57 = vpack.c.bf16 %v682_v51, %v681_v61 }
 0x2c7   : > { %v3585_v16 = vpop.permute.xlu1 %3584  ;;  %3624 = vrot.lane.b32.xlu1 %v3623_v58, %s5917_s26  ;;  %3589 = vrot.lane.b32.xlu0 %v3588_v63, %s4035_s21  ;;  %v4547_v17 = vmax.f32 %v4340_v36, %v895_v34  ;;  %v4550_v27 = vmax.f32 %v4343_v37, %v899_v35  ;;  %v3003_v58 = vpack.c.bf16 %v700_v62, %v699_v52  ;;  %v683_v63 = vld [vmem:[%s5897_s2 + $0x40] sm:$0xff]  ;;  %v684_v34 = vld [vmem:[%s5897_s2 + $0x48] sm:$0xff]  ;;  %s5935_s21 = smov 124  }
 0x2c8   : > { %v3587_v18 = vunpack.i.h.bf16 %v3585_v16  ;;  %v3586_v28 = vunpack.i.l.bf16 %v3585_v16  ;;  %v701_v35 = vld [vmem:[%s5897_s2 + $0xd0] sm:$0xff]  ;;  %v702_v16 = vld [vmem:[%s5897_s2 + $0xd8] sm:$0xff] }
 0x2c9   : > { %v3633_v20 = vpack.i.bf16 %v4550_v27, %v4547_v17 }
 0x2ca   : > { %v896_v26 = vsel %vm588_vm4, %v3586_v28, %v3587_v18  ;;  %v900_v9 = vsel %vm588_vm4, %v3587_v18, %v3586_v28  ;;  %v3005_v18 = vpack.c.bf16 %v684_v34, %v683_v63  ;;  %v3007_v28 = vpack.c.bf16 %v702_v16, %v701_v35 }
 0x2cb   : > { %3634 = vrot.lane.b32.xlu1 %v3633_v20, %s5917_s26  ;;  %3599 = vrot.lane.b32.xlu0 %v3598_v23, %s5917_s26  ;;  %v4563_v36 = vmax.f32 %v4356_v45, %v896_v26  ;;  %v4566_v37 = vmax.f32 %v4359_v46, %v900_v9  ;;  %v675_v45 = vld [vmem:[%s5897_s2] sm:$0xff]  ;;  %v676_v46 = vld [vmem:[%s5897_s2 + $0x8] sm:$0xff] }
 0x2cc   : > { %v2989_v39 = vpack.c.bf16 %v676_v46, %v675_v45  ;;  %v685_v20 = vld [vmem:[%s5897_s2 + $0x50] sm:$0xff]  ;;  %v686_v23 = vld [vmem:[%s5897_s2 + $0x58] sm:$0xff]  ;;  %v703_v26 = vld [vmem:[%s5897_s2 + $0xe0] sm:$0xff] }
 0x2cd   : > { %v3643_v7 = vpack.i.bf16 %v4566_v37, %v4563_v36  ;;  %v704_v9 = vld [vmem:[%s5897_s2 + $0xe8] sm:$0xff]  ;;  %v705_v46 = vld [vmem:[%s5897_s2 + $0xf0] sm:$0xff] }
 0x2ce   : > { %2990 = vmatpush3.bf16.msra.mxu0 %v2989_v39  ;;  %v3011_v30 = vpack.c.bf16 %v704_v9, %v703_v26  ;;  %v688_v45 = vld [vmem:[%s5897_s2 + $0x68] sm:$0xff]  ;;  %v3015_v38 = vpack.c.bf16 %v706_v15, %v705_v46  ;;  %v689_v39 = vld [vmem:[%s5897_s2 + $0x70] sm:$0xff] }
 0x2cf   : > { %3644 = vrot.lane.b32.xlu1 %v3643_v7, %s5917_s26  ;;  %2992 = vmatprep.subr.bf16.mxu0 %v2991_v24  ;;  %v3009_v7 = vpack.c.bf16 %v686_v23, %v685_v20  ;;  %v3013_v1 = vpack.c.bf16 %v688_v45, %v687_v31  ;;  %v690_v24 = vld [vmem:[%s5897_s2 + $0x78] sm:$0xff]  ;;  %s4046_s26 = smov 125  }
 0x2d0   : > { %v3017_v25 = vpack.c.bf16 %v690_v24, %v689_v39 }
 0x2d2   : > { %2994 = vmatpush3.bf16.msra.mxu0 %v2993_v41  ;;  %v422_v41 = vld [vmem:[%s5933_s1 + $0x80] sm:$0xff] }
 0x2d3   : > { %2996 = vmatprep.subr.bf16.mxu0 %v2995_v42  ;;  %v423_v42 = vld [vmem:[%s5933_s1 + $0x88] sm:$0xff] }
 0x2d4   : > { %v3019_v49 = vpack.c.bf16 %v423_v42, %v422_v41 }
 0x2d6   : > { %2998 = vmatpush3.bf16.msra.mxu0 %v2997_v21 }
 0x2d7   : > { %3000 = vmatprep.subr.bf16.mxu0 %v2999_v22 }
 0x2da   : > { %3002 = vmatpush3.bf16.msra.mxu0 %v3001_v57 }
 0x2db   : > { %3004 = vmatprep.subr.bf16.mxu0 %v3003_v58 }
 0x2de   : > { %3006 = vmatpush3.bf16.msra.mxu0 %v3005_v18 }
 0x2df   : > { %3008 = vmatprep.subr.bf16.mxu0 %v3007_v28 }
 0x2e2   : > { %3010 = vmatpush3.bf16.msra.mxu0 %v3009_v7 }
 0x2e3   : > { %3012 = vmatprep.subr.bf16.mxu0 %v3011_v30 }
 0x2e6   : > { %3014 = vmatpush3.bf16.msra.mxu0 %v3013_v1 }
 0x2e7   : > { %3016 = vmatprep.subr.bf16.mxu0 %v3015_v38 }
 0x2ea   : > { %3018 = vmatpush3.bf16.msra.mxu0 %v3017_v25 }
 0x2eb   : > { %3020 = vmatprep.subr.bf16.mxu0 %v3019_v49 }
 0x329   : > { %v3550_v40 = vpop.permute.xlu0 %3549 }
 0x32a   : > { %v3552_v2 = vunpack.i.h.bf16 %v3550_v40  ;;  %v3551_v3 = vunpack.i.l.bf16 %v3550_v40 }
 0x32c   : > { %v622_v50 = vsel %vm621_vm5, %v3551_v3, %v3552_v2  ;;  %v626_v55 = vsel %vm621_vm5, %v3552_v2, %v3551_v3 }
 0x32d   : > { %v3595_v56 = vpop.permute.xlu1 %3594  ;;  %v3560_v21 = vpop.permute.xlu0 %3559  ;;  %v4679_v22 = vmax.f32 %v4433_v53, %v622_v50  ;;  %v4682_v61 = vmax.f32 %v4435_v54, %v626_v55 }
 0x32e   : > { %v3597_v51 = vunpack.i.h.bf16 %v3595_v56  ;;  %v3596_v52 = vunpack.i.l.bf16 %v3595_v56  ;;  %v3562_v62 = vunpack.i.h.bf16 %v3560_v21  ;;  %v3561_v57 = vunpack.i.l.bf16 %v3560_v21 }
 0x32f   : > { %v3608_v58 = vpack.i.bf16 %v4682_v61, %v4679_v22 }
 0x330   : > { %v623_v63 = vsel %vm621_vm5, %v3596_v52, %v3597_v51  ;;  %v627_v34 = vsel %vm621_vm5, %v3597_v51, %v3596_v52  ;;  %v1143_v53 = vsel %vm588_vm4, %v3561_v57, %v3562_v62  ;;  %v1147_v54 = vsel %vm588_vm4, %v3562_v62, %v3561_v57 }
 0x331   : > { %v3605_v35 = vpop.permute.xlu1 %3604  ;;  %v3570_v16 = vpop.permute.xlu0 %3569  ;;  %3609 = vrot.lane.b32.xlu0 %v3608_v58, %s4037_s30  ;;  %v4696_v18 = vmax.f32 %v4450_v5, %v623_v63  ;;  %v4699_v28 = vmax.f32 %v4452_v6, %v627_v34  ;;  %v4702_v20 = vmax.f32 %v4428_v43, %v1143_v53  ;;  %v4705_v23 = vmax.f32 %v4431_v44, %v1147_v54 }
 0x332   : > { %v3607_v26 = vunpack.i.h.bf16 %v3605_v35  ;;  %v3606_v9 = vunpack.i.l.bf16 %v3605_v35  ;;  %v3572_v7 = vunpack.i.h.bf16 %v3570_v16  ;;  %v3571_v30 = vunpack.i.l.bf16 %v3570_v16 }
 0x333   : > { %v3653_v31 = vpack.i.bf16 %v4699_v28, %v4696_v18  ;;  %v3618_v5 = vpack.i.bf16 %v4705_v23, %v4702_v20 }
 0x334   : > { %v625_v6 = vsel %vm621_vm5, %v3606_v9, %v3607_v26  ;;  %v629_v43 = vsel %vm621_vm5, %v3607_v26, %v3606_v9  ;;  %v1144_v44 = vsel %vm588_vm4, %v3571_v30, %v3572_v7  ;;  %v1148_v45 = vsel %vm588_vm4, %v3572_v7, %v3571_v30 }
 0x335   : > { %3654 = vrot.lane.b32.xlu1 %v3653_v31, %s4037_s30  ;;  %v3615_v1 = vpop.permute.xlu1 %3614  ;;  %v3580_v46 = vpop.permute.xlu0 %3579  ;;  %3619 = vrot.lane.b32.xlu0 %v3618_v5, %s5934_s25  ;;  %v4722_v15 = vmax.f32 %v4473_v0, %v625_v6  ;;  %v4725_v38 = vmax.f32 %v4476_v32, %v629_v43  ;;  %v4728_v39 = vmax.f32 %v4459_v19, %v1144_v44 }
 0x336   : > { %v3582_v24 = vunpack.i.h.bf16 %v3580_v46  ;;  %v3581_v25 = vunpack.i.l.bf16 %v3580_v46  ;;  %v4733_v2 = vmax.f32 %v4464_v8, %v1148_v45  ;;  %v3617_v52 = vunpack.i.h.bf16 %v3615_v1 }
 0x337   : > { %v3663_v40 = vpack.i.bf16 %v4725_v38, %v4722_v15  ;;  %v3616_v62 = vunpack.i.l.bf16 %v3615_v1 }
 0x338   : > { %v1145_v3 = vsel %vm588_vm4, %v3581_v25, %v3582_v24  ;;  %v1149_v0 = vsel %vm588_vm4, %v3582_v24, %v3581_v25  ;;  %v3628_v19 = vpack.i.bf16 %v4733_v2, %v4728_v39 }
 0x339   : > { %3664 = vrot.lane.b32.xlu1 %v3663_v40, %s4037_s30  ;;  %v3590_v32 = vpop.permute.xlu0 %3589  ;;  %v4743_v41 = vmax.f32 %v4479_v33, %v1145_v3  ;;  %v4746_v42 = vmax.f32 %v4482_v29, %v1149_v0  ;;  %v3625_v50 = vpop.permute.xlu1 %3624  ;;  %v925_v35 = vsel %vm621_vm5, %v3616_v62, %v3617_v52  ;;  %v929_v16 = vsel %vm621_vm5, %v3617_v52, %v3616_v62  ;;  %v2626_v52 = vld [vmem:[%s5897_s2 + $0x218] sm:$0xff]  ;;  %v2643_v62 = vld [vmem:[%s5897_s2 + $0x2a0] sm:$0xff] }
 0x33a   : > { %v3592_v8 = vunpack.i.h.bf16 %v3590_v32  ;;  %v3591_v49 = vunpack.i.l.bf16 %v3590_v32  ;;  %3629 = vrot.lane.b32.xlu0 %v3628_v19, %s5934_s25  ;;  %v3627_v26 = vunpack.i.h.bf16 %v3625_v50  ;;  %v3626_v9 = vunpack.i.l.bf16 %v3625_v50  ;;  %v2639_v19 = vld [vmem:[%s5897_s2 + $0x280] sm:$0xff]  ;;  %v2641_v50 = vld [vmem:[%s5897_s2 + $0x290] sm:$0xff] }
 0x33b   : > { %v3638_v55 = vpack.i.bf16 %v4746_v42, %v4743_v41  ;;  %v4782_v30 = vmax.f32 %v4499_v47, %v925_v35  ;;  %v2646_v35 = vld [vmem:[%s5897_s2 + $0x2b8] sm:$0xff] }
 0x33c   : > { %v1146_v56 = vsel %vm588_vm4, %v3591_v49, %v3592_v8  ;;  %v1150_v21 = vsel %vm588_vm4, %v3592_v8, %v3591_v49  ;;  %v930_v31 = vsel %vm621_vm5, %v3627_v26, %v3626_v9  ;;  %v2640_v8 = vld [vmem:[%s5897_s2 + $0x288] sm:$0xff] }
 0x33d   : > { %v3600_v51 = vpop.permute.xlu0 %3599  ;;  %v4756_v33 = vmax.f32 %v4509_v59, %v1146_v56  ;;  %v4759_v29 = vmax.f32 %v4512_v60, %v1150_v21  ;;  %v3635_v59 = vpop.permute.xlu1 %3634  ;;  %v2624_v49 = vld [vmem:[%s5897_s2 + $0x208] sm:$0xff] }
 0x33e   : > { %v3602_v57 = vunpack.i.h.bf16 %v3600_v51  ;;  %v3601_v58 = vunpack.i.l.bf16 %v3600_v51  ;;  %3639 = vrot.lane.b32.xlu0 %v3638_v55, %s5934_s25  ;;  %v3637_v5 = vunpack.i.h.bf16 %v3635_v59  ;;  %v3636_v6 = vunpack.i.l.bf16 %v3635_v59  ;;  %v2642_v55 = vld [vmem:[%s5897_s2 + $0x298] sm:$0xff]  ;;  %v2625_v51 = vld [vmem:[%s5897_s2 + $0x210] sm:$0xff] }
 0x33f   : > { %v3648_v63 = vpack.i.bf16 %v4759_v29, %v4756_v33  ;;  %v3087_v21 = vpack.c.bf16 %v2642_v55, %v2641_v50  ;;  %v2645_v59 = vld [vmem:[%s5897_s2 + $0x2b0] sm:$0xff]  ;;  %v2654_v50 = vld [vmem:[%s5897_s2 + $0x2f8] sm:$0xff] }
 0x340   : > { %v624_v34 = vsel %vm621_vm5, %v3601_v58, %v3602_v57  ;;  %v628_v53 = vsel %vm621_vm5, %v3602_v57, %v3601_v58  ;;  %v927_v45 = vsel %vm621_vm5, %v3636_v6, %v3637_v5  ;;  %v931_v1 = vsel %vm621_vm5, %v3637_v5, %v3636_v6  ;;  %v2644_v57 = vld [vmem:[%s5897_s2 + $0x2a8] sm:$0xff]  ;;  %v2637_v55 = vld [vmem:[%s5897_s2 + $0x270] sm:$0xff] }
 0x341   : > { %v4769_v54 = vmax.f32 %v4535_v4, %v624_v34  ;;  %v4772_v60 = vmax.f32 %v4538_v10, %v628_v53  ;;  %v4785_v4 = vmax.f32 %v4502_v48, %v929_v16  ;;  %v926_v10 = vsel %vm621_vm5, %v3626_v9, %v3627_v26  ;;  %v3645_v43 = vpop.permute.xlu1 %3644  ;;  %v2627_v34 = vld [vmem:[%s5897_s2 + $0x220] sm:$0xff]  ;;  %v2628_v53 = vld [vmem:[%s5897_s2 + $0x228] sm:$0xff]  ;;  %v2629_v9 = vld [vmem:[%s5897_s2 + $0x230] sm:$0xff] }
 0x342   : > { %3649 = vrot.lane.b32.xlu0 %v3648_v63, %s5934_s25  ;;  %v4795_v47 = vmax.f32 %v4525_v11, %v926_v10  ;;  %v4798_v48 = vmax.f32 %v4528_v14, %v930_v31  ;;  %v3647_v46 = vunpack.i.h.bf16 %v3645_v43  ;;  %v3646_v24 = vunpack.i.l.bf16 %v3645_v43  ;;  %v2647_v10 = vld [vmem:[%s5897_s2 + $0x2c0] sm:$0xff]  ;;  %v2648_v31 = vld [vmem:[%s5897_s2 + $0x2c8] sm:$0xff] }
 0x343   : > { %v3658_v7 = vpack.i.bf16 %v4772_v60, %v4769_v54  ;;  %v3668_v44 = vpack.i.bf16 %v4785_v4, %v4782_v30  ;;  %v4808_v40 = vmax.f32 %v4547_v17, %v927_v45  ;;  %v4811_v11 = vmax.f32 %v4550_v27, %v931_v1  ;;  %v2631_v43 = vld [vmem:[%s5897_s2 + $0x240] sm:$0xff]  ;;  %v2649_v45 = vld [vmem:[%s5897_s2 + $0x2d0] sm:$0xff]  ;;  %v2650_v1 = vld [vmem:[%s5897_s2 + $0x2d8] sm:$0xff] }
 0x344   : > { %v3678_v25 = vpack.i.bf16 %v4798_v48, %v4795_v47  ;;  %v928_v14 = vsel %vm621_vm5, %v3646_v24, %v3647_v46  ;;  %v932_v3 = vsel %vm621_vm5, %v3647_v46, %v3646_v24  ;;  %v3089_v58 = vpack.c.bf16 %v2626_v52, %v2625_v51  ;;  %v2638_v51 = vld [vmem:[%s5897_s2 + $0x278] sm:$0xff] }
 0x345   : > { %v3688_v0 = vpack.i.bf16 %v4811_v11, %v4808_v40  ;;  %v4821_v32 = vmax.f32 %v4563_v36, %v928_v14  ;;  %v4824_v17 = vmax.f32 %v4566_v37, %v932_v3  ;;  %v2623_v36 = vld [vmem:[%s5897_s2 + $0x200] sm:$0xff]  ;;  %v3083_v37 = vpack.c.bf16 %v2640_v8, %v2639_v19  ;;  %v2634_v14 = vld [vmem:[%s5897_s2 + $0x258] sm:$0xff] }
 0x346   : > { %3659 = vrot.lane.b32.xlu0 %v3658_v7, %s4037_s30  ;;  %v3085_v56 = vpack.c.bf16 %v2624_v49, %v2623_v36  ;;  %v3091_v63 = vpack.c.bf16 %v2644_v57, %v2643_v62  ;;  %v3093_v16 = vpack.c.bf16 %v2628_v53, %v2627_v34  ;;  %v3095_v26 = vpack.c.bf16 %v2646_v35, %v2645_v59  ;;  %v2630_v7 = vld [vmem:[%s5897_s2 + $0x238] sm:$0xff]  ;;  %v2651_v3 = vld [vmem:[%s5897_s2 + $0x2e0] sm:$0xff]  ;;  %v2636_v36 = vld [vmem:[%s5897_s2 + $0x268] sm:$0xff] }
 0x347   : > { %v3698_v27 = vpack.i.bf16 %v4824_v17, %v4821_v32  ;;  %3084 = vmatprep.subr.bf16.mxu1 %v3083_v37  ;;  %v3097_v5 = vpack.c.bf16 %v2630_v7, %v2629_v9  ;;  %v3099_v6 = vpack.c.bf16 %v2648_v31, %v2647_v10  ;;  %v3103_v24 = vpack.c.bf16 %v2650_v1, %v2649_v45  ;;  %v2635_v8 = vld [vmem:[%s5897_s2 + $0x260] sm:$0xff]  ;;  %v2653_v49 = vld [vmem:[%s5897_s2 + $0x2f0] sm:$0xff]  ;;  %v407_v53 = vld [vmem:[%s5933_s1 + $0x8] sm:$0xff] }
 0x348   : > { %3086 = vmatpush3.bf16.msra.mxu1 %v3085_v56  ;;  %v3109_v37 = vpack.c.bf16 %v2636_v36, %v2635_v8  ;;  %v3113_v57 = vpack.c.bf16 %v2638_v51, %v2637_v55  ;;  %v424_v59 = vld [vmem:[%s5933_s1 + $0x90] sm:$0xff]  ;;  %v425_v35 = vld [vmem:[%s5933_s1 + $0x98] sm:$0xff]  ;;  %v427_v8 = vld [vmem:[%s5933_s1 + $0xa8] sm:$0xff] }
 0x349   : > { %3088 = vmatprep.subr.bf16.mxu1 %v3087_v21  ;;  %v3111_v21 = vpack.c.bf16 %v2654_v50, %v2653_v49  ;;  %v3023_v45 = vpack.c.bf16 %v425_v35, %v424_v59  ;;  %v410_v50 = vld [vmem:[%s5933_s1 + $0x20] sm:$0xff]  ;;  %v411_v55 = vld [vmem:[%s5933_s1 + $0x28] sm:$0xff] }
 0x34a   : > { %3669 = vrot.lane.b32.xlu0 %v3668_v44, %s4037_s30  ;;  %v2632_v44 = vld [vmem:[%s5897_s2 + $0x248] sm:$0xff] }
 0x34b   : > { %v3101_v46 = vpack.c.bf16 %v2632_v44, %v2631_v43 }
 0x34c   : > { %3090 = vmatpush3.bf16.msra.mxu1 %v3089_v58  ;;  %v406_v58 = vld [vmem:[%s5933_s1] sm:$0xff] }
 0x34d   : > { %3092 = vmatprep.subr.bf16.mxu1 %v3091_v63  ;;  %v3021_v44 = vpack.c.bf16 %v407_v53, %v406_v58  ;;  %v413_v53 = vld [vmem:[%s5933_s1 + $0x38] sm:$0xff] }
 0x34e   : > { %3679 = vrot.lane.b32.xlu0 %v3678_v25, %s4037_s30  ;;  %v2633_v25 = vld [vmem:[%s5897_s2 + $0x250] sm:$0xff] }
 0x350   : > { %3094 = vmatpush3.bf16.msra.mxu1 %v3093_v16 }
 0x351   : > { %3096 = vmatprep.subr.bf16.mxu1 %v3095_v26 }
 0x352   : > { %3689 = vrot.lane.b32.xlu0 %v3688_v0, %s4037_s30  ;;  %v2652_v0 = vld [vmem:[%s5897_s2 + $0x2e8] sm:$0xff] }
 0x353   : > { %v3107_v19 = vpack.c.bf16 %v2652_v0, %v2651_v3 }
 0x354   : > { %3098 = vmatpush3.bf16.msra.mxu1 %v3097_v5 }
 0x355   : > { %3100 = vmatprep.subr.bf16.mxu1 %v3099_v6 }
 0x356   : > { %3699 = vrot.lane.b32.xlu0 %v3698_v27, %s4037_s30  ;;  %v3105_v27 = vpack.c.bf16 %v2634_v14, %v2633_v25  ;;  %v409_v25 = vld [vmem:[%s5933_s1 + $0x18] sm:$0xff]  ;;  %s5937_s30 = smov 127  }
 0x358   : > { %3102 = vmatpush3.bf16.msra.mxu1 %v3101_v46 }
 0x359   : > { %3104 = vmatprep.subr.bf16.mxu1 %v3103_v24 }
 0x35c   : > { %3106 = vmatpush3.bf16.msra.mxu1 %v3105_v27 }
 0x35d   : > { %3108 = vmatprep.subr.bf16.mxu1 %v3107_v19  ;;  %v426_v19 = vld [vmem:[%s5933_s1 + $0xa0] sm:$0xff] }
 0x360   : > { %3110 = vmatpush3.bf16.msra.mxu1 %v3109_v37 }
 0x361   : > { %3112 = vmatprep.subr.bf16.mxu1 %v3111_v21  ;;  %v429_v21 = vld [vmem:[%s5933_s1 + $0xb8] sm:$0xff] }
 0x364   : > { %3114 = vmatpush3.bf16.msra.mxu1 %v3113_v57 }
 0x3a3   : > { %v3610_v56 = vpop.permute.xlu0 %3609 }
 0x3a4   : > { %v3612_v52 = vunpack.i.h.bf16 %v3610_v56  ;;  %v3611_v62 = vunpack.i.l.bf16 %v3610_v56  ;;  %v428_v56 = vld [vmem:[%s5933_s1 + $0xb0] sm:$0xff] }
 0x3a6   : > { %v655_v63 = vsel %vm654_vm6, %v3611_v62, %v3612_v52  ;;  %v659_v34 = vsel %vm654_vm6, %v3612_v52, %v3611_v62 }
 0x3a7   : > { %v3655_v16 = vpop.permute.xlu1 %3654  ;;  %v3620_v26 = vpop.permute.xlu0 %3619  ;;  %v663_v9 = vmax.f32 %v4679_v22, %v655_v63  ;;  %v664_v7 = vmax.f32 %v4682_v61, %v659_v34  ;;  %v408_v61 = vld [vmem:[%s5933_s1 + $0x10] sm:$0xff]  ;;  %v3029_v63 = vpack.c.bf16 %v411_v55, %v410_v50 }
 0x3a8   : > { %v3657_v10 = vunpack.i.h.bf16 %v3655_v16  ;;  %v3656_v31 = vunpack.i.l.bf16 %v3655_v16  ;;  %v3622_v5 = vunpack.i.h.bf16 %v3620_v26  ;;  %v3621_v6 = vunpack.i.l.bf16 %v3620_v26  ;;  %v412_v34 = vld [vmem:[%s5933_s1 + $0x30] sm:$0xff] }
 0x3a9   : > { %v671_v43 = vmax.f32 %v663_v9, %v664_v7  ;;  %v3025_v37 = vpack.c.bf16 %v409_v25, %v408_v61  ;;  %v3031_v26 = vpack.c.bf16 %v429_v21, %v428_v56  ;;  %v431_v9 = vld [vmem:[%s5933_s1 + $0xc8] sm:$0xff] }
 0x3aa   : > { %v656_v1 = vsel %vm654_vm6, %v3656_v31, %v3657_v10  ;;  %v660_v46 = vsel %vm654_vm6, %v3657_v10, %v3656_v31  ;;  %v1175_v24 = vsel %vm621_vm5, %v3621_v6, %v3622_v5  ;;  %v1179_v22 = vsel %vm621_vm5, %v3622_v5, %v3621_v6  ;;  %v435_v56 = vld [vmem:[%s5933_s1 + $0xe8] sm:$0xff] }
 0x3ab   : > { %771 = vmatprep.mubr.f32.mxu0 %v671_v43  ;;  %v4960_v14 = vmax.f32 %v4702_v20, %v1175_v24  ;;  %v4963_v3 = vmax.f32 %v4705_v23, %v1179_v22  ;;  %v665_v0 = vmax.f32 %v4696_v18, %v656_v1  ;;  %v666_v27 = vmax.f32 %v4699_v28, %v660_v46  ;;  %v3665_v59 = vpop.permute.xlu1 %3664  ;;  %v414_v1 = vld [vmem:[%s5933_s1 + $0x40] sm:$0xff]  ;;  %v415_v46 = vld [vmem:[%s5933_s1 + $0x48] sm:$0xff] }
 0x3ac   : > { %772 = vmatmul.mubr.f32.vlgmr.msra.gmra.mrb[0].mxu0 %v671_v43  ;;  %v3630_v36 = vpop.permute.xlu0 %3629  ;;  %v3027_v28 = vpack.c.bf16 %v427_v8, %v426_v19  ;;  %v3033_v31 = vpack.c.bf16 %v413_v53, %v412_v34  ;;  %v3667_v5 = vunpack.i.h.bf16 %v3665_v59  ;;  %v3666_v6 = vunpack.i.l.bf16 %v3665_v59 }
 0x3ad   : > { %3022 = vmatpush3.bf16.msra.mxu0 %v3021_v44  ;;  %v3673_v20 = vpack.i.bf16 %v4963_v3, %v4960_v14  ;;  %v672_v23 = vmax.f32 %v665_v0, %v666_v27  ;;  %v3632_v49 = vunpack.i.h.bf16 %v3630_v36  ;;  %v3631_v18 = vunpack.i.l.bf16 %v3630_v36 }
 0x3ae   : > { %3024 = vmatprep.subr.bf16.mxu0 %v3023_v45  ;;  %v3037_v19 = vpack.c.bf16 %v415_v46, %v414_v1  ;;  %v658_v8 = vsel %vm654_vm6, %v3666_v6, %v3667_v5  ;;  %v3864_v1 = vld [vmem:[%s4221_s28 + $0x8] sm:$0xff]  ;;  %v2609_v46 = vld [vmem:[%s5897_s2 + $0x190] sm:$0xff] }
 0x3af   : > { %3674 = vrot.lane.b32.xlu1 %v3673_v20, %s5934_s25  ;;  %776 = vmatprep.mubr.f32.mxu0 %v672_v23  ;;  %v1176_v51 = vsel %vm621_vm5, %v3631_v18, %v3632_v49  ;;  %v1180_v52 = vsel %vm621_vm5, %v3632_v49, %v3631_v18  ;;  %v417_v49 = vld [vmem:[%s5933_s1 + $0x58] sm:$0xff]  ;;  %v662_v18 = vsel %vm654_vm6, %v3667_v5, %v3666_v6  ;;  %v2591_v6 = vld [vmem:[%s5897_s2 + $0x100] sm:$0xff] }
 0x3b0   : > { %777 = vmatmul.mubr.f32.gmra.mrb[2].mxu0 %v672_v23  ;;  %v3640_v62 = vpop.permute.xlu0 %3639  ;;  %v4993_v57 = vmax.f32 %v4728_v39, %v1176_v51  ;;  %v4996_v58 = vmax.f32 %v4733_v2, %v1180_v52  ;;  %v430_v2 = vld [vmem:[%s5933_s1 + $0xc0] sm:$0xff]  ;;  %v670_v53 = vmax.f32 %v4725_v38, %v662_v18  ;;  %v2596_v18 = vld [vmem:[%s5897_s2 + $0x128] sm:$0xff] }
 0x3b1   : > { %3026 = vmatpush3.bf16.msra.mxu0 %v3025_v37  ;;  %v3642_v35 = vunpack.i.h.bf16 %v3640_v62  ;;  %v3641_v16 = vunpack.i.l.bf16 %v3640_v62  ;;  %v3035_v61 = vpack.c.bf16 %v431_v9, %v430_v2  ;;  %v416_v37 = vld [vmem:[%s5933_s1 + $0x50] sm:$0xff]  ;;  %v669_v62 = vmax.f32 %v4722_v15, %v658_v8  ;;  %v421_v9 = vld [vmem:[%s5933_s1 + $0x78] sm:$0xff] }
 0x3b2   : > { %3028 = vmatprep.subr.bf16.mxu0 %v3027_v28  ;;  %v3683_v39 = vpack.i.bf16 %v4996_v58, %v4993_v57  ;;  %v3041_v52 = vpack.c.bf16 %v417_v49, %v416_v37  ;;  %v420_v2 = vld [vmem:[%s5933_s1 + $0x70] sm:$0xff]  ;;  %v3866_v8 = vld [vmem:[%s4221_s28 + $0x18] sm:$0xff]  ;;  %v2595_v49 = vld [vmem:[%s5897_s2 + $0x120] sm:$0xff] }
 0x3b3   : > { %v1177_v7 = vsel %vm621_vm5, %v3641_v16, %v3642_v35  ;;  %v1181_v10 = vsel %vm621_vm5, %v3642_v35, %v3641_v16  ;;  %v418_v35 = vld [vmem:[%s5933_s1 + $0x60] sm:$0xff]  ;;  %v419_v16 = vld [vmem:[%s5933_s1 + $0x68] sm:$0xff]  ;;  %v674_v38 = vmax.f32 %v669_v62, %v670_v53  ;;  %v2598_v62 = vld [vmem:[%s5897_s2 + $0x138] sm:$0xff] }
 0x3b4   : > { %v3650_v43 = vpop.permute.xlu0 %3649  ;;  %3684 = vrot.lane.b32.xlu1 %v3683_v39, %s5934_s25  ;;  %v5018_v44 = vmax.f32 %v4743_v41, %v1177_v7  ;;  %v5021_v45 = vmax.f32 %v4746_v42, %v1181_v10  ;;  %v432_v41 = vld [vmem:[%s5933_s1 + $0xd0] sm:$0xff]  ;;  %v433_v42 = vld [vmem:[%s5933_s1 + $0xd8] sm:$0xff]  ;;  %v2607_v7 = vld [vmem:[%s5897_s2 + $0x180] sm:$0xff] }
 0x3b5   : > { %3030 = vmatpush3.bf16.msra.mxu0 %v3029_v63  ;;  %v3652_v24 = vunpack.i.h.bf16 %v3650_v43  ;;  %v3651_v22 = vunpack.i.l.bf16 %v3650_v43  ;;  %v3039_v55 = vpack.c.bf16 %v433_v42, %v432_v41  ;;  %v2608_v10 = vld [vmem:[%s5897_s2 + $0x188] sm:$0xff]  ;;  %v2594_v41 = vld [vmem:[%s5897_s2 + $0x118] sm:$0xff]  ;;  %v2611_v42 = vld [vmem:[%s5897_s2 + $0x1a0] sm:$0xff] }
 0x3b6   : > { %3032 = vmatprep.subr.bf16.mxu0 %v3031_v26  ;;  %v3693_v25 = vpack.i.bf16 %v5021_v45, %v5018_v44  ;;  %v436_v26 = vld [vmem:[%s5933_s1 + $0xf0] sm:$0xff]  ;;  %v3051_v5 = vpack.c.bf16 %v2608_v10, %v2607_v7  ;;  %v2592_v43 = vld [vmem:[%s5897_s2 + $0x108] sm:$0xff]  ;;  %v3869_v53 = vld [vmem:[%s4221_s28 + $0x20] sm:$0xff] }
 0x3b7   : > { %v1178_v0 = vsel %vm621_vm5, %v3651_v22, %v3652_v24  ;;  %v1182_v27 = vsel %vm621_vm5, %v3652_v24, %v3651_v22  ;;  %v2610_v24 = vld [vmem:[%s5897_s2 + $0x198] sm:$0xff]  ;;  %v3053_v22 = vpack.c.bf16 %v2592_v43, %v2591_v6  ;;  %v2601_v10 = vld [vmem:[%s5897_s2 + $0x150] sm:$0xff] }
 0x3b8   : > { %v3660_v36 = vpop.permute.xlu0 %3659  ;;  %3694 = vrot.lane.b32.xlu1 %v3693_v25, %s5934_s25  ;;  %v5045_v20 = vmax.f32 %v4756_v33, %v1178_v0  ;;  %v5048_v23 = vmax.f32 %v4759_v29, %v1182_v27  ;;  %v434_v29 = vld [vmem:[%s5933_s1 + $0xe0] sm:$0xff]  ;;  %v2593_v25 = vld [vmem:[%s5897_s2 + $0x110] sm:$0xff]  ;;  %v2612_v0 = vld [vmem:[%s5897_s2 + $0x1a8] sm:$0xff] }
 0x3b9   : > { %3034 = vmatpush3.bf16.msra.mxu0 %v3033_v31  ;;  %v3662_v28 = vunpack.i.h.bf16 %v3660_v36  ;;  %v3661_v50 = vunpack.i.l.bf16 %v3660_v36  ;;  %v3043_v59 = vpack.c.bf16 %v435_v56, %v434_v29  ;;  %v3049_v31 = vpack.c.bf16 %v421_v9, %v420_v2  ;;  %v3865_v27 = vld [vmem:[%s4221_s28] sm:$0xff]  ;;  %v3867_v29 = vld [vmem:[%s4221_s28 + $0x10] sm:$0xff]  ;;  %v3868_v56 = vld [vmem:[%s4221_s28 + $0x28] sm:$0xff] }
 0x3ba   : > { %3036 = vmatprep.subr.bf16.mxu0 %v3035_v61  ;;  %v3703_v33 = vpack.i.bf16 %v5048_v23, %v5045_v20  ;;  %v3055_v61 = vpack.c.bf16 %v2610_v24, %v2609_v46  ;;  %v3057_v36 = vpack.c.bf16 %v2594_v41, %v2593_v25  ;;  %v3059_v37 = vpack.c.bf16 %v2612_v0, %v2611_v42  ;;  %v3871_v2 = vld [vmem:[%s4221_s28 + $0x30] sm:$0xff]  ;;  %v2603_v46 = vld [vmem:[%s5897_s2 + $0x160] sm:$0xff]  ;;  %v2604_v24 = vld [vmem:[%s5897_s2 + $0x168] sm:$0xff] }
 0x3bb   : > { %v657_v21 = vsel %vm654_vm6, %v3661_v50, %v3662_v28  ;;  %v661_v51 = vsel %vm654_vm6, %v3662_v28, %v3661_v50  ;;  %v2613_v28 = vld [vmem:[%s5897_s2 + $0x1b0] sm:$0xff]  ;;  %v2614_v50 = vld [vmem:[%s5897_s2 + $0x1b8] sm:$0xff]  ;;  %v3077_v25 = vpack.c.bf16 %v2604_v24, %v2603_v46 }
 0x3bc   : > { %3704 = vrot.lane.b32.xlu1 %v3703_v33, %s5934_s25  ;;  %v667_v63 = vmax.f32 %v4769_v54, %v657_v21  ;;  %v668_v34 = vmax.f32 %v4772_v60, %v661_v51  ;;  %v437_v54 = vld [vmem:[%s5933_s1 + $0xf8] sm:$0xff]  ;;  %v3045_v60 = vpack.c.bf16 %v419_v16, %v418_v35  ;;  %v3061_v21 = vpack.c.bf16 %v2596_v18, %v2595_v49  ;;  %v2605_v42 = vld [vmem:[%s5897_s2 + $0x170] sm:$0xff]  ;;  %s5936_s25 = smov 120  }
 0x3bd   : > { %3038 = vmatpush3.bf16.msra.mxu0 %v3037_v19  ;;  %v3047_v39 = vpack.c.bf16 %v437_v54, %v436_v26  ;;  %v5125_v19 = vpop.permute.xlu0 %3669  ;;  %v3063_v51 = vpack.c.bf16 %v2614_v50, %v2613_v28  ;;  %v3870_v35 = vld [vmem:[%s4221_s28 + $0x38] sm:$0xff]  ;;  %v2599_v26 = vld [vmem:[%s5897_s2 + $0x140] sm:$0xff]  ;;  %v2600_v54 = vld [vmem:[%s5897_s2 + $0x148] sm:$0xff] }
 0x3be   : > { %3040 = vmatprep.subr.bf16.mxu0 %v3039_v55  ;;  %v673_v15 = vmax.f32 %v667_v63, %v668_v34  ;;  %v3672_v55 = vunpack.i.h.bf16 %v5125_v19  ;;  %v3671_v33 = vunpack.i.l.bf16 %v5125_v19  ;;  %v2615_v63 = vld [vmem:[%s5897_s2 + $0x1c0] sm:$0xff]  ;;  %v2616_v34 = vld [vmem:[%s5897_s2 + $0x1c8] sm:$0xff]  ;;  %v3069_v9 = vpack.c.bf16 %v2600_v54, %v2599_v26  ;;  %v2606_v0 = vld [vmem:[%s5897_s2 + $0x178] sm:$0xff] }
 0x3c0   : > { %781 = vmatprep.mubr.f32.mxu0 %v673_v15 }
 0x3c1   : > { %3042 = vmatpush3.bf16.msra.mxu0 %v3041_v52  ;;  %v2597_v52 = vld [vmem:[%s5897_s2 + $0x130] sm:$0xff]  ;;  %v3680_v6 = vpop.permute.xlu0 %3679 }
 0x3c2   : > { %782 = vmatmul.mubr.f32.gmra.mrb[4].mxu0 %v673_v15  ;;  %3044 = vmatprep.subr.bf16.mxu0 %v3043_v59  ;;  %v961_v59 = vsel %vm654_vm6, %v3672_v55, %v3671_v33  ;;  %v3065_v16 = vpack.c.bf16 %v2598_v62, %v2597_v52  ;;  %v3067_v15 = vpack.c.bf16 %v2616_v34, %v2615_v63  ;;  %v3682_v19 = vunpack.i.h.bf16 %v3680_v6 }
 0x3c3   : > { %786 = vmatprep.mubr.f32.mxu0 %v674_v38 }
 0x3c5   : > { %3046 = vmatpush3.bf16.msra.mxu0 %v3045_v60  ;;  %v2617_v60 = vld [vmem:[%s5897_s2 + $0x1d0] sm:$0xff] }
 0x3c6   : > { %787 = vmatmul.mubr.f32.gmra.mrb[6].mxu0 %v674_v38  ;;  %3048 = vmatprep.subr.bf16.mxu0 %v3047_v39  ;;  %v966_v38 = vmax.f32 %v4785_v4, %v961_v59  ;;  %v2618_v39 = vld [vmem:[%s5897_s2 + $0x1d8] sm:$0xff] }
 0x3c7   : > { %856 = vmatprep.mubr.f32.mxu0 %v3864_v1  ;;  %v3071_v7 = vpack.c.bf16 %v2618_v39, %v2617_v60  ;;  %v2602_v4 = vld [vmem:[%s5897_s2 + $0x158] sm:$0xff] }
 0x3c8   : > { %v3073_v43 = vpack.c.bf16 %v2602_v4, %v2601_v10 }
 0x3c9   : > { %3050 = vmatpush3.bf16.msra.mxu0 %v3049_v31  ;;  %v2619_v31 = vld [vmem:[%s5897_s2 + $0x1e0] sm:$0xff] }
 0x3ca   : > { %3052 = vmatprep.subr.bf16.mxu0 %v3051_v5  ;;  %v2620_v5 = vld [vmem:[%s5897_s2 + $0x1e8] sm:$0xff] }
 0x3cb   : > { %v3075_v1 = vpack.c.bf16 %v2620_v5, %v2619_v31 }
 0x3cc   : > { %857 = vmatmul.mubr.f32.vlgmr.msra.gmra.mrb[8].mxu0 %v3865_v27  ;;  %v3690_v27 = vpop.permute.xlu0 %3689 }
 0x3cd   : > { %3054 = vmatpush3.bf16.msra.mxu0 %v3053_v22  ;;  %861 = vmatprep.mubr.f32.mxu0 %v3866_v8  ;;  %v2621_v22 = vld [vmem:[%s5897_s2 + $0x1f0] sm:$0xff]  ;;  %v3681_v8 = vunpack.i.l.bf16 %v3680_v6  ;;  %v3692_v49 = vunpack.i.h.bf16 %v3690_v27  ;;  %v3691_v18 = vunpack.i.l.bf16 %v3690_v27 }
 0x3ce   : > { %3056 = vmatprep.subr.bf16.mxu0 %v3055_v61  ;;  %v2622_v61 = vld [vmem:[%s5897_s2 + $0x1f8] sm:$0xff] }
 0x3cf   : > { %v3079_v41 = vpack.c.bf16 %v2622_v61, %v2621_v22  ;;  %v962_v28 = vsel %vm654_vm6, %v3682_v19, %v3681_v8  ;;  %v959_v63 = vsel %vm654_vm6, %v3691_v18, %v3692_v49 }
 0x3d0   : > { %862 = vmatmul.mubr.f32.gmra.mrb[10].mxu0 %v3867_v29  ;;  %v3700_v50 = vpop.permute.xlu0 %3699 }
 0x3d1   : > { %3058 = vmatpush3.bf16.msra.mxu0 %v3057_v36  ;;  %866 = vmatprep.mubr.f32.mxu0 %v3868_v56  ;;  %v3081_v36 = vpack.c.bf16 %v2606_v0, %v2605_v42  ;;  %v968_v56 = vmax.f32 %v4798_v48, %v962_v28  ;;  %v3701_v52 = vunpack.i.l.bf16 %v3700_v50  ;;  %v969_v48 = vmax.f32 %v4808_v40, %v959_v63 }
 0x3d2   : > { %3060 = vmatprep.subr.bf16.mxu0 %v3059_v37  ;;  %v957_v37 = vsel %vm654_vm6, %v3671_v33, %v3672_v55  ;;  %v963_v55 = vsel %vm654_vm6, %v3692_v49, %v3691_v18 }
 0x3d3   : > { %v965_v29 = vmax.f32 %v4782_v30, %v957_v37  ;;  %v970_v62 = vmax.f32 %v4811_v11, %v963_v55 }
 0x3d4   : > { %867 = vmatmul.mubr.f32.gmra.mrb[12].mxu0 %v3869_v53 }
 0x3d5   : > { %3062 = vmatpush3.bf16.msra.mxu0 %v3061_v21  ;;  %871 = vmatprep.mubr.f32.mxu0 %v3870_v35  ;;  %v958_v21 = vsel %vm654_vm6, %v3681_v8, %v3682_v19 }
 0x3d6   : > { %3064 = vmatprep.subr.bf16.mxu0 %v3063_v51  ;;  %v3702_v51 = vunpack.i.h.bf16 %v3700_v50  ;;  %v967_v33 = vmax.f32 %v4795_v47, %v958_v21 }
 0x3d8   : > { %872 = vmatmul.mubr.f32.gmra.mrb[14].mxu0 %v3871_v2  ;;  %v964_v30 = vsel %vm654_vm6, %v3702_v51, %v3701_v52  ;;  %v960_v53 = vsel %vm654_vm6, %v3701_v52, %v3702_v51 }
 0x3d9   : > { %3066 = vmatpush3.bf16.msra.mxu0 %v3065_v16  ;;  %1070 = vmatprep.mubr.f32.mxu0 %v966_v38  ;;  %v972_v34 = vmax.f32 %v4824_v17, %v964_v30  ;;  %v971_v47 = vmax.f32 %v4821_v32, %v960_v53 }
 0x3da   : > { %3068 = vmatprep.subr.bf16.mxu0 %v3067_v15 }
 0x3dd   : > { %3070 = vmatpush3.bf16.msra.mxu0 %v3069_v9 }
 0x3de   : > { %3072 = vmatprep.subr.bf16.mxu0 %v3071_v7 }
 0x3e1   : > { %3074 = vmatpush3.bf16.msra.mxu0 %v3073_v43 }
 0x3e2   : > { %3076 = vmatprep.subr.bf16.mxu0 %v3075_v1 }
 0x3e5   : > { %3078 = vmatpush3.bf16.msra.mxu0 %v3077_v25 }
 0x3e6   : > { %3080 = vmatprep.subr.bf16.mxu0 %v3079_v41 }
 0x3e9   : > { %3082 = vmatpush3.bf16.msra.mxu0 %v3081_v36 }
 0x3ec   : > { %1071 = vmatmul.mubr.f32.vlgmr.msra.gmra.mrb[16].mxu0 %v965_v29 }
 0x3ed   : > { %1075 = vmatprep.mubr.f32.mxu0 %v968_v56 }
 0x3f0   : > { %1076 = vmatmul.mubr.f32.gmra.mrb[18].mxu0 %v967_v33 }
 0x3f1   : > { %1080 = vmatprep.mubr.f32.mxu0 %v970_v62 }
 0x3f4   : > { %1081 = vmatmul.mubr.f32.gmra.mrb[20].mxu0 %v969_v48 }
 0x3f5   : > { %1085 = vmatprep.mubr.f32.mxu0 %v972_v34 }
 0x3f8   : > { %1086 = vmatmul.mubr.f32.gmra.mrb[22].mxu0 %v971_v47 }
 0x421   : > { %v3675_v11 = vpop.permute.xlu1 %3674 }
 0x422   : > { %v3677_v59 = vunpack.i.h.bf16 %v3675_v11  ;;  %v3676_v35 = vunpack.i.l.bf16 %v3675_v11 }
 0x424   : > { %v1211_v16 = vsel %vm621_vm5, %v3677_v59, %v3676_v35  ;;  %v1207_v15 = vsel %vm621_vm5, %v3676_v35, %v3677_v59 }
 0x425   : > { %v1216_v40 = vmax.f32 %v4963_v3, %v1211_v16  ;;  %v1215_v17 = vmax.f32 %v4960_v14, %v1207_v15 }
 0x426   : > { %v3685_v26 = vpop.permute.xlu1 %3684 }
 0x427   : > { %1320 = vmatprep.mubr.f32.mxu1 %v1216_v40  ;;  %v3687_v54 = vunpack.i.h.bf16 %v3685_v26  ;;  %v3686_v38 = vunpack.i.l.bf16 %v3685_v26 }
 0x428   : > { %1321 = vmatmul.mubr.f32.vlgmr.msra.gmra.mrb[0].mxu1 %v1215_v17 }
 0x429   : > { %v1212_v32 = vsel %vm621_vm5, %v3687_v54, %v3686_v38  ;;  %v1208_v60 = vsel %vm621_vm5, %v3686_v38, %v3687_v54 }
 0x42a   : > { %v3695_v39 = vpop.permute.xlu1 %3694  ;;  %v1218_v2 = vmax.f32 %v4996_v58, %v1212_v32  ;;  %v1217_v9 = vmax.f32 %v4993_v57, %v1208_v60 }
 0x42b   : > { %v3697_v7 = vunpack.i.h.bf16 %v3695_v39  ;;  %v3696_v3 = vunpack.i.l.bf16 %v3695_v39 }
 0x42c   : > { %1325 = vmatprep.mubr.f32.mxu1 %v1218_v2  ;;  %v4038_v2 = vmov 0.0|0.0  }
 0x42d   : > { %1326 = vmatmul.mubr.f32.gmra.mrb[2].mxu1 %v1217_v9  ;;  %v1213_v14 = vsel %vm621_vm5, %v3697_v7, %v3696_v3  ;;  %v1209_v10 = vsel %vm621_vm5, %v3696_v3, %v3697_v7  ;;  %3147 = vmatprep.subr.bf16.mxu1 %v4038_v2 }
 0x42e   : > { %v3705_v4 = vpop.permute.xlu1 %3704  ;;  %v1220_v31 = vmax.f32 %v5021_v45, %v1213_v14  ;;  %v1219_v5 = vmax.f32 %v5018_v44, %v1209_v10 }
 0x42f   : > { %v3707_v6 = vunpack.i.h.bf16 %v3705_v4  ;;  %v3706_v43 = vunpack.i.l.bf16 %v3705_v4 }
 0x430   : > { %1330 = vmatprep.mubr.f32.mxu1 %v1220_v31 }
 0x431   : > { %1331 = vmatmul.mubr.f32.gmra.mrb[4].mxu1 %v1219_v5  ;;  %v1214_v57 = vsel %vm621_vm5, %v3707_v6, %v3706_v43  ;;  %v1210_v58 = vsel %vm621_vm5, %v3706_v43, %v3707_v6 }
 0x432   : > { %v1222_v1 = vmax.f32 %v5048_v23, %v1214_v57  ;;  %v1221_v46 = vmax.f32 %v5045_v20, %v1210_v58 }
 0x434   : > { %1335 = vmatprep.mubr.f32.mxu1 %v1222_v1 }
 0x435   : > { %1336 = vmatmul.mubr.f32.gmra.mrb[6].mxu1 %v1221_v46 }
 0x47f   : > { %v2717_v24 = vpop.f32.mrb[0].mxu0 }
 0x480   : > { %v2718_v45 = vpop.f32.mrb[1].mxu0 }
 0x481   : > { %v2719_v22 = vadd.f32 %v2718_v45, %v2717_v24 }
 0x483   : > { %v2720_v44 = vpop.f32.mrb[2].mxu0 }
 0x484   : > { %v2721_v61 = vpop.f32.mrb[3].mxu0 }
 0x485   : > { %v2722_v25 = vadd.f32 %v2721_v61, %v2720_v44  ;;  %v1508_v44 = vld [vmem:[#allocation2 + $0x18] sm:$0xff] }
 0x486   : > { %2655 = vmatprep.mubr.msk.f32.mxu1 %vm1561_vm7, %v1508_v44 }
 0x495   : > { %v2723_v41 = vpop.f32.mrb[4].mxu0 }
 0x496   : > { %v2724_v42 = vpop.f32.mrb[5].mxu0 }
 0x497   : > { %v2725_v0 = vadd.f32 %v2724_v42, %v2723_v41 }
 0x499   : > { %v2726_v27 = vpop.f32.mrb[6].mxu0 }
 0x49a   : > { %v2727_v19 = vpop.f32.mrb[7].mxu0 }
 0x49b   : > { %v2728_v8 = vadd.f32 %v2727_v19, %v2726_v27 }
 0x49f   : > { %v2761_v13 = vpop.f32.mrb[8].mxu0 }
 0x4a0   : > { %v2762_v36 = vpop.f32.mrb[9].mxu0 }
 0x4a1   : > { %v2763_v37 = vadd.f32 %v2762_v36, %v2761_v13 }
 0x4a3   : > { %v859_v23 = vadd.f32 %v2763_v37, %v2719_v22  ;;  %v2764_v49 = vpop.f32.mrb[10].mxu0  ;;  %v1506_v22 = vld [vmem:[#allocation2 + $0x8] sm:$0xff] }
 0x4a4   : > { %v2765_v20 = vpop.f32.mrb[11].mxu0  ;;  %1668 = vmatprep.mubr.f32.mxu0 %v1506_v22 }
 0x4a5   : > { %v2766_v18 = vadd.f32 %v2765_v20, %v2764_v49 }
 0x4a7   : > { %v864_v28 = vadd.f32 %v2766_v18, %v2722_v25  ;;  %v2767_v50 = vpop.f32.mrb[12].mxu0 }
 0x4a8   : > { %v2768_v29 = vpop.f32.mrb[13].mxu0 }
 0x4a9   : > { %v2769_v56 = vadd.f32 %v2768_v29, %v2767_v50 }
 0x4ab   : > { %v869_v21 = vadd.f32 %v2769_v56, %v2725_v0  ;;  %v2770_v51 = vpop.f32.mrb[14].mxu0 }
 0x4ac   : > { %v2771_v52 = vpop.f32.mrb[15].mxu0 }
 0x4ad   : > { %v2772_v55 = vadd.f32 %v2771_v52, %v2770_v51 }
 0x4af   : > { %v874_v33 = vadd.f32 %v2772_v55, %v2728_v8 }
 0x4bf   : > { %v2805_v62 = vpop.f32.mrb[16].mxu0 }
 0x4c0   : > { %v2806_v63 = vpop.f32.mrb[17].mxu0 }
 0x4c1   : > { %v2807_v30 = vadd.f32 %v2806_v63, %v2805_v62 }
 0x4c3   : > { %v1091_v48 = vadd.f32 %v2807_v30, %v859_v23  ;;  %v2808_v34 = vpop.f32.mrb[18].mxu0 }
 0x4c4   : > { %v2809_v53 = vpop.f32.mrb[19].mxu0 }
 0x4c5   : > { %v2810_v47 = vadd.f32 %v2809_v53, %v2808_v34 }
 0x4c7   : > { %v1092_v11 = vadd.f32 %v2810_v47, %v864_v28  ;;  %v2811_v59 = vpop.f32.mrb[20].mxu0 }
 0x4c8   : > { %v2812_v35 = vpop.f32.mrb[21].mxu0 }
 0x4c9   : > { %v2813_v16 = vadd.f32 %v2812_v35, %v2811_v59 }
 0x4cb   : > { %v1093_v15 = vadd.f32 %v2813_v16, %v869_v21  ;;  %v2814_v40 = vpop.f32.mrb[22].mxu0 }
 0x4cc   : > { %v2815_v17 = vpop.f32.mrb[23].mxu0 }
 0x4cd   : > { %v2816_v26 = vadd.f32 %v2815_v17, %v2814_v40 }
 0x4cf   : > { %v1094_v54 = vadd.f32 %v2816_v26, %v874_v33 }
 0x4fb   : > { %v2849_v38 = vpop.f32.mrb[0].mxu1 }
 0x4fc   : > { %v2850_v32 = vpop.f32.mrb[1].mxu1 }
 0x4fd   : > { %v2851_v60 = vadd.f32 %v2850_v32, %v2849_v38 }
 0x4ff   : > { %v5249_v39 = vadd.f32 %v2851_v60, %v1091_v48 }
 0x500   : > { %v2852_v9 = vpop.f32.mrb[2].mxu1 }
 0x501   : > { %v2853_v7 = vpop.f32.mrb[3].mxu1 }
 0x502   : > { %v2854_v3 = vadd.f32 %v2853_v7, %v2852_v9 }
 0x504   : > { %v5252_v14 = vadd.f32 %v2854_v3, %v1092_v11  ;;  %v2855_v10 = vpop.f32.mrb[4].mxu1 }
 0x505   : > { %v2856_v4 = vpop.f32.mrb[5].mxu1 }
 0x506   : > { %v2857_v31 = vadd.f32 %v2856_v4, %v2855_v10  ;;  %v3718_v5 = vpack.i.bf16 %v5252_v14, %v5249_v39  ;;  %v3117_v1 = vpack.c.bf16 %v5252_v14, %v5249_v39 }
 0x508   : > { %v5256_v6 = vadd.f32 %v2857_v31, %v1093_v15  ;;  %v2858_v43 = vpop.f32.mrb[6].mxu1  ;;  %3719 = vrot.lane.b32.xlu1 %v3718_v5, %s5935_s21  ;;  %3709 = vrot.lane.b32.xlu0 %v3718_v5, %s5936_s25 }
 0x509   : > { %v2859_v57 = vpop.f32.mrb[7].mxu1 }
 0x50a   : > { %v2860_v58 = vadd.f32 %v2859_v57, %v2858_v43 }
 0x50c   : > { %v5262_v46 = vadd.f32 %v2860_v58, %v1094_v54  ;;  %3729 = vrot.lane.b32.xlu1 %v3718_v5, %s4039_s0  ;;  %3714 = vrot.lane.b32.xlu0 %v3718_v5, %s4040_s8 }
 0x50e   : > { %v3733_v24 = vpack.i.bf16 %v5262_v46, %v5256_v6  ;;  %v3121_v45 = vpack.c.bf16 %v5262_v46, %v5256_v6 }
 0x510   : > { %3734 = vrot.lane.b32.xlu1 %v3733_v24, %s5936_s25  ;;  %3724 = vrot.lane.b32.xlu0 %v3718_v5, %s4041_s27 }
 0x514   : > { %3739 = vrot.lane.b32.xlu1 %v3718_v5, %s5937_s30  ;;  %3749 = vrot.lane.b32.xlu0 %v3733_v24, %s4040_s8 }
 0x518   : > { %3744 = vrot.lane.b32.xlu1 %v3718_v5, %s4042_s11  ;;  %3789 = vrot.lane.b32.xlu0 %v3733_v24, %s4041_s27  ;;  %s2334_s27 = sld [smem:[#allocation6]] }
 0x51c   : > { %3754 = vrot.lane.b32.xlu1 %v3733_v24, %s5935_s21  ;;  %3794 = vrot.lane.b32.xlu0 %v3733_v24, %s4039_s0  ;;  %s4047_s21 = smov 115  }
 0x520   : > { %3759 = vrot.lane.b32.xlu1 %v3718_v5, %s4043_s29  ;;  %3799 = vrot.lane.b32.xlu0 %v3733_v24, %s5937_s30  ;;  %s5768_s30 = sand.u32 1, %s4017_s14  }
 0x524   : > { %3764 = vrot.lane.b32.xlu1 %v3718_v5, %s5938_s12  ;;  %3804 = vrot.lane.b32.xlu0 %v3733_v24, %s4042_s11  ;;  %s2587_s11 = sshll.u32 %s5768_s30, 6 }
 0x528   : > { %3769 = vrot.lane.b32.xlu1 %v3718_v5, %s4044_s18  ;;  %3809 = vrot.lane.b32.xlu0 %v3733_v24, %s4043_s29  ;;  %s5777_s29 = scalar_lea.vmem [#allocation8], %s2587_s11 }
 0x52c   : > { %3774 = vrot.lane.b32.xlu1 %v3718_v5, %s4045_s20  ;;  %3814 = vrot.lane.b32.xlu0 %v3733_v24, %s5938_s12  ;;  %s2683_s12 = sshll.u32 %s4129_s17, 10  ;;  %s4049_s17 = smov [#allocation8]  }
 0x52d   : > { %s5801_s25 = scalar_lea.hbm %s5905_s10, %s2683_s12 }
 0x530   : > { %3779 = vrot.lane.b32.xlu1 %v3718_v5, %s4046_s26  ;;  %3819 = vrot.lane.b32.xlu0 %v3733_v24, %s4044_s18  ;;  %s2461_s18 = sshll.u32 %s5777_s29, 4  ;;  %s5803_s18 = int_to_ptr.vmem [resolvable:$true] %s2461_s18 }
 0x534   : > { %3784 = vrot.lane.b32.xlu1 %v3718_v5, %s4047_s21  ;;  %3824 = vrot.lane.b32.xlu0 %v3733_v24, %s4045_s20  ;;  %s5787_s20 = scalar_lea.vmem [#allocation7], %s2587_s11  ;;  %s3923_s11 = scalar_lea.vmem %s5803_s18, 1024 }
 0x535   : > { %p3924_p12 = scmp.ne.s32.totalorder %s5803_s18, %s3923_s11 }
 0x537   : > { %p3925_p1 = pnand %p3924_p12, %p5939_p13 }
 0x538   : > { %3834 = vrot.lane.b32.xlu1 %v3733_v24, %s4047_s21  ;;  %3829 = vrot.lane.b32.xlu0 %v3733_v24, %s4046_s26  ;;  %s2445_s26 = sshll.u32 %s5787_s20, 4  ;;  %s3927_s21 = sshll.u32 %s4049_s17, 4  ;;  %s5818_s26 = int_to_ptr.vmem [resolvable:$true] %s2445_s26  ;;  %s3928_s21 = int_to_ptr.vmem [resolvable:$false] %s3927_s21 }
 0x539   : > { %p3926_p6 = pneg %p3925_p1  ;;  %s3929_s1 = scalar_lea.vmem %s3928_s21, 2048 }
 0x53a   : > { %p3930_p5 = scmp.lt.s32.totalorder %s5803_s18, %s3928_s21  ;;  %p3931_p9 = scmp.lt.s32.totalorder %s3929_s1, %s3923_s11 }
 0x53c   : > { %p3932_p10 = por %p3931_p9, %p3930_p5 }
 0x53e   : > { %p3933_p2 = pnand %p3932_p10, %p3926_p6 }
 0x57a   : > { %v3720_v61 = vpop.permute.xlu1 %3719  ;;  %v3710_v25 = vpop.permute.xlu0 %3709 }
 0x57b   : > { %v3722_v41 = vunpack.i.h.bf16 %v3720_v61  ;;  %v3721_v42 = vunpack.i.l.bf16 %v3720_v61  ;;  %v3712_v0 = vunpack.i.h.bf16 %v3710_v25  ;;  %v3711_v27 = vunpack.i.l.bf16 %v3710_v25 }
 0x57d   : > { %v3115_v19 = vpack.c.bf16 %v3722_v41, %v3721_v42  ;;  %v3148_v8 = vpack.c.bf16 %v3712_v0, %v3711_v27 }
 0x57e   : > { %v3730_v13 = vpop.permute.xlu1 %3729  ;;  %v3715_v36 = vpop.permute.xlu0 %3714 }
 0x57f   : > { %3116 = vmatprep.subr.bf16.mxu0 %v3115_v19  ;;  %3149 = vmatpush1.bf16.msra.mxu1 %v3148_v8  ;;  %v3717_v18 = vunpack.i.h.bf16 %v3715_v36  ;;  %v3716_v28 = vunpack.i.l.bf16 %v3715_v36  ;;  %v3732_v53 = vunpack.i.h.bf16 %v3730_v13  ;;  %v3731_v47 = vunpack.i.l.bf16 %v3730_v13 }
 0x580   : > { %3118 = vmatpush3.bf16.msra.mxu0 %v3117_v1  ;;  %3150 = vmatprep.subr.bf16.mxu1 %v4038_v2 }
 0x581   : > { %v3154_v21 = vpack.c.bf16 %v3717_v18, %v3716_v28  ;;  %v3123_v32 = vpack.c.bf16 %v3732_v53, %v3731_v47 }
 0x582   : > { %v3735_v37 = vpop.permute.xlu1 %3734  ;;  %v3725_v23 = vpop.permute.xlu0 %3724 }
 0x583   : > { %v3737_v49 = vunpack.i.h.bf16 %v3735_v37  ;;  %v3736_v20 = vunpack.i.l.bf16 %v3735_v37  ;;  %v3727_v62 = vunpack.i.h.bf16 %v3725_v23  ;;  %v3726_v63 = vunpack.i.l.bf16 %v3725_v23 }
 0x585   : > { %v3151_v50 = vpack.c.bf16 %v3737_v49, %v3736_v20  ;;  %v3160_v35 = vpack.c.bf16 %v3727_v62, %v3726_v63 }
 0x586   : > { %v3740_v29 = vpop.permute.xlu1 %3739  ;;  %v3750_v56 = vpop.permute.xlu0 %3749 }
 0x587   : > { %3152 = vmatpush1.bf16.msra.mxu1 %v3151_v50  ;;  %v3752_v51 = vunpack.i.h.bf16 %v3750_v56  ;;  %v3751_v52 = vunpack.i.l.bf16 %v3750_v56  ;;  %v3742_v17 = vunpack.i.h.bf16 %v3740_v29  ;;  %v3741_v26 = vunpack.i.l.bf16 %v3740_v29 }
 0x588   : > { %3153 = vmatprep.subr.bf16.mxu1 %v4038_v2 }
 0x589   : > { %v3157_v30 = vpack.c.bf16 %v3752_v51, %v3751_v52  ;;  %v3125_v14 = vpack.c.bf16 %v3742_v17, %v3741_v26 }
 0x58a   : > { %v3745_v55 = vpop.permute.xlu1 %3744  ;;  %v3790_v33 = vpop.permute.xlu0 %3789 }
 0x58b   : > { %3155 = vmatpush1.bf16.msra.mxu1 %v3154_v21  ;;  %v3792_v16 = vunpack.i.h.bf16 %v3790_v33  ;;  %v3791_v15 = vunpack.i.l.bf16 %v3790_v33  ;;  %v3747_v9 = vunpack.i.h.bf16 %v3745_v55  ;;  %v3746_v7 = vunpack.i.l.bf16 %v3745_v55 }
 0x58c   : > { %3156 = vmatprep.subr.bf16.mxu1 %v4038_v2 }
 0x58d   : > { %v3163_v3 = vpack.c.bf16 %v3792_v16, %v3791_v15  ;;  %v3166_v6 = vpack.c.bf16 %v3747_v9, %v3746_v7  ;;  %v1510_v9 = vld [vmem:[#allocation2 + $0x28] sm:$0xff]  ;;  %v1512_v7 = vld [vmem:[#allocation2 + $0x38] sm:$0xff] }
 0x58e   : > { %v3755_v48 = vpop.permute.xlu1 %3754  ;;  %v3795_v34 = vpop.permute.xlu0 %3794 }
 0x58f   : > { %v3757_v11 = vunpack.i.h.bf16 %v3755_v48  ;;  %v3756_v59 = vunpack.i.l.bf16 %v3755_v48  ;;  %3158 = vmatpush1.bf16.msra.mxu1 %v3157_v30  ;;  %v3797_v60 = vunpack.i.h.bf16 %v3795_v34  ;;  %v3796_v39 = vunpack.i.l.bf16 %v3795_v34 }
 0x590   : > { %3159 = vmatprep.subr.bf16.mxu1 %v4038_v2 }
 0x591   : > { %v3119_v40 = vpack.c.bf16 %v3757_v11, %v3756_v59  ;;  %v3127_v43 = vpack.c.bf16 %v3797_v60, %v3796_v39  ;;  %v1505_v60 = vld [vmem:[#allocation2] sm:$0xff]  ;;  %v1507_v39 = vld [vmem:[#allocation2 + $0x10] sm:$0xff] }
 0x592   : > { %v3760_v54 = vpop.permute.xlu1 %3759  ;;  %v3800_v38 = vpop.permute.xlu0 %3799 }
 0x593   : > { %3120 = vmatprep.subr.bf16.mxu0 %v3119_v40  ;;  %3161 = vmatpush1.bf16.msra.mxu1 %v3160_v35  ;;  %v3802_v10 = vunpack.i.h.bf16 %v3800_v38  ;;  %v3801_v4 = vunpack.i.l.bf16 %v3800_v38  ;;  %v3762_v57 = vunpack.i.h.bf16 %v3760_v54  ;;  %v3761_v58 = vunpack.i.l.bf16 %v3760_v54 }
 0x594   : > { %3122 = vmatpush3.bf16.msra.mxu0 %v3121_v45  ;;  %3162 = vmatprep.subr.bf16.mxu1 %v4038_v2 }
 0x595   : > { %3124 = vmatprep.subr.bf16.mxu0 %v3123_v32  ;;  %v3129_v24 = vpack.c.bf16 %v3802_v10, %v3801_v4  ;;  %v3131_v25 = vpack.c.bf16 %v3762_v57, %v3761_v58  ;;  %v1514_v10 = vld [vmem:[#allocation2 + $0x48] sm:$0xff]  ;;  %v1516_v4 = vld [vmem:[#allocation2 + $0x58] sm:$0xff]  ;;  %v1517_v57 = vld [vmem:[#allocation2 + $0x60] sm:$0xff] }
 0x596   : > { %v3765_v31 = vpop.permute.xlu1 %3764  ;;  %v3805_v5 = vpop.permute.xlu0 %3804  ;;  %v1519_v58 = vld [vmem:[#allocation2 + $0x70] sm:$0xff] }
 0x597   : > { %3164 = vmatpush1.bf16.msra.mxu1 %v3163_v3  ;;  %v3807_v1 = vunpack.i.h.bf16 %v3805_v5  ;;  %v3806_v46 = vunpack.i.l.bf16 %v3805_v5  ;;  %v3767_v45 = vunpack.i.h.bf16 %v3765_v31  ;;  %v3766_v22 = vunpack.i.l.bf16 %v3765_v31  ;;  %v1509_v3 = vld [vmem:[#allocation2 + $0x20] sm:$0xff]  ;;  %v1515_v31 = vld [vmem:[#allocation2 + $0x50] sm:$0xff]  ;;  %v1518_v5 = vld [vmem:[#allocation2 + $0x68] sm:$0xff] }
 0x598   : > { %3126 = vmatpush3.bf16.msra.mxu0 %v3125_v14  ;;  %3165 = vmatprep.subr.bf16.mxu1 %v4038_v2  ;;  %v1511_v14 = vld [vmem:[#allocation2 + $0x30] sm:$0xff] }
 0x599   : > { %3128 = vmatprep.subr.bf16.mxu0 %v3127_v43  ;;  %v3169_v0 = vpack.c.bf16 %v3807_v1, %v3806_v46  ;;  %v3133_v8 = vpack.c.bf16 %v3767_v45, %v3766_v22  ;;  %v1520_v43 = vld [vmem:[#allocation2 + $0x78] sm:$0xff]  ;;  %v1521_v46 = vld [vmem:[#allocation2 + $0x80] sm:$0xff]  ;;  %v1526_v45 = vld [vmem:[#allocation2 + $0xa8] sm:$0xff] }
 0x59a   : > { %v3770_v44 = vpop.permute.xlu1 %3769  ;;  %v3810_v61 = vpop.permute.xlu0 %3809  ;;  %v1524_v1 = vld [vmem:[#allocation2 + $0x98] sm:$0xff] }
 0x59b   : > { %v3812_v41 = vunpack.i.h.bf16 %v3810_v61  ;;  %v3811_v42 = vunpack.i.l.bf16 %v3810_v61  ;;  %3167 = vmatpush1.bf16.msra.mxu1 %v3166_v6  ;;  %v3772_v27 = vunpack.i.h.bf16 %v3770_v44  ;;  %v3771_v19 = vunpack.i.l.bf16 %v3770_v44  ;;  %v1522_v6 = vld [vmem:[#allocation2 + $0x88] sm:$0xff]  ;;  %v1528_v22 = vld [vmem:[#allocation2 + $0xb8] sm:$0xff]  ;;  %v1525_v44 = vld [vmem:[#allocation2 + $0xa0] sm:$0xff] }
 0x59c   : > { %3130 = vmatpush3.bf16.msra.mxu0 %v3129_v24  ;;  %3168 = vmatprep.subr.bf16.mxu1 %v4038_v2  ;;  %v1523_v24 = vld [vmem:[#allocation2 + $0x90] sm:$0xff] }
 0x59d   : > { %3132 = vmatprep.subr.bf16.mxu0 %v3131_v25  ;;  %v3135_v13 = vpack.c.bf16 %v3812_v41, %v3811_v42  ;;  %v3172_v28 = vpack.c.bf16 %v3772_v27, %v3771_v19  ;;  %v1527_v61 = vld [vmem:[#allocation2 + $0xb0] sm:$0xff]  ;;  %v1530_v25 = vld [vmem:[#allocation2 + $0xc8] sm:$0xff]  ;;  %v1532_v41 = vld [vmem:[#allocation2 + $0xd8] sm:$0xff] }
 0x59e   : > { %v3775_v36 = vpop.permute.xlu1 %3774  ;;  %v3815_v37 = vpop.permute.xlu0 %3814  ;;  %v1529_v42 = vld [vmem:[#allocation2 + $0xc0] sm:$0xff]  ;;  %v1534_v27 = vld [vmem:[#allocation2 + $0xe8] sm:$0xff]  ;;  %v1536_v19 = vld [vmem:[#allocation2 + $0xf8] sm:$0xff] }
 0x59f   : > { %v3777_v23 = vunpack.i.h.bf16 %v3775_v36  ;;  %v3776_v49 = vunpack.i.l.bf16 %v3775_v36  ;;  %v3817_v20 = vunpack.i.h.bf16 %v3815_v37  ;;  %v3816_v18 = vunpack.i.l.bf16 %v3815_v37  ;;  %3170 = vmatpush1.bf16.msra.mxu1 %v3169_v0  ;;  %v1531_v0 = vld [vmem:[#allocation2 + $0xd0] sm:$0xff]  ;;  %v1538_v36 = vld [vmem:[#allocation2 + $0x108] sm:$0xff]  ;;  %v1540_v37 = vld [vmem:[#allocation2 + $0x118] sm:$0xff] }
 0x5a0   : > { %3134 = vmatpush3.bf16.msra.mxu0 %v3133_v8  ;;  %3171 = vmatprep.subr.bf16.mxu1 %v4038_v2  ;;  %v1533_v8 = vld [vmem:[#allocation2 + $0xe0] sm:$0xff] }
 0x5a1   : > { %v3137_v50 = vpack.c.bf16 %v3817_v20, %v3816_v18  ;;  %3136 = vmatprep.subr.bf16.mxu0 %v3135_v13  ;;  %v3139_v29 = vpack.c.bf16 %v3777_v23, %v3776_v49  ;;  %v1535_v13 = vld [vmem:[#allocation2 + $0xf0] sm:$0xff]  ;;  %v1537_v23 = vld [vmem:[#allocation2 + $0x100] sm:$0xff]  ;;  %v1542_v20 = vld [vmem:[#allocation2 + $0x128] sm:$0xff] }
 0x5a2   : > { %v3780_v56 = vpop.permute.xlu1 %3779  ;;  %v3820_v21 = vpop.permute.xlu0 %3819  ;;  %v1539_v49 = vld [vmem:[#allocation2 + $0x110] sm:$0xff]  ;;  %v1544_v18 = vld [vmem:[#allocation2 + $0x138] sm:$0xff] }
 0x5a3   : > { %v3782_v51 = vunpack.i.h.bf16 %v3780_v56  ;;  %v3781_v52 = vunpack.i.l.bf16 %v3780_v56  ;;  %v3822_v55 = vunpack.i.h.bf16 %v3820_v21  ;;  %v3821_v33 = vunpack.i.l.bf16 %v3820_v21  ;;  %3173 = vmatpush1.bf16.msra.mxu1 %v3172_v28  ;;  %v1541_v28 = vld [vmem:[#allocation2 + $0x120] sm:$0xff]  ;;  %v1548_v56 = vld [vmem:[#allocation2 + $0x158] sm:$0xff] }
 0x5a4   : > { %3138 = vmatpush3.bf16.msra.mxu0 %v3137_v50  ;;  %3174 = vmatprep.subr.bf16.mxu1 %v4038_v2  ;;  %v1543_v50 = vld [vmem:[#allocation2 + $0x130] sm:$0xff]  ;;  %v1545_v21 = vld [vmem:[#allocation2 + $0x140] sm:$0xff] }
 0x5a5   : > { %v3141_v62 = vpack.c.bf16 %v3782_v51, %v3781_v52  ;;  %v3175_v63 = vpack.c.bf16 %v3822_v55, %v3821_v33  ;;  %3140 = vmatprep.subr.bf16.mxu0 %v3139_v29  ;;  %v1546_v29 = vld [vmem:[#allocation2 + $0x148] sm:$0xff]  ;;  %v1547_v51 = vld [vmem:[#allocation2 + $0x150] sm:$0xff]  ;;  %v1552_v55 = vld [vmem:[#allocation2 + $0x178] sm:$0xff] }
 0x5a6   : > { %v3785_v30 = vpop.permute.xlu1 %3784  ;;  %v3825_v48 = vpop.permute.xlu0 %3824  ;;  %v1550_v52 = vld [vmem:[#allocation2 + $0x168] sm:$0xff]  ;;  %v1549_v33 = vld [vmem:[#allocation2 + $0x160] sm:$0xff] }
 0x5a7   : > { %v3787_v34 = vunpack.i.h.bf16 %v3785_v30  ;;  %v3786_v53 = vunpack.i.l.bf16 %v3785_v30  ;;  %v3827_v47 = vunpack.i.h.bf16 %v3825_v48  ;;  %v3826_v11 = vunpack.i.l.bf16 %v3825_v48  ;;  %3176 = vmatpush1.bf16.msra.mxu1 %v3175_v63  ;;  %v1554_v63 = vld [vmem:[#allocation2 + $0x188] sm:$0xff]  ;;  %v1556_v30 = vld [vmem:[#allocation2 + $0x198] sm:$0xff]  ;;  %v1553_v48 = vld [vmem:[#allocation2 + $0x180] sm:$0xff] }
 0x5a8   : > { %3142 = vmatpush3.bf16.msra.mxu0 %v3141_v62  ;;  %3177 = vmatprep.subr.bf16.mxu1 %v4038_v2  ;;  %v1551_v62 = vld [vmem:[#allocation2 + $0x170] sm:$0xff] }
 0x5a9   : > { %v3178_v59 = vpack.c.bf16 %v3787_v34, %v3786_v53  ;;  %v3143_v35 = vpack.c.bf16 %v3827_v47, %v3826_v11  ;;  %v1555_v34 = vld [vmem:[#allocation2 + $0x190] sm:$0xff]  ;;  %v1558_v53 = vld [vmem:[#allocation2 + $0x1a8] sm:$0xff]  ;;  %v1560_v47 = vld [vmem:[#allocation2 + $0x1b8] sm:$0xff] }
 0x5aa   : > { %v3835_v16 = vpop.permute.xlu1 %3834  ;;  %v3830_v15 = vpop.permute.xlu0 %3829  ;;  %v1557_v11 = vld [vmem:[#allocation2 + $0x1a0] sm:$0xff] }
 0x5ab   : > { %v3837_v40 = vunpack.i.h.bf16 %v3835_v16  ;;  %v3836_v17 = vunpack.i.l.bf16 %v3835_v16  ;;  %v3832_v26 = vunpack.i.h.bf16 %v3830_v15  ;;  %v3831_v54 = vunpack.i.l.bf16 %v3830_v15  ;;  %3144 = vmatprep.subr.bf16.mxu0 %v3143_v35  ;;  %3179 = vmatpush1.bf16.msra.mxu1 %v3178_v59  ;;  %v1559_v59 = vld [vmem:[#allocation2 + $0x1b0] sm:$0xff]  ;;  %v2065_v35 = vld [vmem:[%s5902_s7 + $0x8] sm:$0xff]  ;;  %v2067_v16 = vld [vmem:[%s5902_s7 + $0x18] sm:$0xff] }
 0x5ac   : > { %3180 = vmatprep.subr.bf16.mxu1 %v4038_v2  ;;  %v1513_v2 = vld [vmem:[#allocation2 + $0x40] sm:$0xff]  ;;  %v3211_v15 = vpack.c.bf16 %v2067_v16, %v2065_v35  ;;  %v2106_v16 = vld [vmem:[%s5902_s7 + $0x150] sm:$0xff] }
 0x5ad   : > { %v3181_v38 = vpack.c.bf16 %v3837_v40, %v3836_v17  ;;  %v3145_v32 = vpack.c.bf16 %v3832_v26, %v3831_v54  ;;  %v2064_v40 = vld [vmem:[%s5902_s7] sm:$0xff]  ;;  %v2066_v17 = vld [vmem:[%s5902_s7 + $0x10] sm:$0xff]  ;;  %v2069_v54 = vld [vmem:[%s5902_s7 + $0x28] sm:$0xff] }
 0x5ae   : > { %v3213_v26 = vpack.c.bf16 %v2066_v17, %v2064_v40  ;;  %v2104_v35 = vld [vmem:[%s5902_s7 + $0x140] sm:$0xff]  ;;  %v2109_v40 = vld [vmem:[%s5902_s7 + $0x168] sm:$0xff]  ;;  %v2111_v17 = vld [vmem:[%s5902_s7 + $0x178] sm:$0xff] }
 0x5af   : > { %3146 = vmatpush3.bf16.msra.mxu0 %v3145_v32  ;;  %3182 = vmatpush1.bf16.msra.mxu1 %v3181_v38  ;;  %v2071_v38 = vld [vmem:[%s5902_s7 + $0x38] sm:$0xff] }
 0x5b0   : > { %3212 = vmatprep.subr.bf16.mxu1 %v3211_v15  ;;  %v3215_v32 = vpack.c.bf16 %v2071_v38, %v2069_v54  ;;  %v3253_v15 = vpack.c.bf16 %v2106_v16, %v2104_v35  ;;  %v2108_v54 = vld [vmem:[%s5902_s7 + $0x160] sm:$0xff]  ;;  %v2110_v38 = vld [vmem:[%s5902_s7 + $0x170] sm:$0xff]  ;;  %v2133_v16 = vld [vmem:[%s5902_s7 + $0x228] sm:$0xff] }
 0x5b1   : > { %v2130_v35 = vld [vmem:[%s5902_s7 + $0x210] sm:$0xff] }
 0x5b2   : > { %1669 = vmatmul.mubr.f32.vlgmr.msra.gmra.mrb[24].mxu0 %v1505_v60  ;;  %1804 = vmatmul.mubr.f32.vlgmr.msra.gmra.mrb[8].mxu1 %v1507_v39  ;;  %v2068_v60 = vld [vmem:[%s5902_s7 + $0x20] sm:$0xff]  ;;  %v2070_v39 = vld [vmem:[%s5902_s7 + $0x30] sm:$0xff] }
 0x5b3   : > { %1673 = vmatprep.mubr.f32.mxu0 %v1510_v9  ;;  %2656 = vmatprep.mubr.msk.f32.mxu1 %vm1561_vm7, %v1512_v7  ;;  %v3217_v9 = vpack.c.bf16 %v2070_v39, %v2068_v60  ;;  %v2073_v7 = vld [vmem:[%s5902_s7 + $0x48] sm:$0xff]  ;;  %v2115_v39 = vld [vmem:[%s5902_s7 + $0x198] sm:$0xff] }
 0x5b4   : > { %3214 = vmatpush1.bf16.msra.mxu1 %v3213_v26  ;;  %v3255_v26 = vpack.c.bf16 %v2111_v17, %v2109_v40  ;;  %v2113_v60 = vld [vmem:[%s5902_s7 + $0x188] sm:$0xff] }
 0x5b5   : > { %3216 = vmatprep.subr.bf16.mxu1 %v3215_v32  ;;  %v3257_v32 = vpack.c.bf16 %v2110_v38, %v2108_v54  ;;  %v2132_v54 = vld [vmem:[%s5902_s7 + $0x220] sm:$0xff]  ;;  %v2134_v38 = vld [vmem:[%s5902_s7 + $0x230] sm:$0xff] }
 0x5b6   : > { %1674 = vmatmul.mubr.f32.gmra.mrb[26].mxu0 %v1509_v3  ;;  %1809 = vmatmul.mubr.f32.gmra.mrb[10].mxu1 %v1511_v14  ;;  %v2075_v3 = vld [vmem:[%s5902_s7 + $0x58] sm:$0xff] }
 0x5b7   : > { %1678 = vmatprep.mubr.f32.mxu0 %v1514_v10  ;;  %2657 = vmatprep.mubr.msk.f32.mxu1 %vm1561_vm7, %v1516_v4  ;;  %v3219_v14 = vpack.c.bf16 %v2075_v3, %v2073_v7  ;;  %v2072_v10 = vld [vmem:[%s5902_s7 + $0x40] sm:$0xff]  ;;  %v2074_v4 = vld [vmem:[%s5902_s7 + $0x50] sm:$0xff] }
 0x5b8   : > { %3218 = vmatpush1.bf16.msra.mxu1 %v3217_v9  ;;  %v3259_v9 = vpack.c.bf16 %v2115_v39, %v2113_v60  ;;  %v2112_v7 = vld [vmem:[%s5902_s7 + $0x180] sm:$0xff]  ;;  %v2114_v3 = vld [vmem:[%s5902_s7 + $0x190] sm:$0xff]  ;;  %v2137_v60 = vld [vmem:[%s5902_s7 + $0x248] sm:$0xff] }
 0x5b9   : > { %3220 = vmatprep.subr.bf16.mxu1 %v3219_v14  ;;  %v3261_v14 = vpack.c.bf16 %v2114_v3, %v2112_v7  ;;  %v2139_v39 = vld [vmem:[%s5902_s7 + $0x258] sm:$0xff]  ;;  %v3281_v7 = vpack.c.bf16 %v2134_v38, %v2132_v54  ;;  %v2165_v54 = vld [vmem:[%s5902_s7 + $0x328] sm:$0xff] }
 0x5ba   : > { %1679 = vmatmul.mubr.f32.gmra.mrb[28].mxu0 %v1513_v2  ;;  %1814 = vmatmul.mubr.f32.gmra.mrb[12].mxu1 %v1515_v31  ;;  %v3221_v2 = vpack.c.bf16 %v2074_v4, %v2072_v10  ;;  %v2077_v31 = vld [vmem:[%s5902_s7 + $0x68] sm:$0xff]  ;;  %v2167_v38 = vld [vmem:[%s5902_s7 + $0x338] sm:$0xff] }
 0x5bb   : > { %1683 = vmatprep.mubr.f32.mxu0 %v1518_v5  ;;  %2658 = vmatprep.mubr.msk.f32.mxu1 %vm1561_vm7, %v1520_v43  ;;  %v2079_v5 = vld [vmem:[%s5902_s7 + $0x78] sm:$0xff]  ;;  %v5459_v10 = vld [vmem:[%s4221_s28 + $0x8] sm:$0xff] }
 0x5bc   : > { %3222 = vmatpush1.bf16.msra.mxu1 %v3221_v2  ;;  %v3223_v43 = vpack.c.bf16 %v2079_v5, %v2077_v31  ;;  %v5462_v4 = vld [vmem:[%s4221_s28 + $0x28] sm:$0xff]  ;;  %v5467_v31 = vld [vmem:[%s4221_s28 + $0x18] sm:$0xff] }
 0x5bd   : > { %v2035_v2 = vmax.f32 %v5459_v10, %v5462_v4  ;;  %v5470_v5 = vld [vmem:[%s4221_s28 + $0x38] sm:$0xff] }
 0x5be   : > { %1684 = vmatmul.mubr.f32.gmra.mrb[30].mxu0 %v1517_v57  ;;  %1819 = vmatmul.mubr.f32.gmra.mrb[14].mxu1 %v1519_v58  ;;  %v2076_v57 = vld [vmem:[%s5902_s7 + $0x60] sm:$0xff]  ;;  %v2078_v58 = vld [vmem:[%s5902_s7 + $0x70] sm:$0xff] }
 0x5bf   : > { %1688 = vmatprep.mubr.f32.mxu0 %v1522_v6  ;;  %2659 = vmatprep.mubr.msk.f32.mxu1 %vm1561_vm7, %v1524_v1  ;;  %v3225_v6 = vpack.c.bf16 %v2078_v58, %v2076_v57  ;;  %v2081_v1 = vld [vmem:[%s5902_s7 + $0x88] sm:$0xff]  ;;  %v2119_v58 = vld [vmem:[%s5902_s7 + $0x1b8] sm:$0xff] }
 0x5c0   : > { %3224 = vmatprep.subr.bf16.mxu1 %v3223_v43  ;;  %v2036_v43 = vmax.f32 %v5467_v31, %v5470_v5  ;;  %v2117_v57 = vld [vmem:[%s5902_s7 + $0x1a8] sm:$0xff] }
 0x5c1   : > { %3226 = vmatpush1.bf16.msra.mxu1 %v3225_v6  ;;  %v5481_v6 = vld [vmem:[%s4221_s28] sm:$0xff] }
 0x5c2   : > { %1689 = vmatmul.mubr.f32.gmra.mrb[32].mxu0 %v1521_v46  ;;  %1824 = vmatmul.mubr.f32.gmra.mrb[16].mxu1 %v1523_v24  ;;  %v2083_v46 = vld [vmem:[%s5902_s7 + $0x98] sm:$0xff] }
 0x5c3   : > { %1693 = vmatprep.mubr.f32.mxu0 %v1526_v45  ;;  %2660 = vmatprep.mubr.msk.f32.mxu1 %vm1561_vm7, %v1528_v22  ;;  %v3227_v24 = vpack.c.bf16 %v2083_v46, %v2081_v1  ;;  %v2080_v45 = vld [vmem:[%s5902_s7 + $0x80] sm:$0xff]  ;;  %v2082_v22 = vld [vmem:[%s5902_s7 + $0x90] sm:$0xff] }
 0x5c4   : > { %v5484_v1 = vld [vmem:[%s4221_s28 + $0x20] sm:$0xff] }
 0x5c5   : > { %3228 = vmatprep.subr.bf16.mxu1 %v3227_v24  ;;  %v2026_v46 = vmax.f32 %v5481_v6, %v5484_v1  ;;  %v5489_v24 = vld [vmem:[%s4221_s28 + $0x10] sm:$0xff] }
 0x5c6   : > { %1694 = vmatmul.mubr.f32.gmra.mrb[34].mxu0 %v1525_v44  ;;  %1829 = vmatmul.mubr.f32.gmra.mrb[18].mxu1 %v1527_v61  ;;  %v3229_v44 = vpack.c.bf16 %v2082_v22, %v2080_v45  ;;  %v2085_v61 = vld [vmem:[%s5902_s7 + $0xa8] sm:$0xff]  ;;  %v5492_v45 = vld [vmem:[%s4221_s28 + $0x30] sm:$0xff]  ;;  %s2673_s28 = sld [smem:[#allocation6 + $0x1]] }
 0x5c7   : > { %1698 = vmatprep.mubr.f32.mxu0 %v1530_v25  ;;  %2661 = vmatprep.mubr.msk.f32.mxu1 %vm1561_vm7, %v1532_v41  ;;  %v2087_v25 = vld [vmem:[%s5902_s7 + $0xb8] sm:$0xff]  ;;  %v2027_v22 = vmax.f32 %v5489_v24, %v5492_v45 }
 0x5c8   : > { %3230 = vmatpush1.bf16.msra.mxu1 %v3229_v44  ;;  %v3231_v41 = vpack.c.bf16 %v2087_v25, %v2085_v61  ;;  %v3263_v44 = vpack.c.bf16 %v2119_v58, %v2117_v57  ;;  %v2116_v61 = vld [vmem:[%s5902_s7 + $0x1a0] sm:$0xff]  ;;  %v2118_v25 = vld [vmem:[%s5902_s7 + $0x1b0] sm:$0xff]  ;;  %v2141_v57 = vld [vmem:[%s5902_s7 + $0x268] sm:$0xff] }
 0x5c9   : > { %v2143_v58 = vld [vmem:[%s5902_s7 + $0x278] sm:$0xff] }
 0x5ca   : > { %1699 = vmatmul.mubr.f32.gmra.mrb[36].mxu0 %v1529_v42  ;;  %1834 = vmatmul.mubr.f32.gmra.mrb[20].mxu1 %v1531_v0  ;;  %v2084_v42 = vld [vmem:[%s5902_s7 + $0xa0] sm:$0xff]  ;;  %v2086_v0 = vld [vmem:[%s5902_s7 + $0xb0] sm:$0xff] }
 0x5cb   : > { %1703 = vmatprep.mubr.f32.mxu0 %v1534_v27  ;;  %2662 = vmatprep.mubr.msk.f32.mxu1 %vm1561_vm7, %v1536_v19  ;;  %v3233_v27 = vpack.c.bf16 %v2086_v0, %v2084_v42  ;;  %v2089_v19 = vld [vmem:[%s5902_s7 + $0xc8] sm:$0xff]  ;;  %v3265_v42 = vpack.c.bf16 %v2118_v25, %v2116_v61  ;;  %v2028_v0 = vmax.f32 %v2026_v46, %v2027_v22  ;;  %v2140_v25 = vld [vmem:[%s5902_s7 + $0x260] sm:$0xff] }
 0x5cc   : > { %3232 = vmatprep.subr.bf16.mxu1 %v3231_v41  ;;  %v2037_v41 = vmax.f32 %v2035_v2, %v2036_v43  ;;  %v2136_v2 = vld [vmem:[%s5902_s7 + $0x240] sm:$0xff]  ;;  %v2138_v43 = vld [vmem:[%s5902_s7 + $0x250] sm:$0xff]  ;;  %v3287_v61 = vpack.c.bf16 %v2143_v58, %v2141_v57 }
 0x5cd   : > { %3234 = vmatpush1.bf16.msra.mxu1 %v3233_v27  ;;  %v3285_v22 = vpack.c.bf16 %v2138_v43, %v2136_v2  ;;  %v2168_v58 = vld [vmem:[%s5902_s7 + $0x340] sm:$0xff] }
 0x5ce   : > { %1704 = vmatmul.mubr.f32.gmra.mrb[38].mxu0 %v1533_v8  ;;  %1839 = vmatmul.mubr.f32.gmra.mrb[22].mxu1 %v1535_v13  ;;  %v2091_v8 = vld [vmem:[%s5902_s7 + $0xd8] sm:$0xff]  ;;  %v2038_v27 = vrot.slane %v2037_v41, 4 }
 0x5cf   : > { %1708 = vmatprep.mubr.f32.mxu0 %v1538_v36  ;;  %2663 = vmatprep.mubr.msk.f32.mxu1 %vm1561_vm7, %v1540_v37  ;;  %v3235_v13 = vpack.c.bf16 %v2091_v8, %v2089_v19  ;;  %v2088_v36 = vld [vmem:[%s5902_s7 + $0xc0] sm:$0xff]  ;;  %v2090_v37 = vld [vmem:[%s5902_s7 + $0xd0] sm:$0xff]  ;;  %v2121_v19 = vld [vmem:[%s5902_s7 + $0x1c8] sm:$0xff] }
 0x5d0   : > { %v2123_v8 = vld [vmem:[%s5902_s7 + $0x1d8] sm:$0xff] }
 0x5d1   : > { %3236 = vmatprep.subr.bf16.mxu1 %v3235_v13  ;;  %v2029_v13 = vrot.slane %v2028_v0, 4 }
 0x5d2   : > { %1709 = vmatmul.mubr.f32.gmra.mrb[40].mxu0 %v1537_v23  ;;  %1844 = vmatmul.mubr.f32.gmra.mrb[24].mxu1 %v1539_v49  ;;  %v3237_v23 = vpack.c.bf16 %v2090_v37, %v2088_v36  ;;  %v2093_v49 = vld [vmem:[%s5902_s7 + $0xe8] sm:$0xff]  ;;  %v3267_v36 = vpack.c.bf16 %v2123_v8, %v2121_v19  ;;  %v2120_v37 = vld [vmem:[%s5902_s7 + $0x1c0] sm:$0xff] }
 0x5d3   : > { %1713 = vmatprep.mubr.f32.mxu0 %v1542_v20  ;;  %2664 = vmatprep.mubr.msk.f32.mxu1 %vm1561_vm7, %v1544_v18  ;;  %v2095_v20 = vld [vmem:[%s5902_s7 + $0xf8] sm:$0xff] }
 0x5d4   : > { %3238 = vmatpush1.bf16.msra.mxu1 %v3237_v23  ;;  %v3239_v18 = vpack.c.bf16 %v2095_v20, %v2093_v49  ;;  %v2122_v23 = vld [vmem:[%s5902_s7 + $0x1d0] sm:$0xff]  ;;  %v2039_v49 = vmax.f32 %v2037_v41, %v2038_v27  ;;  %v1888_v20 = vld [vmem:[%s5899_s4] sm:$0xff] }
 0x5d5   : > { %v2142_v41 = vld [vmem:[%s5902_s7 + $0x270] sm:$0xff] }
 0x5d6   : > { %1714 = vmatmul.mubr.f32.gmra.mrb[42].mxu0 %v1541_v28  ;;  %1849 = vmatmul.mubr.f32.gmra.mrb[26].mxu1 %v1543_v50  ;;  %v2092_v28 = vld [vmem:[%s5902_s7 + $0xe0] sm:$0xff]  ;;  %v2094_v50 = vld [vmem:[%s5902_s7 + $0xf0] sm:$0xff]  ;;  %v3289_v19 = vpack.c.bf16 %v2142_v41, %v2140_v25 }
 0x5d7   : > { %1718 = vmatprep.mubr.f32.mxu0 %v1546_v29  ;;  %2665 = vmatprep.mubr.msk.f32.mxu1 %vm1561_vm7, %v1548_v56  ;;  %v3241_v29 = vpack.c.bf16 %v2094_v50, %v2092_v28  ;;  %v2097_v56 = vld [vmem:[%s5902_s7 + $0x108] sm:$0xff]  ;;  %v2030_v28 = vmax.f32 %v2028_v0, %v2029_v13  ;;  %v2040_v50 = vrot.slane %v2039_v49, 2  ;;  %v2147_v0 = vld [vmem:[%s5902_s7 + $0x298] sm:$0xff] }
 0x5d8   : > { %3240 = vmatprep.subr.bf16.mxu1 %v3239_v18  ;;  %v3269_v18 = vpack.c.bf16 %v2122_v23, %v2120_v37  ;;  %v2146_v37 = vld [vmem:[%s5902_s7 + $0x290] sm:$0xff]  ;;  %v2149_v23 = vld [vmem:[%s5902_s7 + $0x2a8] sm:$0xff] }
 0x5d9   : > { %3242 = vmatpush1.bf16.msra.mxu1 %v3241_v29  ;;  %v2125_v29 = vld [vmem:[%s5902_s7 + $0x1e8] sm:$0xff] }
 0x5da   : > { %1719 = vmatmul.mubr.f32.gmra.mrb[44].mxu0 %v1545_v21  ;;  %1854 = vmatmul.mubr.f32.gmra.mrb[28].mxu1 %v1547_v51  ;;  %v2099_v21 = vld [vmem:[%s5902_s7 + $0x118] sm:$0xff] }
 0x5db   : > { %1723 = vmatprep.mubr.f32.mxu0 %v1550_v52  ;;  %2666 = vmatprep.mubr.msk.f32.mxu1 %vm1561_vm7, %v1552_v55  ;;  %v3243_v51 = vpack.c.bf16 %v2099_v21, %v2097_v56  ;;  %v2096_v52 = vld [vmem:[%s5902_s7 + $0x100] sm:$0xff]  ;;  %v2098_v55 = vld [vmem:[%s5902_s7 + $0x110] sm:$0xff]  ;;  %v2127_v56 = vld [vmem:[%s5902_s7 + $0x1f8] sm:$0xff]  ;;  %v2031_v21 = vrot.slane %v2030_v28, 2 }
 0x5dd   : > { %3244 = vmatprep.subr.bf16.mxu1 %v3243_v51  ;;  %v3271_v51 = vpack.c.bf16 %v2127_v56, %v2125_v29  ;;  %v2148_v29 = vld [vmem:[%s5902_s7 + $0x2a0] sm:$0xff]  ;;  %v2150_v56 = vld [vmem:[%s5902_s7 + $0x2b0] sm:$0xff] }
 0x5de   : > { %1724 = vmatmul.mubr.f32.gmra.mrb[46].mxu0 %v1549_v33  ;;  %1859 = vmatmul.mubr.f32.gmra.mrb[30].mxu1 %v1551_v62  ;;  %v3245_v33 = vpack.c.bf16 %v2098_v55, %v2096_v52  ;;  %v2101_v62 = vld [vmem:[%s5902_s7 + $0x128] sm:$0xff]  ;;  %v2124_v52 = vld [vmem:[%s5902_s7 + $0x1e0] sm:$0xff]  ;;  %v2126_v55 = vld [vmem:[%s5902_s7 + $0x1f0] sm:$0xff] }
 0x5df   : > { %1728 = vmatprep.mubr.f32.mxu0 %v1554_v63  ;;  %2667 = vmatprep.mubr.msk.f32.mxu1 %vm1561_vm7, %v1556_v30  ;;  %v2103_v63 = vld [vmem:[%s5902_s7 + $0x138] sm:$0xff] }
 0x5e0   : > { %3246 = vmatpush1.bf16.msra.mxu1 %v3245_v33  ;;  %v3247_v30 = vpack.c.bf16 %v2103_v63, %v2101_v62  ;;  %v2041_v33 = vmax.f32 %v2039_v49, %v2040_v50  ;;  %v3273_v62 = vpack.c.bf16 %v2126_v55, %v2124_v52  ;;  %v2032_v63 = vmax.f32 %v2030_v28, %v2031_v21  ;;  %v2151_v49 = vld [vmem:[%s5902_s7 + $0x2b8] sm:$0xff]  ;;  %v2153_v21 = vld [vmem:[%s5902_s7 + $0x2c8] sm:$0xff] }
 0x5e1   : > { %v3295_v50 = vpack.c.bf16 %v2151_v49, %v2149_v23  ;;  %v3297_v55 = vpack.c.bf16 %v2150_v56, %v2148_v29  ;;  %v2178_v23 = vld [vmem:[%s5902_s7 + $0x390] sm:$0xff]  ;;  %v2181_v49 = vld [vmem:[%s5902_s7 + $0x3a8] sm:$0xff]  ;;  %v2180_v29 = vld [vmem:[%s5902_s7 + $0x3a0] sm:$0xff] }
 0x5e2   : > { %1729 = vmatmul.mubr.f32.gmra.mrb[48].mxu0 %v1553_v48  ;;  %1864 = vmatmul.mubr.f32.gmra.mrb[32].mxu1 %v1555_v34  ;;  %v2100_v48 = vld [vmem:[%s5902_s7 + $0x120] sm:$0xff]  ;;  %v2102_v34 = vld [vmem:[%s5902_s7 + $0x130] sm:$0xff] }
 0x5e3   : > { %1733 = vmatprep.mubr.f32.mxu0 %v1558_v53  ;;  %2668 = vmatprep.mubr.msk.f32.mxu1 %vm1561_vm7, %v1560_v47  ;;  %v3249_v53 = vpack.c.bf16 %v2102_v34, %v2100_v48  ;;  %v2105_v47 = vld [vmem:[%s5902_s7 + $0x148] sm:$0xff]  ;;  %v2131_v34 = vld [vmem:[%s5902_s7 + $0x218] sm:$0xff]  ;;  %v2182_v56 = vld [vmem:[%s5902_s7 + $0x3b0] sm:$0xff] }
 0x5e4   : > { %3248 = vmatprep.subr.bf16.mxu1 %v3247_v30  ;;  %v2042_v30 = vrot.slane %v2041_v33, 1  ;;  %v2129_v48 = vld [vmem:[%s5902_s7 + $0x208] sm:$0xff] }
 0x5e5   : > { %3250 = vmatpush1.bf16.msra.mxu1 %v3249_v53  ;;  %v2033_v53 = vrot.slane %v2032_v63, 1 }
 0x5e6   : > { %1734 = vmatmul.mubr.f32.gmra.mrb[50].mxu0 %v1557_v11  ;;  %1869 = vmatmul.mubr.f32.gmra.mrb[34].mxu1 %v1559_v59  ;;  %v2107_v11 = vld [vmem:[%s5902_s7 + $0x158] sm:$0xff] }
 0x5e7   : > { %v3251_v59 = vpack.c.bf16 %v2107_v11, %v2105_v47  ;;  %2981 = vmatprep.mubr.msk.f32.mxu0 %vm1892_vm8, %v1888_v20  ;;  %v2043_v47 = vmax.f32 %v2041_v33, %v2042_v30  ;;  %v3275_v11 = vpack.c.bf16 %v2131_v34, %v2129_v48  ;;  %v2034_v40 = vmax.f32 %v2032_v63, %v2033_v53  ;;  %v2154_v63 = vld [vmem:[%s5902_s7 + $0x2d0] sm:$0xff]  ;;  %v2157_v30 = vld [vmem:[%s5902_s7 + $0x2e8] sm:$0xff]  ;;  %v2159_v48 = vld [vmem:[%s5902_s7 + $0x2f8] sm:$0xff] }
 0x5e8   : > { %v3303_v53 = vpack.c.bf16 %v2159_v48, %v2157_v30  ;;  %v2189_v30 = vld [vmem:[%s5902_s7 + $0x3e8] sm:$0xff]  ;;  %v2191_v48 = vld [vmem:[%s5902_s7 + $0x3f8] sm:$0xff] }
 0x5e9   : > { %3252 = vmatprep.subr.bf16.mxu1 %v3251_v59  ;;  %v2128_v59 = vld [vmem:[%s5902_s7 + $0x200] sm:$0xff]  ;;  %2256 = vmatprep.mubr.f32.mxu1 %v2043_v47 }
 0x5ea   : > { %3254 = vmatpush1.bf16.msra.mxu1 %v3253_v15  ;;  %v2053_v15 = vadd.f32 %v5467_v31, %v5459_v10  ;;  %v3277_v17 = vpack.c.bf16 %v2130_v35, %v2128_v59  ;;  %v2156_v47 = vld [vmem:[%s5902_s7 + $0x2e0] sm:$0xff]  ;;  %v2161_v59 = vld [vmem:[%s5902_s7 + $0x308] sm:$0xff]  ;;  %v2163_v35 = vld [vmem:[%s5902_s7 + $0x318] sm:$0xff] }
 0x5eb   : > { %3256 = vmatprep.subr.bf16.mxu1 %v3255_v26  ;;  %v2135_v26 = vld [vmem:[%s5902_s7 + $0x238] sm:$0xff] }
 0x5ee   : > { %3258 = vmatpush1.bf16.msra.mxu1 %v3257_v32  ;;  %v3279_v32 = vpack.c.bf16 %v2135_v26, %v2133_v16  ;;  %v2044_v16 = vadd.f32 %v5489_v24, %v5481_v6  ;;  %v2162_v26 = vld [vmem:[%s5902_s7 + $0x310] sm:$0xff] }
 0x5ef   : > { %3260 = vmatprep.subr.bf16.mxu1 %v3259_v9  ;;  %v2054_v9 = vadd.f32 %v5462_v4, %v2053_v15 }
 0x5f1   : > { %v2055_v3 = vadd.f32 %v5470_v5, %v2054_v9  ;;  %v2164_v9 = vld [vmem:[%s5902_s7 + $0x320] sm:$0xff] }
 0x5f2   : > { %3262 = vmatpush1.bf16.msra.mxu1 %v3261_v14  ;;  %v3283_v14 = vpack.c.bf16 %v2139_v39, %v2137_v60  ;;  %v3311_v39 = vpack.c.bf16 %v2167_v38, %v2165_v54 }
 0x5f3   : > { %3264 = vmatprep.subr.bf16.mxu1 %v3263_v44  ;;  %v2056_v46 = vrot.slane %v2055_v3, 4 }
 0x5f5   : > { %v2057_v44 = vadd.f32 %v2056_v46, %v2055_v3  ;;  %v2169_v3 = vld [vmem:[%s5902_s7 + $0x348] sm:$0xff]  ;;  %v2170_v46 = vld [vmem:[%s5902_s7 + $0x350] sm:$0xff] }
 0x5f6   : > { %3266 = vmatpush1.bf16.msra.mxu1 %v3265_v42  ;;  %v2145_v42 = vld [vmem:[%s5902_s7 + $0x288] sm:$0xff]  ;;  %v3317_v25 = vpack.c.bf16 %v2170_v46, %v2168_v58 }
 0x5f7   : > { %3268 = vmatprep.subr.bf16.mxu1 %v3267_v36  ;;  %v2058_v27 = vrot.slane %v2057_v44, 2  ;;  %v3291_v13 = vpack.c.bf16 %v2147_v0, %v2145_v42  ;;  %v2144_v36 = vld [vmem:[%s5902_s7 + $0x280] sm:$0xff]  ;;  %v2174_v0 = vld [vmem:[%s5902_s7 + $0x370] sm:$0xff] }
 0x5f8   : > { %v2172_v42 = vld [vmem:[%s5902_s7 + $0x360] sm:$0xff] }
 0x5f9   : > { %v2059_v8 = vadd.f32 %v2058_v27, %v2057_v44  ;;  %v2175_v44 = vld [vmem:[%s5902_s7 + $0x378] sm:$0xff]  ;;  %v2177_v27 = vld [vmem:[%s5902_s7 + $0x388] sm:$0xff] }
 0x5fa   : > { %3270 = vmatpush1.bf16.msra.mxu1 %v3269_v18  ;;  %v3293_v18 = vpack.c.bf16 %v2146_v37, %v2144_v36  ;;  %v2176_v37 = vld [vmem:[%s5902_s7 + $0x380] sm:$0xff] }
 0x5fb   : > { %3272 = vmatprep.subr.bf16.mxu1 %v3271_v51  ;;  %v2060_v20 = vrot.slane %v2059_v8, 1  ;;  %v2155_v51 = vld [vmem:[%s5902_s7 + $0x2d8] sm:$0xff] }
 0x5fc   : > { %v3299_v33 = vpack.c.bf16 %v2155_v51, %v2153_v21  ;;  %v2185_v21 = vld [vmem:[%s5902_s7 + $0x3c8] sm:$0xff]  ;;  %v2187_v51 = vld [vmem:[%s5902_s7 + $0x3d8] sm:$0xff] }
 0x5fd   : > { %v2061_v28 = vadd.f32 %v2060_v20, %v2059_v8  ;;  %v2183_v20 = vld [vmem:[%s5902_s7 + $0x3b8] sm:$0xff] }
 0x5fe   : > { %3274 = vmatpush1.bf16.msra.mxu1 %v3273_v62  ;;  %v2152_v62 = vld [vmem:[%s5902_s7 + $0x2c0] sm:$0xff] }
 0x5ff   : > { %3276 = vmatprep.subr.bf16.mxu1 %v3275_v11  ;;  %v2063_v52 = vmul.f32 0.03125, %v2061_v28  ;;  %v3301_v34 = vpack.c.bf16 %v2154_v63, %v2152_v62  ;;  %v2158_v11 = vld [vmem:[%s5902_s7 + $0x2f0] sm:$0xff]  ;;  %v3325_v28 = vpack.c.bf16 %v2178_v23, %v2176_v37  ;;  %v2184_v62 = vld [vmem:[%s5902_s7 + $0x3c0] sm:$0xff] }
 0x600   : > { %v3305_v15 = vpack.c.bf16 %v2158_v11, %v2156_v47  ;;  %v2186_v63 = vld [vmem:[%s5902_s7 + $0x3d0] sm:$0xff]  ;;  %v3335_v47 = vpack.c.bf16 %v2191_v48, %v2189_v30  ;;  %v2188_v11 = vld [vmem:[%s5902_s7 + $0x3e0] sm:$0xff] }
 0x601   : > { %2257 = vmatmul.mubr.f32.vlgmr.msra.gmra.mrb[36].mxu1 %v2034_v40  ;;  %v3307_v40 = vpack.c.bf16 %v2163_v35, %v2161_v59  ;;  %v2190_v59 = vld [vmem:[%s5902_s7 + $0x3f0] sm:$0xff] }
 0x602   : > { %3278 = vmatpush1.bf16.msra.mxu1 %v3277_v17  ;;  %2327 = vmatprep.mubr.f32.mxu1 %v2063_v52  ;;  %v2160_v17 = vld [vmem:[%s5902_s7 + $0x300] sm:$0xff]  ;;  %v3337_v54 = vpack.c.bf16 %v2190_v59, %v2188_v11 }
 0x603   : > { %3280 = vmatprep.subr.bf16.mxu1 %v3279_v32  ;;  %v2045_v32 = vadd.f32 %v5484_v1, %v2044_v16  ;;  %v3309_v60 = vpack.c.bf16 %v2162_v26, %v2160_v17 }
 0x605   : > { %v2046_v2 = vadd.f32 %v5492_v45, %v2045_v32 }
 0x606   : > { %3282 = vmatpush1.bf16.msra.mxu1 %v3281_v7  ;;  %v2166_v7 = vld [vmem:[%s5902_s7 + $0x330] sm:$0xff] }
 0x607   : > { %3284 = vmatprep.subr.bf16.mxu1 %v3283_v14  ;;  %v2171_v14 = vld [vmem:[%s5902_s7 + $0x358] sm:$0xff]  ;;  %v3313_v43 = vpack.c.bf16 %v2166_v7, %v2164_v9 }
 0x608   : > { %v3315_v57 = vpack.c.bf16 %v2171_v14, %v2169_v3 }
 0x60a   : > { %3286 = vmatpush1.bf16.msra.mxu1 %v3285_v22  ;;  %v2173_v22 = vld [vmem:[%s5902_s7 + $0x368] sm:$0xff] }
 0x60b   : > { %3288 = vmatprep.subr.bf16.mxu1 %v3287_v61  ;;  %v2047_v61 = vrot.slane %v2046_v2, 4  ;;  %v3319_v41 = vpack.c.bf16 %v2175_v44, %v2173_v22 }
 0x60d   : > { %v2048_v8 = vadd.f32 %v2047_v61, %v2046_v2 }
 0x60e   : > { %3290 = vmatpush1.bf16.msra.mxu1 %v3289_v19  ;;  %v2179_v19 = vld [vmem:[%s5902_s7 + $0x398] sm:$0xff] }
 0x60f   : > { %3292 = vmatprep.subr.bf16.mxu1 %v3291_v13  ;;  %v3321_v13 = vpack.c.bf16 %v2174_v0, %v2172_v42  ;;  %v3323_v36 = vpack.c.bf16 %v2179_v19, %v2177_v27 }
 0x612   : > { %3294 = vmatpush1.bf16.msra.mxu1 %v3293_v18  ;;  %v2049_v18 = vrot.slane %v2048_v8, 2 }
 0x613   : > { %3296 = vmatprep.subr.bf16.mxu1 %v3295_v50  ;;  %v3327_v50 = vpack.c.bf16 %v2183_v20, %v2181_v49 }
 0x614   : > { %v2050_v52 = vadd.f32 %v2049_v18, %v2048_v8 }
 0x616   : > { %3298 = vmatpush1.bf16.msra.mxu1 %v3297_v55  ;;  %v3329_v55 = vpack.c.bf16 %v2182_v56, %v2180_v29 }
 0x617   : > { %3300 = vmatprep.subr.bf16.mxu1 %v3299_v33  ;;  %v3331_v33 = vpack.c.bf16 %v2187_v51, %v2185_v21 }
 0x61a   : > { %3302 = vmatpush1.bf16.msra.mxu1 %v3301_v34  ;;  %v2051_v34 = vrot.slane %v2050_v52, 1 }
 0x61b   : > { %3304 = vmatprep.subr.bf16.mxu1 %v3303_v53  ;;  %v3333_v53 = vpack.c.bf16 %v2186_v63, %v2184_v62 }
 0x61c   : > { %v2052_v17 = vadd.f32 %v2051_v34, %v2050_v52 }
 0x61e   : > { %3306 = vmatpush1.bf16.msra.mxu1 %v3305_v15  ;;  %v2062_v7 = vmul.f32 0.03125, %v2052_v17 }
 0x61f   : > { %3308 = vmatprep.subr.bf16.mxu1 %v3307_v40 }
 0x622   : > { %3310 = vmatpush1.bf16.msra.mxu1 %v3309_v60 }
 0x623   : > { %3312 = vmatprep.subr.bf16.mxu1 %v3311_v39 }
 0x626   : > { %3314 = vmatpush1.bf16.msra.mxu1 %v3313_v43 }
 0x627   : > { %3316 = vmatprep.subr.bf16.mxu1 %v3315_v57 }
 0x62a   : > { %3318 = vmatpush1.bf16.msra.mxu1 %v3317_v25 }
 0x62b   : > { %3320 = vmatprep.subr.bf16.mxu1 %v3319_v41 }
 0x62e   : > { %3322 = vmatpush1.bf16.msra.mxu1 %v3321_v13 }
 0x62f   : > { %3324 = vmatprep.subr.bf16.mxu1 %v3323_v36 }
 0x632   : > { %3326 = vmatpush1.bf16.msra.mxu1 %v3325_v28 }
 0x633   : > { %3328 = vmatprep.subr.bf16.mxu1 %v3327_v50 }
 0x636   : > { %3330 = vmatpush1.bf16.msra.mxu1 %v3329_v55 }
 0x637   : > { %3332 = vmatprep.subr.bf16.mxu1 %v3331_v33 }
 0x63a   : > { %3334 = vmatpush1.bf16.msra.mxu1 %v3333_v53 }
 0x63b   : > { %3336 = vmatprep.subr.bf16.mxu1 %v3335_v47 }
 0x63e   : > { %3338 = vmatpush1.bf16.msra.mxu1 %v3337_v54 }
 0x641   : > { %2328 = vmatmul.mubr.f32.vlgmr.msra.gmra.mrb[36].mxu1 %v2062_v7 }
 0x685   : > { %v2893_v35 = vpop.f32.mrb[24].mxu0  ;;  %v1805_v16 = vpop.f32.mrb[8].mxu1 }
 0x686   : > { %v2894_v15 = vpop.f32.mrb[25].mxu0  ;;  %v1807_v40 = vpop.f32.mrb[9].mxu1 }
 0x687   : > { %v2895_v26 = vadd.f32 %v2894_v15, %v2893_v35 }
 0x689   : > { %v1806_v38 = vadd.f32 %v2895_v26, %v1805_v16  ;;  %v2896_v32 = vpop.f32.mrb[26].mxu0  ;;  %v1810_v60 = vpop.f32.mrb[10].mxu1 }
 0x68a   : > { %v2897_v39 = vpop.f32.mrb[27].mxu0  ;;  %v1812_v9 = vpop.f32.mrb[11].mxu1 }
 0x68b   : > { %v2898_v3 = vadd.f32 %v2897_v39, %v2896_v32  ;;  %v1874_v46 = vmax.f32 %v1806_v38, 0.0 }
 0x68d   : > { %v1811_v14 = vadd.f32 %v2898_v3, %v1810_v60  ;;  %v2899_v2 = vpop.f32.mrb[28].mxu0  ;;  %v1815_v43 = vpop.f32.mrb[12].mxu1 }
 0x68e   : > { %v2900_v57 = vpop.f32.mrb[29].mxu0  ;;  %v1817_v58 = vpop.f32.mrb[13].mxu1 }
 0x68f   : > { %v1875_v22 = vmax.f32 %v1811_v14, 0.0  ;;  %v2901_v44 = vadd.f32 %v2900_v57, %v2899_v2 }
 0x691   : > { %v3183_v61 = vpack.c.bf16 %v1875_v22, %v1874_v46  ;;  %v1816_v25 = vadd.f32 %v2901_v44, %v1815_v43  ;;  %v2902_v41 = vpop.f32.mrb[30].mxu0  ;;  %v1820_v42 = vpop.f32.mrb[14].mxu1 }
 0x692   : > { %v2903_v0 = vpop.f32.mrb[31].mxu0  ;;  %v1822_v27 = vpop.f32.mrb[15].mxu1 }
 0x693   : > { %v2904_v19 = vadd.f32 %v2903_v0, %v2902_v41  ;;  %3184 = vmatprep.subr.bf16.mxu0 %v3183_v61  ;;  %v1876_v49 = vmax.f32 %v1816_v25, 0.0 }
 0x694   : > { %3186 = vmatpush3.bf16.msra.mxu0 %v3183_v61 }
 0x695   : > { %v1821_v8 = vadd.f32 %v2904_v19, %v1820_v42  ;;  %v2905_v13 = vpop.f32.mrb[32].mxu0  ;;  %v1825_v36 = vpop.f32.mrb[16].mxu1 }
 0x696   : > { %v2906_v37 = vpop.f32.mrb[33].mxu0  ;;  %v1827_v23 = vpop.f32.mrb[17].mxu1 }
 0x697   : > { %v1877_v20 = vmax.f32 %v1821_v8, 0.0  ;;  %v2907_v18 = vadd.f32 %v2906_v37, %v2905_v13 }
 0x699   : > { %v3187_v28 = vpack.c.bf16 %v1877_v20, %v1876_v49  ;;  %v1826_v50 = vadd.f32 %v2907_v18, %v1825_v36  ;;  %v2908_v29 = vpop.f32.mrb[34].mxu0  ;;  %v1830_v56 = vpop.f32.mrb[18].mxu1 }
 0x69a   : > { %v2909_v21 = vpop.f32.mrb[35].mxu0  ;;  %v1832_v51 = vpop.f32.mrb[19].mxu1 }
 0x69b   : > { %v2910_v52 = vadd.f32 %v2909_v21, %v2908_v29  ;;  %3188 = vmatprep.subr.bf16.mxu0 %v3187_v28  ;;  %v1878_v48 = vmax.f32 %v1826_v50, 0.0 }
 0x69c   : > { %3190 = vmatpush3.bf16.msra.mxu0 %v3187_v28 }
 0x69d   : > { %v1831_v55 = vadd.f32 %v2910_v52, %v1830_v56  ;;  %v2911_v33 = vpop.f32.mrb[36].mxu0  ;;  %v1835_v62 = vpop.f32.mrb[20].mxu1 }
 0x69e   : > { %v2912_v63 = vpop.f32.mrb[37].mxu0  ;;  %v1837_v30 = vpop.f32.mrb[21].mxu1 }
 0x69f   : > { %v1879_v34 = vmax.f32 %v1831_v55, 0.0  ;;  %v2913_v53 = vadd.f32 %v2912_v63, %v2911_v33 }
 0x6a1   : > { %v3191_v47 = vpack.c.bf16 %v1879_v34, %v1878_v48  ;;  %v1836_v11 = vadd.f32 %v2913_v53, %v1835_v62  ;;  %v2914_v59 = vpop.f32.mrb[38].mxu0  ;;  %v1840_v35 = vpop.f32.mrb[22].mxu1 }
 0x6a2   : > { %v2915_v16 = vpop.f32.mrb[39].mxu0  ;;  %v1842_v15 = vpop.f32.mrb[23].mxu1 }
 0x6a3   : > { %v2916_v40 = vadd.f32 %v2915_v16, %v2914_v59  ;;  %3192 = vmatprep.subr.bf16.mxu0 %v3191_v47  ;;  %v1880_v60 = vmax.f32 %v1836_v11, 0.0  ;;  %v1889_v11 = vld [vmem:[%s5899_s4 + $0x8] sm:$0xff]  ;;  %v1890_v59 = vld [vmem:[%s5899_s4 + $0x10] sm:$0xff]  ;;  %v4048_v16 = vmov 0  }
 0x6a4   : > { %3194 = vmatpush3.bf16.msra.mxu0 %v3191_v47  ;;  %3838 = vset.pattern.permute.xlu1 %v4048_v16 }
 0x6a5   : > { %v1841_v17 = vadd.f32 %v2916_v40, %v1840_v35  ;;  %v2917_v26 = vpop.f32.mrb[40].mxu0  ;;  %v1845_v54 = vpop.f32.mrb[24].mxu1  ;;  %v1891_v35 = vld [vmem:[%s5899_s4 + $0x18] sm:$0xff]  ;;  %3839 = vset.pattern.permute.xlu0 %v4048_v16 }
 0x6a6   : > { %v2918_v38 = vpop.f32.mrb[41].mxu0  ;;  %v1847_v32 = vpop.f32.mrb[25].mxu1 }
 0x6a7   : > { %v1881_v39 = vmax.f32 %v1841_v17, 0.0  ;;  %v2919_v9 = vadd.f32 %v2918_v38, %v2917_v26  ;;  %v1991_v17 = vld [vmem:[%s5900_s5 + $0x8] sm:$0xff]  ;;  %v1990_v26 = vld [vmem:[%s5900_s5] sm:$0xff] }
 0x6a8   : > { %v1999_v38 = vld [vmem:[%s5901_s6 + $0x8] sm:$0xff] }
 0x6a9   : > { %v3195_v7 = vpack.c.bf16 %v1881_v39, %v1880_v60  ;;  %v1846_v3 = vadd.f32 %v2919_v9, %v1845_v54  ;;  %v2920_v14 = vpop.f32.mrb[42].mxu0  ;;  %v1850_v2 = vpop.f32.mrb[26].mxu1  ;;  %v1998_v39 = vld [vmem:[%s5901_s6] sm:$0xff] }
 0x6aa   : > { %v2921_v43 = vpop.f32.mrb[43].mxu0  ;;  %v1852_v57 = vpop.f32.mrb[27].mxu1 }
 0x6ab   : > { %v2922_v58 = vadd.f32 %v2921_v43, %v2920_v14  ;;  %3196 = vmatprep.subr.bf16.mxu0 %v3195_v7  ;;  %v1882_v41 = vmax.f32 %v1846_v3, 0.0  ;;  %v1992_v14 = vld [vmem:[%s5900_s5 + $0x10] sm:$0xff]  ;;  %v2001_v57 = vld [vmem:[%s5901_s6 + $0x18] sm:$0xff] }
 0x6ac   : > { %3198 = vmatpush3.bf16.msra.mxu0 %v3195_v7  ;;  %v1993_v7 = vld [vmem:[%s5900_s5 + $0x18] sm:$0xff] }
 0x6ad   : > { %v1851_v46 = vadd.f32 %v2922_v58, %v1850_v2  ;;  %v2923_v22 = vpop.f32.mrb[44].mxu0  ;;  %v1855_v44 = vpop.f32.mrb[28].mxu1 }
 0x6ae   : > { %v2924_v61 = vpop.f32.mrb[45].mxu0  ;;  %v1857_v25 = vpop.f32.mrb[29].mxu1 }
 0x6af   : > { %v1883_v42 = vmax.f32 %v1851_v46, 0.0  ;;  %v2925_v0 = vadd.f32 %v2924_v61, %v2923_v22 }
 0x6b1   : > { %v3199_v27 = vpack.c.bf16 %v1883_v42, %v1882_v41  ;;  %v1856_v19 = vadd.f32 %v2925_v0, %v1855_v44  ;;  %v2926_v8 = vpop.f32.mrb[46].mxu0  ;;  %v1860_v13 = vpop.f32.mrb[30].mxu1  ;;  %v2000_v44 = vld [vmem:[%s5901_s6 + $0x10] sm:$0xff] }
 0x6b2   : > { %v2927_v36 = vpop.f32.mrb[47].mxu0  ;;  %v1862_v37 = vpop.f32.mrb[31].mxu1 }
 0x6b3   : > { %v2928_v23 = vadd.f32 %v2927_v36, %v2926_v8  ;;  %3200 = vmatprep.subr.bf16.mxu0 %v3199_v27  ;;  %v1884_v29 = vmax.f32 %v1856_v19, 0.0 }
 0x6b4   : > { %3202 = vmatpush3.bf16.msra.mxu0 %v3199_v27 }
 0x6b5   : > { %v1861_v49 = vadd.f32 %v2928_v23, %v1860_v13  ;;  %v2929_v20 = vpop.f32.mrb[48].mxu0  ;;  %v1865_v18 = vpop.f32.mrb[32].mxu1 }
 0x6b6   : > { %v2930_v28 = vpop.f32.mrb[49].mxu0  ;;  %v1867_v50 = vpop.f32.mrb[33].mxu1 }
 0x6b7   : > { %v1885_v56 = vmax.f32 %v1861_v49, 0.0  ;;  %v2931_v21 = vadd.f32 %v2930_v28, %v2929_v20 }
 0x6b9   : > { %v3203_v51 = vpack.c.bf16 %v1885_v56, %v1884_v29  ;;  %v1866_v52 = vadd.f32 %v2931_v21, %v1865_v18  ;;  %v2932_v55 = vpop.f32.mrb[50].mxu0  ;;  %v1870_v33 = vpop.f32.mrb[34].mxu1 }
 0x6ba   : > { %v2933_v62 = vpop.f32.mrb[51].mxu0  ;;  %v1872_v63 = vpop.f32.mrb[35].mxu1 }
 0x6bb   : > { %v2934_v30 = vadd.f32 %v2933_v62, %v2932_v55  ;;  %3204 = vmatprep.subr.bf16.mxu0 %v3203_v51  ;;  %v1886_v34 = vmax.f32 %v1866_v52, 0.0 }
 0x6bc   : > { %3206 = vmatpush3.bf16.msra.mxu0 %v3203_v51 }
 0x6bd   : > { %v1871_v48 = vadd.f32 %v2934_v30, %v1870_v33  ;;  %v2335_v30 = vstv %s2334_s27  ;;  %s5816_s27 = scalar_lea.hbm %s5904_s9, %s2683_s12 }
 0x6bf   : > { %v1887_v53 = vmax.f32 %v1871_v48, 0.0 }
 0x6c1   : > { %v3207_v47 = vpack.c.bf16 %v1887_v53, %v1886_v34  ;;  %v2339_v34 = vstv %s2673_s28  ;;  %s2432_s28 = scalar_lea.sflag [#allocation9], %s5768_s30 }
 0x6c3   : > { %3208 = vmatprep.subr.bf16.mxu0 %v3207_v47 }
 0x6c4   : > { %3210 = vmatpush3.bf16.msra.mxu0 %v3207_v47 }
 0x6c7   : > { %2982 = vmatmul.mubr.msk.f32.vlgmr.msra.gmra.mrb[52].mxu0 %vm1892_vm8, %v1889_v11 }
 0x6c8   : > { %2984 = vmatprep.mubr.msk.f32.mxu0 %vm1892_vm8, %v1890_v59 }
 0x6cb   : > { %2985 = vmatmul.mubr.msk.f32.gmra.mrb[54].mxu0 %vm1892_vm8, %v1891_v35 }
 0x714   : > { %v2329_v15 = vpop.f32.mrb[36].mxu1 }
 0x715   : > { %v2331_v40 = vpop.f32.mrb[37].mxu1  ;;  %v2336_v48 = vmul.f32 %v2335_v30, %v2329_v15  ;;  %v2379_v15 = vshrl.u32 %v454_v12, 7 }
 0x716   : > { %v2337_v53 = vmul.f32 %v2335_v30, %v2331_v40 }
 0x717   : > { %v2340_v47 = vadd.f32 %v2339_v34, %v2336_v48 }
 0x718   : > { %v2341_v11 = vadd.f32 %v2339_v34, %v2337_v53 }
 0x719   : > { %v2342_v59 = vsub.f32 0.0, %v2340_v47 }
 0x71a   : > { %v2343_v35 = vsub.f32 0.0, %v2341_v11 }
 0x71b   : > { %v2344_v16 = vmul.f32 1.442695, %v2342_v59 }
 0x79a   : > { %v2983_v54 = vpop.f32.mrb[52].mxu0 }
 0x79b   : > { %v1995_v32 = vmul.f32 %v2983_v54, %v1991_v17  ;;  %v1971_v60 = vpop.f32.mrb[53].mxu0  ;;  %v2346_v17 = vmul.f32 1.442695, %v2343_v35 }
 0x79c   : > { %v1994_v9 = vmul.f32 %v1990_v26, %v1971_v60 }
 0x79d   : > { %v2003_v3 = vadd.f32 %v1999_v38, %v1995_v32 }
 0x79e   : > { %v2002_v2 = vadd.f32 %v1998_v39, %v1994_v9  ;;  %v2986_v43 = vpop.f32.mrb[54].mxu0 }
 0x79f   : > { %v2007_v58 = vsub.f32 0.0, %v2003_v3  ;;  %v1997_v46 = vmul.f32 %v2986_v43, %v1993_v7  ;;  %v1981_v22 = vpop.f32.mrb[55].mxu0  ;;  %v2380_v7 = vsub.s32 0, %v2379_v15 }
 0x7a0   : > { %v2006_v61 = vsub.f32 0.0, %v2002_v2  ;;  %v1996_v25 = vmul.f32 %v1992_v14, %v1981_v22 }
 0x7a1   : > { %v2012_v41 = vmul.f32 1.442695, %v2007_v58  ;;  %v2005_v42 = vadd.f32 %v2001_v57, %v1997_v46 }
 0x7a2   : > { %v2010_v0 = vmul.f32 1.442695, %v2006_v61  ;;  %v2004_v27 = vadd.f32 %v2000_v44, %v1996_v25 }
 0x7a3   : > { %3840 = vpow2.f32 %v2012_v41  ;;  %v2009_v19 = vsub.f32 0.0, %v2005_v42 }
 0x7a4   : > { %3842 = vpow2.f32 %v2010_v0  ;;  %v2008_v8 = vsub.f32 0.0, %v2004_v27 }
 0x7a5   : > { %v2016_v13 = vmul.f32 1.442695, %v2009_v19 }
 0x7a6   : > { %v2014_v36 = vmul.f32 1.442695, %v2008_v8 }
 0x7a7   : > { %3844 = vpow2.f32 %v2016_v13 }
 0x7a8   : > { %3846 = vpow2.f32 %v2014_v36 }
 0x7ad   : > { %v3841_v37 = vpop.eup %3840 }
 0x7ae   : > { %v3843_v23 = vpop.eup %3842  ;;  %v2019_v49 = vadd.f32 1.0, %v3841_v37 }
 0x7af   : > { %v2018_v20 = vadd.f32 1.0, %v3843_v23 }
 0x7b0   : > { %3848 = vrcp.f32 %v2019_v49 }
 0x7b1   : > { %v3845_v18 = vpop.eup %3844  ;;  %3850 = vrcp.f32 %v2018_v20 }
 0x7b2   : > { %v3847_v28 = vpop.eup %3846  ;;  %v2021_v50 = vadd.f32 1.0, %v3845_v18 }
 0x7b3   : > { %v2020_v29 = vadd.f32 1.0, %v3847_v28 }
 0x7b4   : > { %3852 = vrcp.f32 %v2021_v50 }
 0x7b5   : > { %3854 = vrcp.f32 %v2020_v29 }
 0x7b6   : > { %3856 = vpow2.f32 %v2344_v16 }
 0x7b7   : > { %3858 = vpow2.f32 %v2346_v17 }
 0x7ba   : > { %v3849_v56 = vpop.eup %3848 }
 0x7bb   : > { %v3851_v21 = vpop.eup %3850  ;;  %v2353_v51 = vmul.f32 0.5, %v3849_v56 }
 0x7bc   : > { %v2352_v52 = vmul.f32 0.5, %v3851_v21 }
 0x7bd   : > { %2365 = vperm.xlu1 %3838, %v2353_v51  }
 0x7be   : > { %v3853_v55 = vpop.eup %3852  ;;  %2360 = vperm.xlu0 %3839, %v2352_v52  }
 0x7bf   : > { %v3855_v33 = vpop.eup %3854  ;;  %v2355_v62 = vmul.f32 0.5, %v3853_v55 }
 0x7c0   : > { %v2354_v63 = vmul.f32 0.5, %v3855_v33  ;;  %v3857_v26 = vpop.eup %3856 }
 0x7c1   : > { %v3859_v54 = vpop.eup %3858  ;;  %v2348_v38 = vadd.f32 1.0, %v3857_v26 }
 0x7c2   : > { %2375 = vperm.xlu0 %3839, %v2355_v62   ;;  %2370 = vperm.xlu1 %3838, %v2354_v63   ;;  %v2349_v32 = vadd.f32 1.0, %v3859_v54 }
 0x7c3   : > { %3860 = vrcp.f32 %v2348_v38 }
 0x7c4   : > { %3862 = vrcp.f32 %v2349_v32 }
 0x7cd   : > { %v3861_v60 = vpop.eup %3860 }
 0x7ce   : > { %v3863_v39 = vpop.eup %3862  ;;  %v2356_v40 = vmul.f32 0.5, %v3861_v60 }
 0x7cf   : > { %v2357_v9 = vmul.f32 0.5, %v3863_v39 }
 0x7d0   : > { %v2381_v3 = vrot.slane %v2356_v40, %v2380_v7 }
 0x7d1   : > { %v2385_v14 = vrot.slane %v2357_v9, %v2380_v7 }
 0x83c   : > { %v2366_v2 = vpop.permute.xlu1 %2365 }
 0x83d   : > { %v2388_v43 = vadd.f32 %v2381_v3, %v2366_v2  ;;  %v2389_v57 = vadd.f32 %v2385_v14, %v2366_v2  ;;  %v2361_v58 = vpop.permute.xlu0 %2360 }
 0x83e   : > { %v2386_v46 = vadd.f32 %v2381_v3, %v2361_v58  ;;  %v2387_v22 = vadd.f32 %v2385_v14, %v2361_v58 }
 0x83f   : > { %v2396_v44 = vmul.f32 %v5489_v24, %v2388_v43  ;;  %v2397_v12 = vmul.f32 %v5467_v31, %v2389_v57 }
 0x840   : > { %v2394_v61 = vmul.f32 %v5481_v6, %v2386_v46  ;;  %v2395_v25 = vmul.f32 %v5459_v10, %v2387_v22 }
 0x841   : > { %v2404_v41 = vsub.f32 %v5489_v24, %v2396_v44  ;;  %v2405_v42 = vsub.f32 %v5467_v31, %v2397_v12  ;;  %2420 = vst [vmem:[%s5777_s29 + $0x10] sm:$0xff] %v2396_v44  ;;  %2421 = vst [vmem:[%s5777_s29 + $0x18] sm:$0xff] %v2397_v12  ;;  %v2376_v0 = vpop.permute.xlu0 %2375  ;;  %v2371_v27 = vpop.permute.xlu1 %2370 }
 0x842   : > { %v2402_v19 = vsub.f32 %v5481_v6, %v2394_v61  ;;  %v2403_v8 = vsub.f32 %v5459_v10, %v2395_v25  ;;  %2418 = vst [vmem:[%s5777_s29] sm:$0xff] %v2394_v61  ;;  %2419 = vst [vmem:[%s5777_s29 + $0x8] sm:$0xff] %v2395_v25  ;;  %v2392_v24 = vadd.f32 %v2381_v3, %v2376_v0 }
 0x843   : > { %v2393_v13 = vadd.f32 %v2385_v14, %v2376_v0  ;;  %2412 = vst [vmem:[%s5787_s20 + $0x10] sm:$0xff] %v2404_v41  ;;  %2413 = vst [vmem:[%s5787_s20 + $0x18] sm:$0xff] %v2405_v42  ;;  %v2390_v31 = vadd.f32 %v2381_v3, %v2371_v27  ;;  %v2391_v6 = vadd.f32 %v2385_v14, %v2371_v27 }
 0x844   : > { %2410 = vst [vmem:[%s5787_s20] sm:$0xff] %v2402_v19  ;;  %2411 = vst [vmem:[%s5787_s20 + $0x8] sm:$0xff] %v2403_v8  ;;  %v2400_v10 = vmul.f32 %v5492_v45, %v2392_v24 }
 0x845   : > { %v2401_v36 = vmul.f32 %v5470_v5, %v2393_v13  ;;  %v2398_v37 = vmul.f32 %v5484_v1, %v2390_v31  ;;  %v2399_v23 = vmul.f32 %v5462_v4, %v2391_v6 }
 0x846   : > { %v2408_v49 = vsub.f32 %v5492_v45, %v2400_v10  ;;  %2424 = vst [vmem:[%s5777_s29 + $0x30] sm:$0xff] %v2400_v10 }
 0x847   : > { %v2409_v20 = vsub.f32 %v5470_v5, %v2401_v36  ;;  %2425 = vst [vmem:[%s5777_s29 + $0x38] sm:$0xff] %v2401_v36  ;;  %v2406_v18 = vsub.f32 %v5484_v1, %v2398_v37  ;;  %v2407_v28 = vsub.f32 %v5462_v4, %v2399_v23  ;;  %2422 = vst [vmem:[%s5777_s29 + $0x20] sm:$0xff] %v2398_v37 }
 0x848   : > { %2423 = vst [vmem:[%s5777_s29 + $0x28] sm:$0xff] %v2399_v23  ;;  %2416 = vst [vmem:[%s5787_s20 + $0x30] sm:$0xff] %v2408_v49 }
 0x849   : > { %2417 = vst [vmem:[%s5787_s20 + $0x38] sm:$0xff] %v2409_v20 }
 0x84a   : > { %3936 = shalt.err (!%p3933_p2)
}
 0x84b   : > { %s3937_s29 = scalar_lea.hbm %s5801_s25, 1024  ;;  %s3941_s8 = scalar_lea.hbm %s5905_s10, 2048 }
 0x84c   : > { %p3938_p3 = scmp.ne.s32.totalorder %s5801_s25, %s3937_s29  ;;  %p3942_p7 = scmp.lt.u32.totalorder %s5801_s25, %s5905_s10 }
 0x84d   : > { %p3943_p8 = scmp.lt.u32.totalorder %s3941_s8, %s3937_s29  ;;  %p3945_p12 = scmp.lt.u32.totalorder %s3937_s29, %s5801_s25 }
 0x84e   : > { %p3939_p4 = pnand %p3938_p3, %p5939_p13 }
 0x84f   : > { %p3944_p11 = por %p3943_p8, %p3942_p7 }
 0x850   : > { %p3940_p0 = pneg %p3939_p4 }
 0x851   : > { %p3946_p1 = por %p3945_p12, %p3944_p11 }
 0x853   : > { %p3947_p6 = pnand %p3946_p1, %p3940_p0 }
 0x855   : > { %3950 = shalt.err (!%p3947_p6)
}
 0x856   : > { %s4050_s1 = smov 256   ;;  %s4051_s11 = smov 16   ;;  %2414 = vst [vmem:[%s5787_s20 + $0x20] sm:$0xff] %v2406_v18  ;;  %2415 = vst [vmem:[%s5787_s20 + $0x28] sm:$0xff] %v2407_v28 }
 0x857   : > { %3350 = dma.vmem_to_hbm [thread:$0]  (%p5939_p13), %s5803_s18, 1024, %s5801_s25, %s2432_s28, %s4050_s1, %s4050_s1, %s4051_s11  }
 0x858   : > { %s2427_s29 = scalar_lea.sflag [#allocation4], %s5768_s30  ;;  %s3951_s12 = scalar_lea.vmem %s5818_s26, 1024 }
 0x859   : > { %p3952_p5 = scmp.ne.s32.totalorder %s5818_s26, %s3951_s12  ;;  %s4052_s0 = smov [#allocation7]  }
 0x85a   : > { %s3955_s8 = sshll.u32 %s4052_s0, 4  ;;  %s3956_s8 = int_to_ptr.vmem [resolvable:$false] %s3955_s8 }
 0x85b   : > { %p3953_p9 = pnand %p3952_p5, %p5939_p13  ;;  %s3957_s17 = scalar_lea.vmem %s3956_s8, 2048 }
 0x85c   : > { %p3958_p2 = scmp.lt.s32.totalorder %s5818_s26, %s3956_s8  ;;  %p3959_p3 = scmp.lt.s32.totalorder %s3957_s17, %s3951_s12 }
 0x85d   : > { %p3954_p10 = pneg %p3953_p9 }
 0x85e   : > { %p3960_p4 = por %p3959_p3, %p3958_p2 }
 0x860   : > { %p3961_p0 = pnand %p3960_p4, %p3954_p10 }
 0x862   : > { %3964 = shalt.err (!%p3961_p0)
}
 0x863   : > { %s3965_s18 = scalar_lea.hbm %s5816_s27, 1024  ;;  %s3969_s28 = scalar_lea.hbm %s5904_s9, 2048 }
 0x864   : > { %p3966_p7 = scmp.ne.s32.totalorder %s5816_s27, %s3965_s18  ;;  %p3970_p12 = scmp.lt.u32.totalorder %s5816_s27, %s5904_s9 }
 0x865   : > { %p3971_p1 = scmp.lt.u32.totalorder %s3969_s28, %s3965_s18  ;;  %p3973_p5 = scmp.lt.u32.totalorder %s3965_s18, %s5816_s27 }
 0x866   : > { %p3967_p8 = pnand %p3966_p7, %p5939_p13 }
 0x867   : > { %p3972_p6 = por %p3971_p1, %p3970_p12 }
 0x868   : > { %p3968_p11 = pneg %p3967_p8 }
 0x869   : > { %p3974_p9 = por %p3973_p5, %p3972_p6 }
 0x86b   : > { %p3975_p10 = pnand %p3974_p9, %p3968_p11 }
 0x86d   : > { %3978 = shalt.err (!%p3975_p10)
}
 0x86e   : > { %3349 = dma.vmem_to_hbm [thread:$0]  (%p5939_p13), %s5818_s26, 1024, %s5816_s27, %s2427_s29, %s4050_s1, %s4050_s1, %s4051_s11  }
 0x86f PF: > { %p3371_p2 = scmp.ge.s32.totalorder %s4025_s16, 2  ;;  %s2476_s12 = sand.u32 1, %s4013_s13  }
 0x870   : > { %p5940_p3 = scmp.ne.s32.totalorder %s5923_s24, 0  ;;  %s2477_s8 = scalar_lea.sflag [#allocation4], %s2476_s12 }
 0x872   : > { %p3361_p4 = pnand %p3371_p2, %p5940_p3 }
 0x874   : > { %4004 = dma.done.wait (!%p3361_p4), %s2477_s8, 1024  }
 0x875   : > { %4006 = vsyncadd (!%p3361_p4), %s2477_s8, 4294966272  ;;  %s2486_s23 = scalar_lea.sflag [#allocation9], %s2476_s12 }
 0x876   : > { %4008 = dma.done.wait (!%p3361_p4), %s2486_s23, 1024  }
 0x877   : > { %4010 = vsyncadd (!%p3361_p4), %s2486_s23, 4294966272  ;;  %p26_p13 = scmp.ge.s32.totalorder %s4133_s19, 4   ;;  %s5941_s13 = smov %s4017_s14 }
 0x878   : > { %s5942_s14 = smov %s4021_s15  ;;  %s5943_s15 = smov %s4144_s22 }
 0x879   : > { %s5944_s16 = smov %s4133_s19  ;;  %28 = sbr.rel (!%p26_p13) target bundleno = 11 (0xb), region = 120 }
 0x880   :  { %2491 = vsyncpa [#allocation3], 1 }
 0x881   :  { %2493 = vsyncpa [#allocation3 + $0x1], 1 }
 0x882   :  { %2494 = vsyncpa [#allocation4], 1 }
 0x883   :  { %2496 = vsyncpa [#allocation4 + $0x1], 1 }
 0x884   :  { %2497 = vsyncpa [#allocation9], 1 }
 0x885   :  { %2499 = vsyncpa [#allocation9 + $0x1], 1 }
 0x886   :  { %2500 = vsyncpa [#allocation5], 1 }
 0x887   :  { %2502 = vsyncpa [#allocation5 + $0x1], 1 }

</bundles_post_ra>
